<compile_context>
chip_gen: v6e
topology: v6e:2x2x1
jax: 0.10.0
libtpu: 0.0.40
codegen_flags: <defaults>
</compile_context>

<pallas_src>
import jax
import jax.numpy as jnp
from jax.experimental import pallas as pl
from jax.experimental.pallas import tpu as pltpu

INPUT_DIM = 944
HIDDEN_DIMS = (630, 270, 630, 944)
OUTPUT_DIM = 1
_WO_PAD_LANES = 128  # final-layer weight padded to a full lane tile for the MXU


def _round_up(n, m):
    return ((n + m - 1) // m) * m


def _cdiv(a, b):
    return -(-a // b)


def dbn_mlp_kernel(x_ref,
                   w1_ref, b1_ref,
                   w2_ref, b2_ref,
                   w3_ref, b3_ref,
                   w4_ref, b4_ref,
                   wo_ref, bo_ref,
                   o_ref):
    """Fused 5-layer MLP forward on one batch tile.

    Hidden matmuls: bf16 inputs, f32 accumulation on the MXU; ReLU is fused
    with the cast back to bf16 so interlayer activations stay half-width.
    Final 944->1 layer: bf16 MXU matvec against a (944, 128) zero-padded
    weight slab; lane 0 of the result is the logit.
    """
    h = x_ref[...].astype(jnp.bfloat16)

    h = jnp.dot(h, w1_ref[...], preferred_element_type=jnp.float32) + b1_ref[...]
    h = jnp.maximum(h, 0.0).astype(jnp.bfloat16)

    h = jnp.dot(h, w2_ref[...], preferred_element_type=jnp.float32) + b2_ref[...]
    h = jnp.maximum(h, 0.0).astype(jnp.bfloat16)

    h = jnp.dot(h, w3_ref[...], preferred_element_type=jnp.float32) + b3_ref[...]
    h = jnp.maximum(h, 0.0).astype(jnp.bfloat16)

    h = jnp.dot(h, w4_ref[...], preferred_element_type=jnp.float32) + b4_ref[...]
    h = jnp.maximum(h, 0.0).astype(jnp.bfloat16)

    # wo_ref is (944, 128) bf16 with real weights in column 0, zeros elsewhere.
    logits_full = jnp.dot(h, wo_ref[...], preferred_element_type=jnp.float32)
    logits = logits_full[:, 0:1] + bo_ref[...]
    o_ref[...] = jax.nn.sigmoid(logits)


def dbn_like_forward(x, params, *, block_batch=512, vmem_limit_bytes=48 << 20):
    """params: list of (W, b) with W as (in_features, out_features), f32.

    Hidden weights are fed to the MXU as bf16 (halves HBM weight bytes); the
    final (944, 1) weight is zero-padded to a lane-dense (944, 128) bf16 slab.
    """
    batch = x.shape[0]
    n_layers = len(params)

    flat = []
    for i, (w, b) in enumerate(params):
        if i < n_layers - 1:
            flat.append(w.astype(jnp.bfloat16))
        else:
            wo_pad = jnp.pad(w, ((0, 0), (0, _WO_PAD_LANES - w.shape[1])))
            flat.append(wo_pad.astype(jnp.bfloat16))           # (944, 128)
        flat.append(b.astype(jnp.float32))

    # Even batch tiling: bound padding waste to <8 rows per tile, and keep at
    # least 2 grid steps for moderately large batches (v7x megacore).
    num_tiles = max(1, _cdiv(batch, block_batch))
    if num_tiles == 1 and batch > 256:
        num_tiles = 2
    tb = _round_up(_cdiv(batch, num_tiles), 8)
    padded = tb * num_tiles
    if padded != batch:
        x = jnp.pad(x, ((0, padded - batch), (0, 0)))
    grid = (num_tiles,)

    in_specs = [pl.BlockSpec((tb, INPUT_DIM), lambda i: (i, 0))]
    for arr in flat:
        # Constant index_map: weight / bias block is fetched once and reused
        # across all batch-grid iterations. Single-buffered -> no wasted VMEM.
        in_specs.append(
            pl.BlockSpec(arr.shape, lambda i: (0, 0),
                         pipeline_mode=pl.Buffered(1)))
    out_spec = pl.BlockSpec((tb, OUTPUT_DIM), lambda i: (i, 0))

    out = pl.pallas_call(
        dbn_mlp_kernel,
        out_shape=jax.ShapeDtypeStruct((padded, OUTPUT_DIM), jnp.float32),
        grid=grid,
        in_specs=in_specs,
        out_specs=out_spec,
        compiler_params=pltpu.CompilerParams(
            dimension_semantics=("parallel",),
            vmem_limit_bytes=vmem_limit_bytes,
        ),
    )(x, *flat)
    return out[:batch]


def init_params(key):
    """Deterministic PyTorch-Linear-style init (uniform +/- 1/sqrt(fan_in)).

    Returns weights as (in_features, out_features) so the kernel does x @ W + b.
    """
    dims = [INPUT_DIM, *HIDDEN_DIMS, OUTPUT_DIM]
    params = []
    for i in range(len(dims) - 1):
        fan_in, fan_out = dims[i], dims[i + 1]
        key, kw, kb = jax.random.split(key, 3)
        bound = 1.0 / jnp.sqrt(jnp.float32(fan_in))
        w = jax.random.uniform(kw, (fan_in, fan_out), jnp.float32, -bound, bound)
        b = jax.random.uniform(kb, (1, fan_out), jnp.float32, -bound, bound)
        params.append((w, b))
    return params


def reference_forward(x, params):
    """Pure-JAX reference mirroring the kernel's bf16-weight / f32-accumulate scheme."""
    h = x
    for w, b in params[:-1]:
        h = jnp.dot(h.astype(jnp.bfloat16), w.astype(jnp.bfloat16),
                    preferred_element_type=jnp.float32) + b
        h = jnp.maximum(h, 0.0)
    wo, bo = params[-1]
    logits = jnp.dot(h.astype(jnp.bfloat16), wo.astype(jnp.bfloat16),
                     preferred_element_type=jnp.float32) + bo
    return jax.nn.sigmoid(logits)


if __name__ == "__main__":
    key = jax.random.PRNGKey(0)
    key, kx = jax.random.split(key)

    batch = 8
    x = jax.random.normal(kx, (batch, INPUT_DIM), jnp.float32)
    params = init_params(key)

    out = dbn_like_forward(x, params)
    out = jax.block_until_ready(out)

    ref = reference_forward(x, params)
    assert out.shape == (batch, OUTPUT_DIM), out.shape
    assert jnp.allclose(out, ref, atol=1e-3, rtol=1e-3), (
        f"max abs err {jnp.max(jnp.abs(out - ref))}"
    )

    print("KERNEL_OK")
</pallas_src>

<mosaic_0001>
module attributes {stable_mosaic.version = 11 : i64} {
  func.func @dbn_mlp_kernel(%arg0: i32, %arg1: memref<8x944xf32, #tpu.memory_space<vmem>>, %arg2: memref<944x630xbf16, #tpu.memory_space<vmem>>, %arg3: memref<1x630xf32, #tpu.memory_space<vmem>>, %arg4: memref<630x270xbf16, #tpu.memory_space<vmem>>, %arg5: memref<1x270xf32, #tpu.memory_space<vmem>>, %arg6: memref<270x630xbf16, #tpu.memory_space<vmem>>, %arg7: memref<1x630xf32, #tpu.memory_space<vmem>>, %arg8: memref<630x944xbf16, #tpu.memory_space<vmem>>, %arg9: memref<1x944xf32, #tpu.memory_space<vmem>>, %arg10: memref<944x128xbf16, #tpu.memory_space<vmem>>, %arg11: memref<1x1xf32, #tpu.memory_space<vmem>>, %arg12: memref<8x1xf32, #tpu.memory_space<vmem>>) attributes {dimension_semantics = [#tpu.dimension_semantics<parallel>], iteration_bounds = array<i64: 1>, scalar_prefetch = 0 : i64, scratch_operands = 0 : i64, tpu.core_type = #tpu.core_type<tc>, window_params = [{transform_indices = @transform_0, window_bounds = array<i64: 8, 944>}, {pipeline_mode = #tpu.pipeline_mode<synchronous>, transform_indices = @transform_1, window_bounds = array<i64: 944, 630>}, {pipeline_mode = #tpu.pipeline_mode<synchronous>, transform_indices = @transform_2, window_bounds = array<i64: 1, 630>}, {pipeline_mode = #tpu.pipeline_mode<synchronous>, transform_indices = @transform_3, window_bounds = array<i64: 630, 270>}, {pipeline_mode = #tpu.pipeline_mode<synchronous>, transform_indices = @transform_4, window_bounds = array<i64: 1, 270>}, {pipeline_mode = #tpu.pipeline_mode<synchronous>, transform_indices = @transform_5, window_bounds = array<i64: 270, 630>}, {pipeline_mode = #tpu.pipeline_mode<synchronous>, transform_indices = @transform_6, window_bounds = array<i64: 1, 630>}, {pipeline_mode = #tpu.pipeline_mode<synchronous>, transform_indices = @transform_7, window_bounds = array<i64: 630, 944>}, {pipeline_mode = #tpu.pipeline_mode<synchronous>, transform_indices = @transform_8, window_bounds = array<i64: 1, 944>}, {pipeline_mode = #tpu.pipeline_mode<synchronous>, transform_indices = @transform_9, window_bounds = array<i64: 944, 128>}, {pipeline_mode = #tpu.pipeline_mode<synchronous>, transform_indices = @transform_10, window_bounds = array<i64: 1, 1>}, {transform_indices = @transform_11, window_bounds = array<i64: 8, 1>}]} {
    %c0 = arith.constant 0 : index
    %c0_0 = arith.constant 0 : index
    %0 = vector.load %arg1[%c0, %c0_0] : memref<8x944xf32, #tpu.memory_space<vmem>>, vector<8x944xf32>
    %1 = arith.truncf %0 : vector<8x944xf32> to vector<8x944xbf16>
    %c0_1 = arith.constant 0 : index
    %c0_2 = arith.constant 0 : index
    %2 = vector.load %arg2[%c0_1, %c0_2] : memref<944x630xbf16, #tpu.memory_space<vmem>>, vector<944x630xbf16>
    %cst = arith.constant dense<0.000000e+00> : vector<8x630xf32>
    %3 = tpu.matmul %1, %2, %cst {dimension_numbers = #tpu.dot_dimension_numbers<[1], [0], [0], [1], [0, 0, 1, 1], [], []>} : vector<8x944xbf16>, vector<944x630xbf16>, vector<8x630xf32> -> vector<8x630xf32>
    %c0_3 = arith.constant 0 : index
    %c0_4 = arith.constant 0 : index
    %4 = vector.load %arg3[%c0_3, %c0_4] : memref<1x630xf32, #tpu.memory_space<vmem>>, vector<1x630xf32>
    %5 = vector.broadcast %4 : vector<1x630xf32> to vector<8x630xf32>
    %6 = arith.addf %3, %5 : vector<8x630xf32>
    %cst_5 = arith.constant 0.000000e+00 : f32
    %7 = vector.broadcast %cst_5 : f32 to vector<8x630xf32>
    %8 = arith.maximumf %6, %7 : vector<8x630xf32>
    %9 = arith.truncf %8 : vector<8x630xf32> to vector<8x630xbf16>
    %c0_6 = arith.constant 0 : index
    %c0_7 = arith.constant 0 : index
    %10 = vector.load %arg4[%c0_6, %c0_7] : memref<630x270xbf16, #tpu.memory_space<vmem>>, vector<630x270xbf16>
    %cst_8 = arith.constant dense<0.000000e+00> : vector<8x270xf32>
    %11 = tpu.matmul %9, %10, %cst_8 {dimension_numbers = #tpu.dot_dimension_numbers<[1], [0], [0], [1], [0, 0, 1, 1], [], []>} : vector<8x630xbf16>, vector<630x270xbf16>, vector<8x270xf32> -> vector<8x270xf32>
    %c0_9 = arith.constant 0 : index
    %c0_10 = arith.constant 0 : index
    %12 = vector.load %arg5[%c0_9, %c0_10] : memref<1x270xf32, #tpu.memory_space<vmem>>, vector<1x270xf32>
    %13 = vector.broadcast %12 : vector<1x270xf32> to vector<8x270xf32>
    %14 = arith.addf %11, %13 : vector<8x270xf32>
    %cst_11 = arith.constant 0.000000e+00 : f32
    %15 = vector.broadcast %cst_11 : f32 to vector<8x270xf32>
    %16 = arith.maximumf %14, %15 : vector<8x270xf32>
    %17 = arith.truncf %16 : vector<8x270xf32> to vector<8x270xbf16>
    %c0_12 = arith.constant 0 : index
    %c0_13 = arith.constant 0 : index
    %18 = vector.load %arg6[%c0_12, %c0_13] : memref<270x630xbf16, #tpu.memory_space<vmem>>, vector<270x630xbf16>
    %cst_14 = arith.constant dense<0.000000e+00> : vector<8x630xf32>
    %19 = tpu.matmul %17, %18, %cst_14 {dimension_numbers = #tpu.dot_dimension_numbers<[1], [0], [0], [1], [0, 0, 1, 1], [], []>} : vector<8x270xbf16>, vector<270x630xbf16>, vector<8x630xf32> -> vector<8x630xf32>
    %c0_15 = arith.constant 0 : index
    %c0_16 = arith.constant 0 : index
    %20 = vector.load %arg7[%c0_15, %c0_16] : memref<1x630xf32, #tpu.memory_space<vmem>>, vector<1x630xf32>
    %21 = vector.broadcast %20 : vector<1x630xf32> to vector<8x630xf32>
    %22 = arith.addf %19, %21 : vector<8x630xf32>
    %cst_17 = arith.constant 0.000000e+00 : f32
    %23 = vector.broadcast %cst_17 : f32 to vector<8x630xf32>
    %24 = arith.maximumf %22, %23 : vector<8x630xf32>
    %25 = arith.truncf %24 : vector<8x630xf32> to vector<8x630xbf16>
    %c0_18 = arith.constant 0 : index
    %c0_19 = arith.constant 0 : index
    %26 = vector.load %arg8[%c0_18, %c0_19] : memref<630x944xbf16, #tpu.memory_space<vmem>>, vector<630x944xbf16>
    %cst_20 = arith.constant dense<0.000000e+00> : vector<8x944xf32>
    %27 = tpu.matmul %25, %26, %cst_20 {dimension_numbers = #tpu.dot_dimension_numbers<[1], [0], [0], [1], [0, 0, 1, 1], [], []>} : vector<8x630xbf16>, vector<630x944xbf16>, vector<8x944xf32> -> vector<8x944xf32>
    %c0_21 = arith.constant 0 : index
    %c0_22 = arith.constant 0 : index
    %28 = vector.load %arg9[%c0_21, %c0_22] : memref<1x944xf32, #tpu.memory_space<vmem>>, vector<1x944xf32>
    %29 = vector.broadcast %28 : vector<1x944xf32> to vector<8x944xf32>
    %30 = arith.addf %27, %29 : vector<8x944xf32>
    %cst_23 = arith.constant 0.000000e+00 : f32
    %31 = vector.broadcast %cst_23 : f32 to vector<8x944xf32>
    %32 = arith.maximumf %30, %31 : vector<8x944xf32>
    %33 = arith.truncf %32 : vector<8x944xf32> to vector<8x944xbf16>
    %c0_24 = arith.constant 0 : index
    %c0_25 = arith.constant 0 : index
    %34 = vector.load %arg10[%c0_24, %c0_25] : memref<944x128xbf16, #tpu.memory_space<vmem>>, vector<944x128xbf16>
    %cst_26 = arith.constant dense<0.000000e+00> : vector<8x128xf32>
    %35 = tpu.matmul %33, %34, %cst_26 {dimension_numbers = #tpu.dot_dimension_numbers<[1], [0], [0], [1], [0, 0, 1, 1], [], []>} : vector<8x944xbf16>, vector<944x128xbf16>, vector<8x128xf32> -> vector<8x128xf32>
    %36 = vector.extract_strided_slice %35 {offsets = [0, 0], sizes = [8, 1], strides = [1, 1]} : vector<8x128xf32> to vector<8x1xf32>
    %c0_27 = arith.constant 0 : index
    %c0_28 = arith.constant 0 : index
    %37 = vector.load %arg11[%c0_27, %c0_28] : memref<1x1xf32, #tpu.memory_space<vmem>>, vector<1x1xf32>
    %38 = vector.broadcast %37 : vector<1x1xf32> to vector<8x1xf32>
    %39 = arith.addf %36, %38 : vector<8x1xf32>
    %40 = arith.negf %39 : vector<8x1xf32>
    %41 = math.exp %40 : vector<8x1xf32>
    %cst_29 = arith.constant 1.000000e+00 : f32
    %42 = vector.broadcast %cst_29 : f32 to vector<8x1xf32>
    %43 = arith.addf %42, %41 : vector<8x1xf32>
    %44 = arith.divf %42, %43 : vector<8x1xf32>
    %c0_30 = arith.constant 0 : index
    %c0_31 = arith.constant 0 : index
    %45 = vector.load %arg12[%c0_30, %c0_31] : memref<8x1xf32, #tpu.memory_space<vmem>>, vector<8x1xf32>
    tpu.vector_store %arg12[%c0_30, %c0_31], %44 {strides = array<i32>} : memref<8x1xf32, #tpu.memory_space<vmem>>, vector<8x1xf32>,
    return
  }
  func.func @transform_0(%arg0: i32) -> (i32, i32) {
    %c0_i32 = arith.constant 0 : i32
    %c0_i32_0 = arith.constant 0 : i32
    return %arg0, %c0_i32 : i32, i32
  }
  func.func @transform_1(%arg0: i32) -> (i32, i32) {
    %c0_i32 = arith.constant 0 : i32
    %c0_i32_0 = arith.constant 0 : i32
    %c0_i32_1 = arith.constant 0 : i32
    return %c0_i32, %c0_i32_0 : i32, i32
  }
  func.func @transform_2(%arg0: i32) -> (i32, i32) {
    %c0_i32 = arith.constant 0 : i32
    %c0_i32_0 = arith.constant 0 : i32
    %c0_i32_1 = arith.constant 0 : i32
    return %c0_i32, %c0_i32_0 : i32, i32
  }
  func.func @transform_3(%arg0: i32) -> (i32, i32) {
    %c0_i32 = arith.constant 0 : i32
    %c0_i32_0 = arith.constant 0 : i32
    %c0_i32_1 = arith.constant 0 : i32
    return %c0_i32, %c0_i32_0 : i32, i32
  }
  func.func @transform_4(%arg0: i32) -> (i32, i32) {
    %c0_i32 = arith.constant 0 : i32
    %c0_i32_0 = arith.constant 0 : i32
    %c0_i32_1 = arith.constant 0 : i32
    return %c0_i32, %c0_i32_0 : i32, i32
  }
  func.func @transform_5(%arg0: i32) -> (i32, i32) {
    %c0_i32 = arith.constant 0 : i32
    %c0_i32_0 = arith.constant 0 : i32
    %c0_i32_1 = arith.constant 0 : i32
    return %c0_i32, %c0_i32_0 : i32, i32
  }
  func.func @transform_6(%arg0: i32) -> (i32, i32) {
    %c0_i32 = arith.constant 0 : i32
    %c0_i32_0 = arith.constant 0 : i32
    %c0_i32_1 = arith.constant 0 : i32
    return %c0_i32, %c0_i32_0 : i32, i32
  }
  func.func @transform_7(%arg0: i32) -> (i32, i32) {
    %c0_i32 = arith.constant 0 : i32
    %c0_i32_0 = arith.constant 0 : i32
    %c0_i32_1 = arith.constant 0 : i32
    return %c0_i32, %c0_i32_0 : i32, i32
  }
  func.func @transform_8(%arg0: i32) -> (i32, i32) {
    %c0_i32 = arith.constant 0 : i32
    %c0_i32_0 = arith.constant 0 : i32
    %c0_i32_1 = arith.constant 0 : i32
    return %c0_i32, %c0_i32_0 : i32, i32
  }
  func.func @transform_9(%arg0: i32) -> (i32, i32) {
    %c0_i32 = arith.constant 0 : i32
    %c0_i32_0 = arith.constant 0 : i32
    %c0_i32_1 = arith.constant 0 : i32
    return %c0_i32, %c0_i32_0 : i32, i32
  }
  func.func @transform_10(%arg0: i32) -> (i32, i32) {
    %c0_i32 = arith.constant 0 : i32
    %c0_i32_0 = arith.constant 0 : i32
    %c0_i32_1 = arith.constant 0 : i32
    return %c0_i32, %c0_i32_0 : i32, i32
  }
  func.func @transform_11(%arg0: i32) -> (i32, i32) {
    %c0_i32 = arith.constant 0 : i32
    %c0_i32_0 = arith.constant 0 : i32
    return %arg0, %c0_i32 : i32, i32
  }
}

</mosaic_0001>

<bundles_post_ra>
// kernel: tpu_custom_call.1
= control target key start
LH: loop header
LB: loop body
LE: loop exit
PB: predicated region body
PF: predicated region fallthrough
CT: control target
= control target key end

     0   :  { %vm1972_vm0 = vcmask 392192   ;;  %vm3285_vm1 = vcmask 1042432   ;;  %vm9415_vm2 = vmmov 0   ;;  %vm3281_vm3 = vcmask 965632   ;;  %s12433_s1 = inlined_call_operand.vmem [shape: bf16[944,630], index: 1, kind: input, shape index: {}]   ;;  %s12434_s0 = inlined_call_operand.vmem [shape: f32[8,944], index: 0, kind: input, shape index: {}]   ;;  %s12435_s3 = inlined_call_operand.vmem [shape: bf16[630,270], index: 3, kind: input, shape index: {}]   ;;  %s12436_s2 = inlined_call_operand.vmem [shape: f32[1,630], index: 2, kind: input, shape index: {}]   ;;  %s12437_s5 = inlined_call_operand.vmem [shape: bf16[270,630], index: 5, kind: input, shape index: {}]   ;;  %s12438_s4 = inlined_call_operand.vmem [shape: f32[1,270], index: 4, kind: input, shape index: {}]   ;;  %s12439_s7 = inlined_call_operand.vmem [shape: bf16[630,944], index: 7, kind: input, shape index: {}]   ;;  %s12440_s6 = inlined_call_operand.vmem [shape: f32[1,630], index: 6, kind: input, shape index: {}]   ;;  %s12441_s9 = inlined_call_operand.vmem [shape: bf16[944,128], index: 9, kind: input, shape index: {}]   ;;  %s12442_s8 = inlined_call_operand.vmem [shape: f32[1,944], index: 8, kind: input, shape index: {}]   ;;  %s12443_s10 = inlined_call_operand.<no memory space> [shape: f32[1,1], index: 10, kind: input, shape index: {}]   ;;  %s12444_s11 = inlined_call_operand.vmem [shape: f32[8,1], index: 11, kind: output, shape index: {}]  }
   0x1   :  { %v8651_v0 = vld [vmem:[%s12433_s1 + $0x11c] ss:$20 sps:$4 sm:$0xff]   ;;  %v8655_v2 = vld [vmem:[%s12433_s1 + $0x118] ss:$20 sps:$4 sm:$0xff]   ;;  %v8657_v4 = vld [vmem:[%s12433_s1 + $0xf4] ss:$20 sps:$4 sm:$0xff]  }
   0x2   :  { %v8653_v1 = vld [vmem:[%s12433_s1 + $0x39c] ss:$20 sps:$4 sm:$0xff]   ;;  %1976 = vmatprep.subr.bf16.mxu0 %v8651_v0  ;;  %v8656_v3 = vld [vmem:[%s12433_s1 + $0x398] ss:$20 sps:$4 sm:$0xff]   ;;  %v8659_v5 = vld [vmem:[%s12433_s1 + $0x374] ss:$20 sps:$4 sm:$0xff]  }
   0x3   :  { %2017 = vmatprep.subr.bf16.mxu1 %v8653_v1  ;;  %1977 = vmatpush1.bf16.msra.mxu0 %v8655_v2  ;;  %v8661_v6 = vld [vmem:[%s12433_s1 + $0xf0] ss:$20 sps:$4 sm:$0xff]   ;;  %v8663_v8 = vld [vmem:[%s12433_s1 + $0xcc] ss:$20 sps:$4 sm:$0xff]   ;;  %v8667_v10 = vld [vmem:[%s12433_s1 + $0xc8] ss:$20 sps:$4 sm:$0xff]  }
   0x4   :  { %2018 = vmatpush1.bf16.msra.mxu1 %v8656_v3  ;;  %1978 = vmatprep.subr.bf16.mxu0 %v8657_v4  ;;  %v8662_v7 = vld [vmem:[%s12433_s1 + $0x370] ss:$20 sps:$4 sm:$0xff]   ;;  %v8665_v9 = vld [vmem:[%s12433_s1 + $0x34c] ss:$20 sps:$4 sm:$0xff]   ;;  %v8668_v11 = vld [vmem:[%s12433_s1 + $0x348] ss:$20 sps:$4 sm:$0xff]  }
   0x5   :  { %2019 = vmatprep.subr.bf16.mxu1 %v8659_v5  ;;  %v8669_v12 = vld [vmem:[%s12433_s1 + $0xa4] ss:$20 sps:$4 sm:$0xff]   ;;  %v8673_v14 = vld [vmem:[%s12433_s1 + $0xa0] ss:$20 sps:$4 sm:$0xff]   ;;  %v8675_v16 = vld [vmem:[%s12433_s1 + $0x7c] ss:$20 sps:$4 sm:$0xff]  }
   0x6   :  { %v8671_v13 = vld [vmem:[%s12433_s1 + $0x324] ss:$20 sps:$4 sm:$0xff]   ;;  %v8674_v15 = vld [vmem:[%s12433_s1 + $0x320] ss:$20 sps:$4 sm:$0xff]   ;;  %v8677_v17 = vld [vmem:[%s12433_s1 + $0x2fc] ss:$20 sps:$4 sm:$0xff]  }
   0x7   :  { %1979 = vmatpush1.bf16.msra.mxu0 %v8661_v6  ;;  %v8679_v18 = vld [vmem:[%s12433_s1 + $0x78] ss:$20 sps:$4 sm:$0xff]   ;;  %v8681_v20 = vld [vmem:[%s12433_s1 + $0x54] ss:$20 sps:$4 sm:$0xff]   ;;  %v8685_v22 = vld [vmem:[%s12433_s1 + $0x50] ss:$20 sps:$4 sm:$0xff]  }
   0x8   :  { %2020 = vmatpush1.bf16.msra.mxu1 %v8662_v7  ;;  %1980 = vmatprep.subr.bf16.mxu0 %v8663_v8  ;;  %v8680_v19 = vld [vmem:[%s12433_s1 + $0x2f8] ss:$20 sps:$4 sm:$0xff]   ;;  %v8683_v21 = vld [vmem:[%s12433_s1 + $0x2d4] ss:$20 sps:$4 sm:$0xff]   ;;  %v8686_v23 = vld [vmem:[%s12433_s1 + $0x2d0] ss:$20 sps:$4 sm:$0xff]  }
   0x9   :  { %2021 = vmatprep.subr.bf16.mxu1 %v8665_v9  ;;  %v8687_v24 = vld [vmem:[%s12433_s1 + $0x2c] ss:$20 sps:$4 sm:$0xff]   ;;  %v8691_v26 = vld [vmem:[%s12433_s1 + $0x28] ss:$20 sps:$4 sm:$0xff]   ;;  %v8693_v28 = vld [vmem:[%s12433_s1 + $0x4] ss:$20 sps:$4 sm:$0xff]  }
   0xa   :  { %v8689_v25 = vld [vmem:[%s12433_s1 + $0x2ac] ss:$20 sps:$4 sm:$0xff]   ;;  %v8692_v27 = vld [vmem:[%s12433_s1 + $0x2a8] ss:$20 sps:$4 sm:$0xff]   ;;  %v8695_v29 = vld [vmem:[%s12433_s1 + $0x284] ss:$20 sps:$4 sm:$0xff]  }
   0xb   :  { %1981 = vmatpush1.bf16.msra.mxu0 %v8667_v10  ;;  %v8697_v30 = vld [vmem:[%s12433_s1] ss:$20 sps:$4 sm:$0xff]   ;;  %v8699_v32 = vld [vmem:[%s12433_s1 + $0x25c] ss:$20 sps:$4 sm:$0xff]   ;;  %v8703_v34 = vld [vmem:[%s12433_s1 + $0x258] ss:$20 sps:$4 sm:$0xff]  }
   0xc   :  { %2022 = vmatpush1.bf16.msra.mxu1 %v8668_v11  ;;  %1982 = vmatprep.subr.bf16.mxu0 %v8669_v12  ;;  %v8698_v31 = vld [vmem:[%s12433_s1 + $0x280] ss:$20 sps:$4 sm:$0xff]   ;;  %v8701_v33 = vld [vmem:[%s12433_s1 + $0x4dc] ss:$20 sps:$4 sm:$0xff]   ;;  %v8704_v35 = vld [vmem:[%s12433_s1 + $0x4d8] ss:$20 sps:$4 sm:$0xff]  }
   0xd   :  { %2023 = vmatprep.subr.bf16.mxu1 %v8671_v13  ;;  %v8705_v36 = vld [vmem:[%s12433_s1 + $0x234] ss:$20 sps:$4 sm:$0xff]   ;;  %v8709_v38 = vld [vmem:[%s12433_s1 + $0x230] ss:$20 sps:$4 sm:$0xff]   ;;  %v8711_v40 = vld [vmem:[%s12433_s1 + $0x20c] ss:$20 sps:$4 sm:$0xff]  }
   0xe   :  { %v8707_v37 = vld [vmem:[%s12433_s1 + $0x4b4] ss:$20 sps:$4 sm:$0xff]   ;;  %v8710_v39 = vld [vmem:[%s12433_s1 + $0x4b0] ss:$20 sps:$4 sm:$0xff]   ;;  %v8713_v41 = vld [vmem:[%s12433_s1 + $0x48c] ss:$20 sps:$4 sm:$0xff]  }
   0xf   :  { %1983 = vmatpush1.bf16.msra.mxu0 %v8673_v14  ;;  %v8715_v42 = vld [vmem:[%s12433_s1 + $0x208] ss:$20 sps:$4 sm:$0xff]   ;;  %v8717_v44 = vld [vmem:[%s12433_s1 + $0x1e4] ss:$20 sps:$4 sm:$0xff]   ;;  %v8721_v47 = vld [vmem:[%s12433_s1 + $0x1e0] ss:$20 sps:$4 sm:$0xff]  }
  0x10   :  { %2024 = vmatpush1.bf16.msra.mxu1 %v8674_v15  ;;  %1984 = vmatprep.subr.bf16.mxu0 %v8675_v16  ;;  %v8716_v43 = vld [vmem:[%s12433_s1 + $0x488] ss:$20 sps:$4 sm:$0xff]   ;;  %v8719_v45 = vld [vmem:[%s12433_s1 + $0x464] ss:$20 sps:$4 sm:$0xff]   ;;  %v8722_v48 = vld [vmem:[%s12433_s1 + $0x460] ss:$20 sps:$4 sm:$0xff]  }
  0x11   :  { %2025 = vmatprep.subr.bf16.mxu1 %v8677_v17  ;;  %v42_v46 = vld [vmem:[%s12434_s0 + $0x8] sm:$0xff]  ;;  %v44_v50 = vld [vmem:[%s12434_s0 + $0x18] sm:$0xff]  ;;  %v8733_v58 = vld [vmem:[%s12433_s1 + $0x190] ss:$20 sps:$4 sm:$0xff]   ;;  %vm4114_vm4 = vcmask 1046528   ;;  %vm4110_vm5 = vcmask 113664  }
  0x12   :  { %v9623_v49 = vpack.c.bf16 %v42_v46, %v42_v46  ;;  %v8723_v51 = vld [vmem:[%s12433_s1 + $0x1bc] ss:$20 sps:$4 sm:$0xff]   ;;  %v9631_v52 = vpack.c.bf16 %v44_v50, %v44_v50  ;;  %v8727_v54 = vld [vmem:[%s12433_s1 + $0x1b8] ss:$20 sps:$4 sm:$0xff]   ;;  %v8729_v56 = vld [vmem:[%s12433_s1 + $0x194] ss:$20 sps:$4 sm:$0xff]  }
  0x13   :  { %1985 = vmatpush1.bf16.msra.mxu0 %v8679_v18  ;;  %v8725_v53 = vld [vmem:[%s12433_s1 + $0x43c] ss:$20 sps:$4 sm:$0xff]   ;;  %v8728_v55 = vld [vmem:[%s12433_s1 + $0x438] ss:$20 sps:$4 sm:$0xff]   ;;  %v8731_v57 = vld [vmem:[%s12433_s1 + $0x414] ss:$20 sps:$4 sm:$0xff]  }
  0x14   :  { %2026 = vmatpush1.bf16.msra.mxu1 %v8680_v19  ;;  %1986 = vmatprep.subr.bf16.mxu0 %v8681_v20  ;;  %v8734_v59 = vld [vmem:[%s12433_s1 + $0x410] ss:$20 sps:$4 sm:$0xff]   ;;  %v8735_v60 = vld [vmem:[%s12433_s1 + $0x16c] ss:$20 sps:$4 sm:$0xff]   ;;  %v8739_v62 = vld [vmem:[%s12433_s1 + $0x168] ss:$20 sps:$4 sm:$0xff]  }
  0x15   :  { %2027 = vmatprep.subr.bf16.mxu1 %v8683_v21  ;;  %2008 = vmatprep.mubr.bf16.mxu0 %v9623_v49  ;;  %v8737_v61 = vld [vmem:[%s12433_s1 + $0x3ec] ss:$20 sps:$4 sm:$0xff]   ;;  %v8740_v63 = vld [vmem:[%s12433_s1 + $0x3e8] ss:$20 sps:$4 sm:$0xff]   ;;  %v8741_v0 = vld [vmem:[%s12433_s1 + $0x144] ss:$20 sps:$4 sm:$0xff]  }
  0x16   :  { %2049 = vmatprep.mubr.bf16.mxu1 %v9631_v52  ;;  %v8743_v1 = vld [vmem:[%s12433_s1 + $0x3c4] ss:$20 sps:$4 sm:$0xff]   ;;  %v8745_v2 = vld [vmem:[%s12433_s1 + $0x140] ss:$20 sps:$4 sm:$0xff]   ;;  %v8749_v6 = vld [vmem:[%s12433_s1 + $0x61c] ss:$20 sps:$4 sm:$0xff]  }
  0x17   :  { %1987 = vmatpush1.bf16.msra.mxu0 %v8685_v22  ;;  %v8746_v3 = vld [vmem:[%s12433_s1 + $0x3c0] ss:$20 sps:$4 sm:$0xff]   ;;  %v8752_v7 = vld [vmem:[%s12433_s1 + $0x89c] ss:$20 sps:$4 sm:$0xff]   ;;  %v8747_v10 = vld [vmem:[%s12433_s1 + $0x618] ss:$20 sps:$4 sm:$0xff]  }
  0x18   :  { %2028 = vmatpush1.bf16.msra.mxu1 %v8686_v23  ;;  %1988 = vmatprep.subr.bf16.mxu0 %v8687_v24  ;;  %v41_v4 = vld [vmem:[%s12434_s0] sm:$0xff]  ;;  %v43_v5 = vld [vmem:[%s12434_s0 + $0x10] sm:$0xff]  ;;  %v8750_v11 = vld [vmem:[%s12433_s1 + $0x898] ss:$20 sps:$4 sm:$0xff]   ;;  %vm7506_vm6 = vcmask 7168  }
  0x19   :  { %2029 = vmatprep.subr.bf16.mxu1 %v8689_v25  ;;  %v9692_v8 = vpack.c.bf16 %v41_v4, %v41_v4  ;;  %v9694_v9 = vpack.c.bf16 %v43_v5, %v43_v5  ;;  %v8755_v12 = vld [vmem:[%s12433_s1 + $0x5f4] ss:$20 sps:$4 sm:$0xff]   ;;  %v8753_v14 = vld [vmem:[%s12433_s1 + $0x5f0] ss:$20 sps:$4 sm:$0xff]   ;;  %v8761_v16 = vld [vmem:[%s12433_s1 + $0x5cc] ss:$20 sps:$4 sm:$0xff]  }
  0x1a   :  { %v8758_v13 = vld [vmem:[%s12433_s1 + $0x874] ss:$20 sps:$4 sm:$0xff]   ;;  %v8756_v15 = vld [vmem:[%s12433_s1 + $0x870] ss:$20 sps:$4 sm:$0xff]   ;;  %v8764_v17 = vld [vmem:[%s12433_s1 + $0x84c] ss:$20 sps:$4 sm:$0xff]  }
  0x1b   :  { %1989 = vmatpush1.bf16.msra.mxu0 %v8691_v26  ;;  %v8759_v18 = vld [vmem:[%s12433_s1 + $0x5c8] ss:$20 sps:$4 sm:$0xff]   ;;  %v8767_v20 = vld [vmem:[%s12433_s1 + $0x5a4] ss:$20 sps:$4 sm:$0xff]   ;;  %v8765_v24 = vld [vmem:[%s12433_s1 + $0x5a0] ss:$20 sps:$4 sm:$0xff]  }
  0x1c   :  { %2030 = vmatpush1.bf16.msra.mxu1 %v8692_v27  ;;  %1990 = vmatprep.subr.bf16.mxu0 %v8693_v28  ;;  %v8762_v19 = vld [vmem:[%s12433_s1 + $0x848] ss:$20 sps:$4 sm:$0xff]   ;;  %v8770_v21 = vld [vmem:[%s12433_s1 + $0x824] ss:$20 sps:$4 sm:$0xff]   ;;  %v8768_v25 = vld [vmem:[%s12433_s1 + $0x820] ss:$20 sps:$4 sm:$0xff]  }
  0x1d   :  { %2031 = vmatprep.subr.bf16.mxu1 %v8695_v29  ;;  %v48_v22 = vld [vmem:[%s12434_s0 + $0x38] sm:$0xff]  ;;  %v8806_v50 = vld [vmem:[%s12433_s1 + $0x8ec] ss:$20 sps:$4 sm:$0xff]   ;;  %v8827_v4 = vld [vmem:[%s12433_s1 + $0x694] ss:$20 sps:$4 sm:$0xff]  }
  0x1e   :  { %v9737_v23 = vpack.c.bf16 %v48_v22, %v48_v22  ;;  %v8773_v26 = vld [vmem:[%s12433_s1 + $0x57c] ss:$20 sps:$4 sm:$0xff]   ;;  %v8771_v28 = vld [vmem:[%s12433_s1 + $0x578] ss:$20 sps:$4 sm:$0xff]   ;;  %v8830_v5 = vld [vmem:[%s12433_s1 + $0xd4] ss:$20 sps:$4 sm:$0xff]  }
  0x1f   :  { %1991 = vmatpush1.bf16.msra.mxu0 %v8697_v30  ;;  %v8776_v27 = vld [vmem:[%s12433_s1 + $0x7fc] ss:$20 sps:$4 sm:$0xff]   ;;  %v8774_v29 = vld [vmem:[%s12433_s1 + $0x7f8] ss:$20 sps:$4 sm:$0xff]   ;;  %v8779_v30 = vld [vmem:[%s12433_s1 + $0x554] ss:$20 sps:$4 sm:$0xff]  }
  0x20   :  { %2032 = vmatpush1.bf16.msra.mxu1 %v8698_v31  ;;  %1992 = vmatprep.subr.bf16.mxu0 %v8699_v32  ;;  %v8782_v31 = vld [vmem:[%s12433_s1 + $0x7d4] ss:$20 sps:$4 sm:$0xff]   ;;  %v8777_v32 = vld [vmem:[%s12433_s1 + $0x550] ss:$20 sps:$4 sm:$0xff]   ;;  %v8795_v46 = vld [vmem:[%s12433_s1 + $0x758] ss:$20 sps:$4 sm:$0xff]  }
  0x21   :  { %2033 = vmatprep.subr.bf16.mxu1 %v8701_v33  ;;  %v8780_v33 = vld [vmem:[%s12433_s1 + $0x7d0] ss:$20 sps:$4 sm:$0xff]   ;;  %v8843_v22 = vld [vmem:[%s12433_s1 + $0x58] ss:$20 sps:$4 sm:$0xff]  }
  0x23   :  { %1993 = vmatpush2.bf16.msra.mxu0 %v8703_v34  ;;  %v8785_v34 = vld [vmem:[%s12433_s1 + $0x52c] ss:$20 sps:$4 sm:$0xff]  }
  0x24   :  { %2034 = vmatpush2.bf16.msra.mxu1 %v8704_v35  ;;  %1994 = vmatprep.subr.bf16.mxu0 %v8705_v36  ;;  %v8788_v35 = vld [vmem:[%s12433_s1 + $0x7ac] ss:$20 sps:$4 sm:$0xff]   ;;  %v8783_v36 = vld [vmem:[%s12433_s1 + $0x528] ss:$20 sps:$4 sm:$0xff]  }
  0x25   :  { %2035 = vmatprep.subr.bf16.mxu1 %v8707_v37  ;;  %v8786_v37 = vld [vmem:[%s12433_s1 + $0x7a8] ss:$20 sps:$4 sm:$0xff]  }
  0x27   :  { %1995 = vmatpush2.bf16.msra.mxu0 %v8709_v38  ;;  %v46_v38 = vld [vmem:[%s12434_s0 + $0x28] sm:$0xff] }
  0x28   :  { %2036 = vmatpush2.bf16.msra.mxu1 %v8710_v39  ;;  %1996 = vmatprep.subr.bf16.mxu0 %v8711_v40  ;;  %v8791_v39 = vld [vmem:[%s12433_s1 + $0x504] ss:$20 sps:$4 sm:$0xff]   ;;  %v9789_v40 = vpack.c.bf16 %v46_v38, %v46_v38 }
  0x29   :  { %2037 = vmatprep.subr.bf16.mxu1 %v8713_v41  ;;  %v8794_v41 = vld [vmem:[%s12433_s1 + $0x784] ss:$20 sps:$4 sm:$0xff]  }
  0x2a   :  { %v8872_v38 = vld [vmem:[%s12433_s1 + $0x304] ss:$20 sps:$4 sm:$0xff]  }
  0x2b   :  { %1997 = vmatpush2.bf16.msra.mxu0 %v8715_v42  ;;  %v8789_v42 = vld [vmem:[%s12433_s1 + $0x500] ss:$20 sps:$4 sm:$0xff]  }
  0x2c   :  { %2038 = vmatpush2.bf16.msra.mxu1 %v8716_v43  ;;  %1998 = vmatprep.subr.bf16.mxu0 %v8717_v44  ;;  %v8792_v43 = vld [vmem:[%s12433_s1 + $0x780] ss:$20 sps:$4 sm:$0xff]   ;;  %v8797_v44 = vld [vmem:[%s12433_s1 + $0x75c] ss:$20 sps:$4 sm:$0xff]  }
  0x2d   :  { %2039 = vmatprep.subr.bf16.mxu1 %v8719_v45  ;;  %v8800_v45 = vld [vmem:[%s12433_s1 + $0x914] ss:$20 sps:$4 sm:$0xff]  }
  0x2f   :  { %1999 = vmatpush2.bf16.msra.mxu0 %v8721_v47  ;;  %v8798_v47 = vld [vmem:[%s12433_s1 + $0x910] ss:$20 sps:$4 sm:$0xff]  }
  0x30   :  { %2040 = vmatpush2.bf16.msra.mxu1 %v8722_v48  ;;  %2000 = vmatprep.subr.bf16.mxu0 %v8723_v51  ;;  %v8803_v48 = vld [vmem:[%s12433_s1 + $0x734] ss:$20 sps:$4 sm:$0xff]   ;;  %v8801_v51 = vld [vmem:[%s12433_s1 + $0x730] ss:$20 sps:$4 sm:$0xff]  }
  0x31   :  { %2041 = vmatprep.subr.bf16.mxu1 %v8725_v53  ;;  %v8804_v53 = vld [vmem:[%s12433_s1 + $0x8e8] ss:$20 sps:$4 sm:$0xff]  }
  0x33   :  { %2001 = vmatpush2.bf16.msra.mxu0 %v8727_v54  ;;  %v8809_v54 = vld [vmem:[%s12433_s1 + $0x70c] ss:$20 sps:$4 sm:$0xff]  }
  0x34   :  { %2042 = vmatpush2.bf16.msra.mxu1 %v8728_v55  ;;  %2002 = vmatprep.subr.bf16.mxu0 %v8729_v56  ;;  %v8812_v55 = vld [vmem:[%s12433_s1 + $0x8c4] ss:$20 sps:$4 sm:$0xff]   ;;  %v8807_v56 = vld [vmem:[%s12433_s1 + $0x708] ss:$20 sps:$4 sm:$0xff]  }
  0x35   :  { %2043 = vmatprep.subr.bf16.mxu1 %v8731_v57  ;;  %v8810_v57 = vld [vmem:[%s12433_s1 + $0x8c0] ss:$20 sps:$4 sm:$0xff]  }
  0x37   :  { %2003 = vmatpush2.bf16.msra.mxu0 %v8733_v58  ;;  %v8815_v58 = vld [vmem:[%s12433_s1 + $0x6e4] ss:$20 sps:$4 sm:$0xff]  }
  0x38   :  { %2044 = vmatpush2.bf16.msra.mxu1 %v8734_v59  ;;  %2004 = vmatprep.subr.bf16.mxu0 %v8735_v60  ;;  %v47_v59 = vld [vmem:[%s12434_s0 + $0x30] sm:$0xff]  ;;  %v8818_v60 = vld [vmem:[%s12433_s1 + $0x124] ss:$20 sps:$4 sm:$0xff]  }
  0x39   :  { %2045 = vmatprep.subr.bf16.mxu1 %v8737_v61  ;;  %v8813_v61 = vld [vmem:[%s12433_s1 + $0x6e0] ss:$20 sps:$4 sm:$0xff]  }
  0x3b   :  { %2005 = vmatpush2.bf16.msra.mxu0 %v8739_v62  ;;  %v9849_v62 = vpack.c.bf16 %v47_v59, %v47_v59  ;;  %v8894_v59 = vld [vmem:[%s12433_s1 + $0x4e0] ss:$20 sps:$4 sm:$0xff]  }
  0x3c   :  { %2046 = vmatpush2.bf16.msra.mxu1 %v8740_v63  ;;  %2006 = vmatprep.subr.bf16.mxu0 %v8741_v0  ;;  %v8816_v63 = vld [vmem:[%s12433_s1 + $0x120] ss:$20 sps:$4 sm:$0xff]   ;;  %v8821_v0 = vld [vmem:[%s12433_s1 + $0x6bc] ss:$20 sps:$4 sm:$0xff]  }
  0x3d   :  { %2047 = vmatprep.subr.bf16.mxu1 %v8743_v1  ;;  %v8824_v1 = vld [vmem:[%s12433_s1 + $0xfc] ss:$20 sps:$4 sm:$0xff]  }
  0x3f   :  { %2007 = vmatpush2.bf16.msra.mxu0 %v8745_v2  ;;  %v8819_v2 = vld [vmem:[%s12433_s1 + $0x6b8] ss:$20 sps:$4 sm:$0xff]  }
  0x40   :  { %2048 = vmatpush2.bf16.msra.mxu1 %v8746_v3  ;;  %2058 = vmatprep.subr.bf16.mxu0 %v8749_v6  ;;  %v8822_v3 = vld [vmem:[%s12433_s1 + $0xf8] ss:$20 sps:$4 sm:$0xff]   ;;  %v8825_v6 = vld [vmem:[%s12433_s1 + $0x690] ss:$20 sps:$4 sm:$0xff]  }
  0x41   :  { %2099 = vmatprep.subr.bf16.mxu1 %v8752_v7  ;;  %v8828_v7 = vld [vmem:[%s12433_s1 + $0xd0] ss:$20 sps:$4 sm:$0xff]  }
  0x42   :  { %2009 = vmatmul.mubr.bf16.vlgmr.msra.gmra.mxu0 %v9692_v8 }
  0x43   :  { %2050 = vmatmul.mubr.bf16.vlgmr.msra.gmra.mxu1 %v9694_v9  ;;  %2059 = vmatpush1.bf16.msra.mxu0 %v8747_v10  ;;  %v8833_v10 = vld [vmem:[%s12433_s1 + $0x66c] ss:$20 sps:$4 sm:$0xff]  }
  0x44   :  { %2100 = vmatpush1.bf16.msra.mxu1 %v8750_v11  ;;  %2060 = vmatprep.subr.bf16.mxu0 %v8755_v12  ;;  %v8836_v11 = vld [vmem:[%s12433_s1 + $0xac] ss:$20 sps:$4 sm:$0xff]   ;;  %v8831_v12 = vld [vmem:[%s12433_s1 + $0x668] ss:$20 sps:$4 sm:$0xff]  }
  0x45   :  { %2101 = vmatprep.subr.bf16.mxu1 %v8758_v13  ;;  %7807 = vmatprep.mubr.msk.bf16.mxu1 %vm1972_vm0, %v9737_v23  ;;  %v8834_v13 = vld [vmem:[%s12433_s1 + $0xa8] ss:$20 sps:$4 sm:$0xff]  }
  0x46   :  { %2090 = vmatprep.mubr.bf16.mxu0 %v9789_v40 }
  0x47   :  { %2061 = vmatpush1.bf16.msra.mxu0 %v8753_v14  ;;  %v8839_v14 = vld [vmem:[%s12433_s1 + $0x644] ss:$20 sps:$4 sm:$0xff]  }
  0x48   :  { %2102 = vmatpush1.bf16.msra.mxu1 %v8756_v15  ;;  %2062 = vmatprep.subr.bf16.mxu0 %v8761_v16  ;;  %v8842_v15 = vld [vmem:[%s12433_s1 + $0x84] ss:$20 sps:$4 sm:$0xff]   ;;  %v8837_v16 = vld [vmem:[%s12433_s1 + $0x640] ss:$20 sps:$4 sm:$0xff]  }
  0x49   :  { %2103 = vmatprep.subr.bf16.mxu1 %v8764_v17  ;;  %v8840_v17 = vld [vmem:[%s12433_s1 + $0x80] ss:$20 sps:$4 sm:$0xff]  }
  0x4b   :  { %2063 = vmatpush1.bf16.msra.mxu0 %v8759_v18  ;;  %v45_v18 = vld [vmem:[%s12434_s0 + $0x20] sm:$0xff] }
  0x4c   :  { %2104 = vmatpush1.bf16.msra.mxu1 %v8762_v19  ;;  %2064 = vmatprep.subr.bf16.mxu0 %v8767_v20  ;;  %v8845_v19 = vld [vmem:[%s12433_s1 + $0x5c] ss:$20 sps:$4 sm:$0xff]   ;;  %v8848_v20 = vld [vmem:[%s12433_s1 + $0x3a4] ss:$20 sps:$4 sm:$0xff]  }
  0x4d   :  { %2105 = vmatprep.subr.bf16.mxu1 %v8770_v21  ;;  %v9913_v21 = vpack.c.bf16 %v45_v18, %v45_v18  ;;  %v8924_v18 = vld [vmem:[%s12433_s1 + $0x5d0] ss:$20 sps:$4 sm:$0xff]  }
  0x4f   :  { %2065 = vmatpush1.bf16.msra.mxu0 %v8765_v24  ;;  %v8846_v24 = vld [vmem:[%s12433_s1 + $0x3a0] ss:$20 sps:$4 sm:$0xff]  }
  0x50   :  { %2106 = vmatpush1.bf16.msra.mxu1 %v8768_v25  ;;  %2066 = vmatprep.subr.bf16.mxu0 %v8773_v26  ;;  %v8851_v25 = vld [vmem:[%s12433_s1 + $0x34] ss:$20 sps:$4 sm:$0xff]   ;;  %v8854_v26 = vld [vmem:[%s12433_s1 + $0x37c] ss:$20 sps:$4 sm:$0xff]  }
  0x51   :  { %2107 = vmatprep.subr.bf16.mxu1 %v8776_v27  ;;  %v8849_v27 = vld [vmem:[%s12433_s1 + $0x30] ss:$20 sps:$4 sm:$0xff]  }
  0x53   :  { %2067 = vmatpush1.bf16.msra.mxu0 %v8771_v28  ;;  %v8852_v28 = vld [vmem:[%s12433_s1 + $0x378] ss:$20 sps:$4 sm:$0xff]  }
  0x54   :  { %2108 = vmatpush1.bf16.msra.mxu1 %v8774_v29  ;;  %2068 = vmatprep.subr.bf16.mxu0 %v8779_v30  ;;  %v8857_v29 = vld [vmem:[%s12433_s1 + $0xc] ss:$20 sps:$4 sm:$0xff]   ;;  %v8860_v30 = vld [vmem:[%s12433_s1 + $0x354] ss:$20 sps:$4 sm:$0xff]  }
  0x55   :  { %2109 = vmatprep.subr.bf16.mxu1 %v8782_v31  ;;  %v8855_v31 = vld [vmem:[%s12433_s1 + $0x8] ss:$20 sps:$4 sm:$0xff]  }
  0x57   :  { %2069 = vmatpush1.bf16.msra.mxu0 %v8777_v32  ;;  %v8858_v32 = vld [vmem:[%s12433_s1 + $0x350] ss:$20 sps:$4 sm:$0xff]  }
  0x58   :  { %2110 = vmatpush1.bf16.msra.mxu1 %v8780_v33  ;;  %2070 = vmatprep.subr.bf16.mxu0 %v8785_v34  ;;  %v8863_v33 = vld [vmem:[%s12433_s1 + $0x264] ss:$20 sps:$4 sm:$0xff]   ;;  %v8866_v34 = vld [vmem:[%s12433_s1 + $0x32c] ss:$20 sps:$4 sm:$0xff]  }
  0x59   :  { %2111 = vmatprep.subr.bf16.mxu1 %v8788_v35  ;;  %v8861_v35 = vld [vmem:[%s12433_s1 + $0x260] ss:$20 sps:$4 sm:$0xff]  }
  0x5b   :  { %2071 = vmatpush1.bf16.msra.mxu0 %v8783_v36  ;;  %v8864_v36 = vld [vmem:[%s12433_s1 + $0x328] ss:$20 sps:$4 sm:$0xff]  }
  0x5c   :  { %2112 = vmatpush1.bf16.msra.mxu1 %v8786_v37  ;;  %2072 = vmatprep.subr.bf16.mxu0 %v8791_v39  ;;  %v8869_v37 = vld [vmem:[%s12433_s1 + $0x23c] ss:$20 sps:$4 sm:$0xff]   ;;  %v8867_v39 = vld [vmem:[%s12433_s1 + $0x238] ss:$20 sps:$4 sm:$0xff]  }
  0x5d   :  { %2113 = vmatprep.subr.bf16.mxu1 %v8794_v41  ;;  %v8870_v41 = vld [vmem:[%s12433_s1 + $0x300] ss:$20 sps:$4 sm:$0xff]  }
  0x5f   :  { %2073 = vmatpush1.bf16.msra.mxu0 %v8789_v42  ;;  %v8875_v42 = vld [vmem:[%s12433_s1 + $0x214] ss:$20 sps:$4 sm:$0xff]  }
  0x60   :  { %2114 = vmatpush1.bf16.msra.mxu1 %v8792_v43  ;;  %2074 = vmatprep.subr.bf16.mxu0 %v8797_v44  ;;  %v8878_v43 = vld [vmem:[%s12433_s1 + $0x2dc] ss:$20 sps:$4 sm:$0xff]  }
  0x61   :  { %2125 = vmatprep.subr.bf16.mxu1 %v8800_v45  ;;  %v8873_v44 = vld [vmem:[%s12433_s1 + $0x210] ss:$20 sps:$4 sm:$0xff]   ;;  %v8876_v45 = vld [vmem:[%s12433_s1 + $0x2d8] ss:$20 sps:$4 sm:$0xff]  }
  0x63   :  { %2075 = vmatpush2.bf16.msra.mxu0 %v8795_v46  ;;  %v8881_v46 = vld [vmem:[%s12433_s1 + $0x1ec] ss:$20 sps:$4 sm:$0xff]  }
  0x64   :  { %2126 = vmatpush2.bf16.msra.mxu1 %v8798_v47  ;;  %2076 = vmatprep.subr.bf16.mxu0 %v8803_v48  ;;  %v8884_v47 = vld [vmem:[%s12433_s1 + $0x2b4] ss:$20 sps:$4 sm:$0xff]  }
  0x65   :  { %2127 = vmatprep.subr.bf16.mxu1 %v8806_v50  ;;  %v8879_v48 = vld [vmem:[%s12433_s1 + $0x1e8] ss:$20 sps:$4 sm:$0xff]   ;;  %v8882_v50 = vld [vmem:[%s12433_s1 + $0x2b0] ss:$20 sps:$4 sm:$0xff]  }
  0x67   :  { %2077 = vmatpush2.bf16.msra.mxu0 %v8801_v51  ;;  %v8887_v51 = vld [vmem:[%s12433_s1 + $0x1c4] ss:$20 sps:$4 sm:$0xff]  }
  0x68   :  { %2128 = vmatpush2.bf16.msra.mxu1 %v8804_v53  ;;  %2078 = vmatprep.subr.bf16.mxu0 %v8809_v54  ;;  %v8890_v53 = vld [vmem:[%s12433_s1 + $0x28c] ss:$20 sps:$4 sm:$0xff]  }
  0x69   :  { %2129 = vmatprep.subr.bf16.mxu1 %v8812_v55  ;;  %v8885_v54 = vld [vmem:[%s12433_s1 + $0x1c0] ss:$20 sps:$4 sm:$0xff]   ;;  %v8888_v55 = vld [vmem:[%s12433_s1 + $0x288] ss:$20 sps:$4 sm:$0xff]  }
  0x6b   :  { %2079 = vmatpush2.bf16.msra.mxu0 %v8807_v56  ;;  %v8893_v56 = vld [vmem:[%s12433_s1 + $0x19c] ss:$20 sps:$4 sm:$0xff]  }
  0x6c   :  { %2130 = vmatpush2.bf16.msra.mxu1 %v8810_v57  ;;  %2080 = vmatprep.subr.bf16.mxu0 %v8815_v58  ;;  %v8896_v57 = vld [vmem:[%s12433_s1 + $0x4e4] ss:$20 sps:$4 sm:$0xff]  }
  0x6d   :  { %2140 = vmatprep.subr.bf16.mxu1 %v8818_v60  ;;  %v8891_v58 = vld [vmem:[%s12433_s1 + $0x198] ss:$20 sps:$4 sm:$0xff]   ;;  %v8899_v60 = vld [vmem:[%s12433_s1 + $0x174] ss:$20 sps:$4 sm:$0xff]  }
  0x6f   :  { %2132 = vmatmul.mubr.bf16.vlgmr.msra.gmra.mxu1 %v9849_v62  ;;  %2081 = vmatpush2.bf16.msra.mxu0 %v8813_v61  ;;  %v8902_v61 = vld [vmem:[%s12433_s1 + $0x4bc] ss:$20 sps:$4 sm:$0xff]  }
  0x70   :  { %2141 = vmatpush1.bf16.msra.mxu1 %v8816_v63  ;;  %2082 = vmatprep.subr.bf16.mxu0 %v8821_v0  ;;  %v8897_v63 = vld [vmem:[%s12433_s1 + $0x170] ss:$20 sps:$4 sm:$0xff]   ;;  %v8900_v0 = vld [vmem:[%s12433_s1 + $0x4b8] ss:$20 sps:$4 sm:$0xff]  }
  0x71   :  { %2142 = vmatprep.subr.bf16.mxu1 %v8824_v1  ;;  %2172 = vmatprep.mubr.bf16.mxu1 %v9623_v49  ;;  %v8905_v1 = vld [vmem:[%s12433_s1 + $0x14c] ss:$20 sps:$4 sm:$0xff]  }
  0x73   :  { %2083 = vmatpush2.bf16.msra.mxu0 %v8819_v2  ;;  %v8908_v2 = vld [vmem:[%s12433_s1 + $0x494] ss:$20 sps:$4 sm:$0xff]  }
  0x74   :  { %2143 = vmatpush1.bf16.msra.mxu1 %v8822_v3  ;;  %2084 = vmatprep.subr.bf16.mxu0 %v8827_v4  ;;  %v8903_v3 = vld [vmem:[%s12433_s1 + $0x148] ss:$20 sps:$4 sm:$0xff]   ;;  %v8906_v4 = vld [vmem:[%s12433_s1 + $0x490] ss:$20 sps:$4 sm:$0xff]  }
  0x75   :  { %2144 = vmatprep.subr.bf16.mxu1 %v8830_v5  ;;  %v8911_v5 = vld [vmem:[%s12433_s1 + $0x46c] ss:$20 sps:$4 sm:$0xff]  }
  0x77   :  { %2085 = vmatpush2.bf16.msra.mxu0 %v8825_v6  ;;  %v8914_v6 = vld [vmem:[%s12433_s1 + $0x624] ss:$20 sps:$4 sm:$0xff]  }
  0x78   :  { %2145 = vmatpush1.bf16.msra.mxu1 %v8828_v7  ;;  %2086 = vmatprep.subr.bf16.mxu0 %v8833_v10  ;;  %v8909_v7 = vld [vmem:[%s12433_s1 + $0x468] ss:$20 sps:$4 sm:$0xff]   ;;  %v8912_v10 = vld [vmem:[%s12433_s1 + $0x620] ss:$20 sps:$4 sm:$0xff]  }
  0x79   :  { %2146 = vmatprep.subr.bf16.mxu1 %v8836_v11  ;;  %v8917_v11 = vld [vmem:[%s12433_s1 + $0x444] ss:$20 sps:$4 sm:$0xff]  }
  0x7b   :  { %2087 = vmatpush2.bf16.msra.mxu0 %v8831_v12  ;;  %v8920_v12 = vld [vmem:[%s12433_s1 + $0x5fc] ss:$20 sps:$4 sm:$0xff]  }
  0x7c   :  { %2147 = vmatpush1.bf16.msra.mxu1 %v8834_v13  ;;  %2088 = vmatprep.subr.bf16.mxu0 %v8839_v14  ;;  %v8915_v13 = vld [vmem:[%s12433_s1 + $0x440] ss:$20 sps:$4 sm:$0xff]   ;;  %v8918_v14 = vld [vmem:[%s12433_s1 + $0x5f8] ss:$20 sps:$4 sm:$0xff]  }
  0x7d   :  { %2148 = vmatprep.subr.bf16.mxu1 %v8842_v15  ;;  %v8923_v15 = vld [vmem:[%s12433_s1 + $0x41c] ss:$20 sps:$4 sm:$0xff]  }
  0x7f   :  { %2089 = vmatpush2.bf16.msra.mxu0 %v8837_v16  ;;  %v8926_v16 = vld [vmem:[%s12433_s1 + $0x5d4] ss:$20 sps:$4 sm:$0xff]  }
  0x80   :  { %2149 = vmatpush1.bf16.msra.mxu1 %v8840_v17  ;;  %2181 = vmatprep.subr.bf16.mxu0 %v8848_v20  ;;  %v8921_v17 = vld [vmem:[%s12433_s1 + $0x418] ss:$20 sps:$4 sm:$0xff]  }
  0x81   :  { %2150 = vmatprep.subr.bf16.mxu1 %v8845_v19  ;;  %v8929_v19 = vld [vmem:[%s12433_s1 + $0x3f4] ss:$20 sps:$4 sm:$0xff]   ;;  %v8932_v20 = vld [vmem:[%s12433_s1 + $0x5ac] ss:$20 sps:$4 sm:$0xff]  }
  0x82   :  { %2091 = vmatmul.mubr.bf16.vlgmr.msra.gmra.mxu0 %v9913_v21 }
  0x83   :  { %2182 = vmatpush1.bf16.msra.mxu0 %v8846_v24  ;;  %2213 = vmatprep.mubr.bf16.mxu0 %v9631_v52  ;;  %v8930_v24 = vld [vmem:[%s12433_s1 + $0x5a8] ss:$20 sps:$4 sm:$0xff]  }
  0x84   :  { %2151 = vmatpush1.bf16.msra.mxu1 %v8843_v22  ;;  %2183 = vmatprep.subr.bf16.mxu0 %v8854_v26  ;;  %v8927_v22 = vld [vmem:[%s12433_s1 + $0x3f0] ss:$20 sps:$4 sm:$0xff]  }
  0x85   :  { %2152 = vmatprep.subr.bf16.mxu1 %v8851_v25  ;;  %v8935_v25 = vld [vmem:[%s12433_s1 + $0x3cc] ss:$20 sps:$4 sm:$0xff]   ;;  %v8938_v26 = vld [vmem:[%s12433_s1 + $0x584] ss:$20 sps:$4 sm:$0xff]  }
  0x87   :  { %2184 = vmatpush1.bf16.msra.mxu0 %v8852_v28  ;;  %v8936_v28 = vld [vmem:[%s12433_s1 + $0x580] ss:$20 sps:$4 sm:$0xff]  }
  0x88   :  { %2153 = vmatpush1.bf16.msra.mxu1 %v8849_v27  ;;  %2185 = vmatprep.subr.bf16.mxu0 %v8860_v30  ;;  %v8933_v27 = vld [vmem:[%s12433_s1 + $0x3c8] ss:$20 sps:$4 sm:$0xff]   ;;  %v8944_v30 = vld [vmem:[%s12433_s1 + $0x8a4] ss:$20 sps:$4 sm:$0xff]  }
  0x89   :  { %2154 = vmatprep.subr.bf16.mxu1 %v8857_v29  ;;  %v8941_v29 = vld [vmem:[%s12433_s1 + $0x55c] ss:$20 sps:$4 sm:$0xff]  }
  0x8b   :  { %2186 = vmatpush1.bf16.msra.mxu0 %v8858_v32  ;;  %v8942_v32 = vld [vmem:[%s12433_s1 + $0x8a0] ss:$20 sps:$4 sm:$0xff]  }
  0x8c   :  { %2155 = vmatpush1.bf16.msra.mxu1 %v8855_v31  ;;  %2187 = vmatprep.subr.bf16.mxu0 %v8866_v34  ;;  %v8939_v31 = vld [vmem:[%s12433_s1 + $0x558] ss:$20 sps:$4 sm:$0xff]   ;;  %v8950_v34 = vld [vmem:[%s12433_s1 + $0x87c] ss:$20 sps:$4 sm:$0xff]  }
  0x8d   :  { %2156 = vmatprep.subr.bf16.mxu1 %v8863_v33  ;;  %v8947_v33 = vld [vmem:[%s12433_s1 + $0x534] ss:$20 sps:$4 sm:$0xff]  }
  0x8f   :  { %2188 = vmatpush1.bf16.msra.mxu0 %v8864_v36  ;;  %v8948_v36 = vld [vmem:[%s12433_s1 + $0x878] ss:$20 sps:$4 sm:$0xff]  }
  0x90   :  { %2157 = vmatpush2.bf16.msra.mxu1 %v8861_v35  ;;  %2189 = vmatprep.subr.bf16.mxu0 %v8872_v38  ;;  %v8945_v35 = vld [vmem:[%s12433_s1 + $0x530] ss:$20 sps:$4 sm:$0xff]   ;;  %v8956_v38 = vld [vmem:[%s12433_s1 + $0x854] ss:$20 sps:$4 sm:$0xff]  }
  0x91   :  { %2158 = vmatprep.subr.bf16.mxu1 %v8869_v37  ;;  %v8953_v37 = vld [vmem:[%s12433_s1 + $0x50c] ss:$20 sps:$4 sm:$0xff]  }
  0x93   :  { %2190 = vmatpush1.bf16.msra.mxu0 %v8870_v41  ;;  %v8954_v41 = vld [vmem:[%s12433_s1 + $0x850] ss:$20 sps:$4 sm:$0xff]  }
  0x94   :  { %2159 = vmatpush2.bf16.msra.mxu1 %v8867_v39  ;;  %2191 = vmatprep.subr.bf16.mxu0 %v8878_v43  ;;  %v8951_v39 = vld [vmem:[%s12433_s1 + $0x508] ss:$20 sps:$4 sm:$0xff]   ;;  %v8962_v43 = vld [vmem:[%s12433_s1 + $0x82c] ss:$20 sps:$4 sm:$0xff]  }
  0x95   :  { %2160 = vmatprep.subr.bf16.mxu1 %v8875_v42  ;;  %v8959_v42 = vld [vmem:[%s12433_s1 + $0x764] ss:$20 sps:$4 sm:$0xff]  }
  0x97   :  { %2192 = vmatpush1.bf16.msra.mxu0 %v8876_v45  ;;  %v8960_v45 = vld [vmem:[%s12433_s1 + $0x828] ss:$20 sps:$4 sm:$0xff]  }
  0x98   :  { %2161 = vmatpush2.bf16.msra.mxu1 %v8873_v44  ;;  %2193 = vmatprep.subr.bf16.mxu0 %v8884_v47  ;;  %v8957_v44 = vld [vmem:[%s12433_s1 + $0x760] ss:$20 sps:$4 sm:$0xff]   ;;  %v8968_v47 = vld [vmem:[%s12433_s1 + $0x804] ss:$20 sps:$4 sm:$0xff]  }
  0x99   :  { %2162 = vmatprep.subr.bf16.mxu1 %v8881_v46  ;;  %v8965_v46 = vld [vmem:[%s12433_s1 + $0x73c] ss:$20 sps:$4 sm:$0xff]  }
  0x9b   :  { %2194 = vmatpush1.bf16.msra.mxu0 %v8882_v50  ;;  %v8966_v50 = vld [vmem:[%s12433_s1 + $0x800] ss:$20 sps:$4 sm:$0xff]  }
  0x9c   :  { %2163 = vmatpush2.bf16.msra.mxu1 %v8879_v48  ;;  %2195 = vmatprep.subr.bf16.mxu0 %v8890_v53  ;;  %v8963_v48 = vld [vmem:[%s12433_s1 + $0x738] ss:$20 sps:$4 sm:$0xff]   ;;  %v8974_v53 = vld [vmem:[%s12433_s1 + $0x7dc] ss:$20 sps:$4 sm:$0xff]  }
  0x9d   :  { %2164 = vmatprep.subr.bf16.mxu1 %v8887_v51  ;;  %v8971_v51 = vld [vmem:[%s12433_s1 + $0x714] ss:$20 sps:$4 sm:$0xff]  }
  0x9f   :  { %2196 = vmatpush1.bf16.msra.mxu0 %v8888_v55  ;;  %v8972_v55 = vld [vmem:[%s12433_s1 + $0x7d8] ss:$20 sps:$4 sm:$0xff]  }
  0xa0   :  { %2165 = vmatpush2.bf16.msra.mxu1 %v8885_v54  ;;  %2197 = vmatprep.subr.bf16.mxu0 %v8896_v57  ;;  %v8969_v54 = vld [vmem:[%s12433_s1 + $0x710] ss:$20 sps:$4 sm:$0xff]   ;;  %v8980_v57 = vld [vmem:[%s12433_s1 + $0x7b4] ss:$20 sps:$4 sm:$0xff]  }
  0xa1   :  { %2166 = vmatprep.subr.bf16.mxu1 %v8893_v56  ;;  %v8977_v56 = vld [vmem:[%s12433_s1 + $0x6ec] ss:$20 sps:$4 sm:$0xff]  }
  0xa3   :  { %2198 = vmatpush2.bf16.msra.mxu0 %v8894_v59  ;;  %v8978_v59 = vld [vmem:[%s12433_s1 + $0x7b0] ss:$20 sps:$4 sm:$0xff]  }
  0xa4   :  { %2167 = vmatpush2.bf16.msra.mxu1 %v8891_v58  ;;  %2199 = vmatprep.subr.bf16.mxu0 %v8902_v61  ;;  %v8975_v58 = vld [vmem:[%s12433_s1 + $0x6e8] ss:$20 sps:$4 sm:$0xff]   ;;  %v8986_v61 = vld [vmem:[%s12433_s1 + $0x78c] ss:$20 sps:$4 sm:$0xff]  }
  0xa5   :  { %2168 = vmatprep.subr.bf16.mxu1 %v8899_v60  ;;  %v8983_v60 = vld [vmem:[%s12433_s1 + $0x6c4] ss:$20 sps:$4 sm:$0xff]  }
  0xa7   :  { %2200 = vmatpush2.bf16.msra.mxu0 %v8900_v0  ;;  %v8984_v0 = vld [vmem:[%s12433_s1 + $0x788] ss:$20 sps:$4 sm:$0xff]  }
  0xa8   :  { %2169 = vmatpush2.bf16.msra.mxu1 %v8897_v63  ;;  %2201 = vmatprep.subr.bf16.mxu0 %v8908_v2  ;;  %v8981_v63 = vld [vmem:[%s12433_s1 + $0x6c0] ss:$20 sps:$4 sm:$0xff]   ;;  %v8992_v2 = vld [vmem:[%s12433_s1 + $0x91c] ss:$20 sps:$4 sm:$0xff]  }
  0xa9   :  { %2170 = vmatprep.subr.bf16.mxu1 %v8905_v1  ;;  %v8989_v1 = vld [vmem:[%s12433_s1 + $0x69c] ss:$20 sps:$4 sm:$0xff]  }
  0xab   :  { %2202 = vmatpush2.bf16.msra.mxu0 %v8906_v4  ;;  %v8990_v4 = vld [vmem:[%s12433_s1 + $0x918] ss:$20 sps:$4 sm:$0xff]  }
  0xac   :  { %2171 = vmatpush2.bf16.msra.mxu1 %v8903_v3  ;;  %2203 = vmatprep.subr.bf16.mxu0 %v8911_v5  ;;  %v8987_v3 = vld [vmem:[%s12433_s1 + $0x698] ss:$20 sps:$4 sm:$0xff]   ;;  %v8995_v5 = vld [vmem:[%s12433_s1 + $0x674] ss:$20 sps:$4 sm:$0xff]  }
  0xad   :  { %2222 = vmatprep.subr.bf16.mxu1 %v8914_v6  ;;  %v8998_v6 = vld [vmem:[%s12433_s1 + $0x8f4] ss:$20 sps:$4 sm:$0xff]  }
  0xaf   :  { %2173 = vmatmul.mubr.bf16.vlgmr.msra.gmra.mxu1 %v9692_v8  ;;  %2204 = vmatpush2.bf16.msra.mxu0 %v8909_v7  ;;  %v8993_v7 = vld [vmem:[%s12433_s1 + $0x670] ss:$20 sps:$4 sm:$0xff]  }
  0xb0   :  { %2223 = vmatpush1.bf16.msra.mxu1 %v8912_v10  ;;  %2205 = vmatprep.subr.bf16.mxu0 %v8917_v11  ;;  %v8996_v10 = vld [vmem:[%s12433_s1 + $0x8f0] ss:$20 sps:$4 sm:$0xff]   ;;  %v9001_v11 = vld [vmem:[%s12433_s1 + $0x64c] ss:$20 sps:$4 sm:$0xff]  }
  0xb1   :  { %2224 = vmatprep.subr.bf16.mxu1 %v8920_v12  ;;  %2254 = vmatprep.mubr.bf16.mxu1 %v9789_v40  ;;  %v9004_v12 = vld [vmem:[%s12433_s1 + $0x8cc] ss:$20 sps:$4 sm:$0xff]  }
  0xb3   :  { %2206 = vmatpush2.bf16.msra.mxu0 %v8915_v13  ;;  %v8999_v13 = vld [vmem:[%s12433_s1 + $0x648] ss:$20 sps:$4 sm:$0xff]  }
  0xb4   :  { %2225 = vmatpush1.bf16.msra.mxu1 %v8918_v14  ;;  %2207 = vmatprep.subr.bf16.mxu0 %v8923_v15  ;;  %v9002_v14 = vld [vmem:[%s12433_s1 + $0x8c8] ss:$20 sps:$4 sm:$0xff]  }
  0xb5   :  { %2226 = vmatprep.subr.bf16.mxu1 %v8926_v16  ;;  %v9005_v15 = vld [vmem:[%s12433_s1 + $0x268] ss:$20 sps:$4 sm:$0xff]  }
  0xb6   :  { %v9006_v16 = vld [vmem:[%s12433_s1 + $0x4e8] ss:$20 sps:$4 sm:$0xff]  }
  0xb7   :  { %2208 = vmatpush2.bf16.msra.mxu0 %v8921_v17  ;;  %v9007_v17 = vld [vmem:[%s12433_s1 + $0x128] ss:$20 sps:$4 sm:$0xff]  }
  0xb8   :  { %2227 = vmatpush1.bf16.msra.mxu1 %v8924_v18  ;;  %2209 = vmatprep.subr.bf16.mxu0 %v8929_v19  ;;  %v9008_v18 = vld [vmem:[%s12433_s1 + $0x3a8] ss:$20 sps:$4 sm:$0xff]   ;;  %v9009_v19 = vld [vmem:[%s12433_s1 + $0x240] ss:$20 sps:$4 sm:$0xff]  }
  0xb9   :  { %2228 = vmatprep.subr.bf16.mxu1 %v8932_v20  ;;  %v9010_v20 = vld [vmem:[%s12433_s1 + $0x4c0] ss:$20 sps:$4 sm:$0xff]  }
  0xbb   :  { %2210 = vmatpush2.bf16.msra.mxu0 %v8927_v22  ;;  %v9011_v22 = vld [vmem:[%s12433_s1 + $0x100] ss:$20 sps:$4 sm:$0xff]  }
  0xbc   :  { %2229 = vmatpush1.bf16.msra.mxu1 %v8930_v24  ;;  %2211 = vmatprep.subr.bf16.mxu0 %v8935_v25  ;;  %v9012_v24 = vld [vmem:[%s12433_s1 + $0x380] ss:$20 sps:$4 sm:$0xff]   ;;  %v9013_v25 = vld [vmem:[%s12433_s1 + $0x218] ss:$20 sps:$4 sm:$0xff]  }
  0xbd   :  { %2230 = vmatprep.subr.bf16.mxu1 %v8938_v26  ;;  %v9014_v26 = vld [vmem:[%s12433_s1 + $0x498] ss:$20 sps:$4 sm:$0xff]  }
  0xbf   :  { %2212 = vmatpush2.bf16.msra.mxu0 %v8933_v27  ;;  %v9015_v27 = vld [vmem:[%s12433_s1 + $0xd8] ss:$20 sps:$4 sm:$0xff]  }
  0xc0   :  { %2231 = vmatpush1.bf16.msra.mxu1 %v8936_v28  ;;  %2263 = vmatprep.subr.bf16.mxu0 %v8944_v30  ;;  %v9016_v28 = vld [vmem:[%s12433_s1 + $0x358] ss:$20 sps:$4 sm:$0xff]   ;;  %v9017_v30 = vld [vmem:[%s12433_s1 + $0x1f0] ss:$20 sps:$4 sm:$0xff]  }
  0xc1   :  { %2232 = vmatprep.subr.bf16.mxu1 %v8941_v29  ;;  %v413_v29 = vlaneseq }
  0xc2   :  { %2214 = vmatmul.mubr.bf16.vlgmr.msra.gmra.mxu0 %v9694_v9 }
  0xc3   :  { %2264 = vmatpush1.bf16.msra.mxu0 %v8942_v32  ;;  %7808 = vmatprep.mubr.msk.bf16.mxu0 %vm1972_vm0, %v9737_v23  ;;  %v9019_v32 = vld [vmem:[%s12433_s1 + $0xb0] ss:$20 sps:$4 sm:$0xff]  }
  0xc4   :  { %2233 = vmatpush1.bf16.msra.mxu1 %v8939_v31  ;;  %2265 = vmatprep.subr.bf16.mxu0 %v8950_v34  ;;  %v9018_v31 = vld [vmem:[%s12433_s1 + $0x470] ss:$20 sps:$4 sm:$0xff]   ;;  %v10298_v34 = vshrl.u32 %v413_v29, 7  ;;  %v9064_v29 = vld [vmem:[%s12433_s1 + $0x920] ss:$20 sps:$4 sm:$0xff]  }
  0xc5   :  { %2234 = vmatprep.subr.bf16.mxu1 %v8947_v33  ;;  %v9022_v33 = vld [vmem:[%s12433_s1 + $0x448] ss:$20 sps:$4 sm:$0xff]  }
  0xc7   :  { %2266 = vmatpush1.bf16.msra.mxu0 %v8948_v36  ;;  %v9024_v36 = vld [vmem:[%s12433_s1 + $0x308] ss:$20 sps:$4 sm:$0xff]  }
  0xc8   :  { %2235 = vmatpush1.bf16.msra.mxu1 %v8945_v35  ;;  %2267 = vmatprep.subr.bf16.mxu0 %v8956_v38  ;;  %v9023_v35 = vld [vmem:[%s12433_s1 + $0x88] ss:$20 sps:$4 sm:$0xff]   ;;  %v9025_v38 = vld [vmem:[%s12433_s1 + $0x1a0] ss:$20 sps:$4 sm:$0xff]  }
  0xc9   :  { %2236 = vmatprep.subr.bf16.mxu1 %v8953_v37  ;;  %v10309_v37 = vld [vmem:[%s12436_s2] sm:$0x1f] }
  0xcb   :  { %2268 = vmatpush1.bf16.msra.mxu0 %v8954_v41  ;;  %v10318_v41 = vsub.s32 0, %v10298_v34 }
  0xcc   :  { %2237 = vmatpush1.bf16.msra.mxu1 %v8951_v39  ;;  %2269 = vmatprep.subr.bf16.mxu0 %v8962_v43  ;;  %v9026_v39 = vld [vmem:[%s12433_s1 + $0x420] ss:$20 sps:$4 sm:$0xff]  }
  0xcd   :  { %2238 = vmatprep.subr.bf16.mxu1 %v8959_v42  ;;  %v9027_v42 = vld [vmem:[%s12433_s1 + $0x60] ss:$20 sps:$4 sm:$0xff]  }
  0xce   :  { %v9028_v43 = vld [vmem:[%s12433_s1 + $0x2e0] ss:$20 sps:$4 sm:$0xff]  }
  0xcf   :  { %2270 = vmatpush1.bf16.msra.mxu0 %v8960_v45  ;;  %v9030_v45 = vld [vmem:[%s12433_s1 + $0x3f8] ss:$20 sps:$4 sm:$0xff]  }
  0xd0   :  { %2239 = vmatpush2.bf16.msra.mxu1 %v8957_v44  ;;  %2271 = vmatprep.subr.bf16.mxu0 %v8968_v47  ;;  %v9029_v44 = vld [vmem:[%s12433_s1 + $0x178] ss:$20 sps:$4 sm:$0xff]  }
  0xd1   :  { %2240 = vmatprep.subr.bf16.mxu1 %v8965_v46  ;;  %v416_v46 = vrot.slane %v10309_v37, %v10318_v41  ;;  %v9031_v47 = vld [vmem:[%s12433_s1 + $0x38] ss:$20 sps:$4 sm:$0xff]  }
  0xd3   :  { %2272 = vmatpush1.bf16.msra.mxu0 %v8966_v50 }
  0xd4   :  { %2241 = vmatpush2.bf16.msra.mxu1 %v8963_v48  ;;  %2273 = vmatprep.subr.bf16.mxu0 %v8974_v53  ;;  %v9032_v48 = vld [vmem:[%s12433_s1 + $0x2b8] ss:$20 sps:$4 sm:$0xff]  }
  0xd5   :  { %2242 = vmatprep.subr.bf16.mxu1 %v8971_v51 }
  0xd7   :  { %2274 = vmatpush1.bf16.msra.mxu0 %v8972_v55 }
  0xd8   :  { %2243 = vmatpush2.bf16.msra.mxu1 %v8969_v54  ;;  %2275 = vmatprep.subr.bf16.mxu0 %v8980_v57  ;;  %v9033_v54 = vld [vmem:[%s12433_s1 + $0x150] ss:$20 sps:$4 sm:$0xff]  }
  0xd9   :  { %2244 = vmatprep.subr.bf16.mxu1 %v8977_v56  ;;  %v9034_v57 = vld [vmem:[%s12433_s1 + $0x3d0] ss:$20 sps:$4 sm:$0xff]  }
  0xdb   :  { %2276 = vmatpush1.bf16.msra.mxu0 %v8978_v59  ;;  %v9035_v59 = vld [vmem:[%s12433_s1 + $0x10] ss:$20 sps:$4 sm:$0xff]  }
  0xdc   :  { %2245 = vmatpush2.bf16.msra.mxu1 %v8975_v58  ;;  %2277 = vmatprep.subr.bf16.mxu0 %v8986_v61 }
  0xdd   :  { %2246 = vmatprep.subr.bf16.mxu1 %v8983_v60 }
  0xdf   :  { %2278 = vmatpush1.bf16.msra.mxu0 %v8984_v0 }
  0xe0   :  { %2247 = vmatpush2.bf16.msra.mxu1 %v8981_v63  ;;  %2289 = vmatprep.subr.bf16.mxu0 %v8992_v2  ;;  %v9036_v63 = vld [vmem:[%s12433_s1 + $0x290] ss:$20 sps:$4 sm:$0xff]   ;;  %v9037_v2 = vld [vmem:[%s12433_s1 + $0x768] ss:$20 sps:$4 sm:$0xff]  }
  0xe1   :  { %2248 = vmatprep.subr.bf16.mxu1 %v8989_v1 }
  0xe3   :  { %2290 = vmatpush2.bf16.msra.mxu0 %v8990_v4  ;;  %v9039_v4 = vld [vmem:[%s12433_s1 + $0x8a8] ss:$20 sps:$4 sm:$0xff]  }
  0xe4   :  { %2249 = vmatpush2.bf16.msra.mxu1 %v8987_v3  ;;  %2291 = vmatprep.subr.bf16.mxu0 %v8998_v6  ;;  %v9038_v3 = vld [vmem:[%s12433_s1 + $0x628] ss:$20 sps:$4 sm:$0xff]   ;;  %v9040_v6 = vld [vmem:[%s12433_s1 + $0x740] ss:$20 sps:$4 sm:$0xff]  }
  0xe5   :  { %2250 = vmatprep.subr.bf16.mxu1 %v8995_v5  ;;  %v9413_v5 = vmov 0  }
  0xe7   :  { %2292 = vmatpush2.bf16.msra.mxu0 %v8996_v10  ;;  %v9042_v10 = vld [vmem:[%s12433_s1 + $0x880] ss:$20 sps:$4 sm:$0xff]  }
  0xe8   :  { %2251 = vmatpush2.bf16.msra.mxu1 %v8993_v7  ;;  %2293 = vmatprep.subr.bf16.mxu0 %v9004_v12  ;;  %v9041_v7 = vld [vmem:[%s12433_s1 + $0x600] ss:$20 sps:$4 sm:$0xff]   ;;  %v9044_v12 = vld [vmem:[%s12433_s1 + $0x5d8] ss:$20 sps:$4 sm:$0xff]  }
  0xe9   :  { %2252 = vmatprep.subr.bf16.mxu1 %v9001_v11  ;;  %v9043_v11 = vld [vmem:[%s12433_s1 + $0x718] ss:$20 sps:$4 sm:$0xff]  }
  0xeb   :  { %2294 = vmatpush2.bf16.msra.mxu0 %v9002_v14  ;;  %v9050_v14 = vld [vmem:[%s12433_s1 + $0x588] ss:$20 sps:$4 sm:$0xff]  }
  0xec   :  { %2253 = vmatpush2.bf16.msra.mxu1 %v8999_v13  ;;  %8413 = vmatprep.subr.bf16.mxu0 %v9005_v15  ;;  %v9045_v13 = vld [vmem:[%s12433_s1 + $0x858] ss:$20 sps:$4 sm:$0xff]   ;;  %v9051_v15 = vld [vmem:[%s12433_s1 + $0x808] ss:$20 sps:$4 sm:$0xff]  }
  0xed   :  { %8435 = vmatprep.subr.bf16.mxu1 %v9006_v16  ;;  %v9052_v16 = vld [vmem:[%s12433_s1 + $0x6a0] ss:$20 sps:$4 sm:$0xff]  }
  0xee   :  { %2296 = vmatmul.mubr.bf16.vlgmr.msra.gmra.mxu0 %v9849_v62 }
  0xef   :  { %2255 = vmatmul.mubr.bf16.vlgmr.msra.gmra.mxu1 %v9913_v21  ;;  %8414 = vmatpush3.bf16.msra.mxu0 %v9007_v17  ;;  %v9053_v17 = vld [vmem:[%s12433_s1 + $0x560] ss:$20 sps:$4 sm:$0xff]  }
  0xf0   :  { %8436 = vmatpush3.bf16.msra.mxu1 %v9008_v18  ;;  %8415 = vmatprep.subr.bf16.mxu0 %v9009_v19  ;;  %v9054_v18 = vld [vmem:[%s12433_s1 + $0x7e0] ss:$20 sps:$4 sm:$0xff]   ;;  %v9055_v19 = vld [vmem:[%s12433_s1 + $0x678] ss:$20 sps:$4 sm:$0xff]  }
  0xf1   :  { %8437 = vmatprep.subr.bf16.mxu1 %v9010_v20  ;;  %2336 = vmatprep.mubr.bf16.mxu0 %v9623_v49  ;;  %v9020_v49 = vld [vmem:[%s12433_s1 + $0x330] ss:$20 sps:$4 sm:$0xff]   ;;  %v9056_v20 = vld [vmem:[%s12433_s1 + $0x538] ss:$20 sps:$4 sm:$0xff]  }
  0xf2   :  { %2376 = vmatprep.mubr.bf16.mxu1 %v9631_v52  ;;  %v9021_v52 = vld [vmem:[%s12433_s1 + $0x1c8] ss:$20 sps:$4 sm:$0xff]  }
  0xf3   :  { %8416 = vmatpush3.bf16.msra.mxu0 %v9011_v22  ;;  %v9057_v22 = vld [vmem:[%s12433_s1 + $0x7b8] ss:$20 sps:$4 sm:$0xff]  }
  0xf4   :  { %8438 = vmatpush3.bf16.msra.mxu1 %v9012_v24  ;;  %8417 = vmatprep.subr.bf16.mxu0 %v9013_v25  ;;  %v9058_v24 = vld [vmem:[%s12433_s1 + $0x650] ss:$20 sps:$4 sm:$0xff]  }
  0xf5   :  { %8439 = vmatprep.subr.bf16.mxu1 %v9014_v26  ;;  %v9059_v25 = vld [vmem:[%s12433_s1 + $0x510] ss:$20 sps:$4 sm:$0xff]  }
  0xf6   :  { %v9060_v26 = vld [vmem:[%s12433_s1 + $0x790] ss:$20 sps:$4 sm:$0xff]  }
  0xf7   :  { %8418 = vmatpush3.bf16.msra.mxu0 %v9015_v27  ;;  %v9063_v27 = vld [vmem:[%s12435_s3 + $0xac] ss:$12 sps:$4 sm:$0xff]  }
  0xf8   :  { %8440 = vmatpush3.bf16.msra.mxu1 %v9016_v28  ;;  %8419 = vmatprep.subr.bf16.mxu0 %v9017_v30  ;;  %v9061_v28 = vld [vmem:[%s12435_s3 + $0xa8] ss:$12 sps:$4 sm:$0xff]  }
  0xf9   :  { %8441 = vmatprep.subr.bf16.mxu1 %v9018_v31  ;;  %v9067_v30 = vld [vmem:[%s12435_s3 + $0x94] ss:$12 sps:$4 sm:$0xff]  }
  0xfb   :  { %8420 = vmatpush3.bf16.msra.mxu0 %v9019_v32  ;;  %v9065_v32 = vld [vmem:[%s12435_s3 + $0x90] ss:$12 sps:$4 sm:$0xff]  }
  0xfc   :  { %8442 = vmatpush3.bf16.msra.mxu1 %v9020_v49  ;;  %8421 = vmatprep.subr.bf16.mxu0 %v9021_v52  ;;  %v9068_v49 = vld [vmem:[%s12433_s1 + $0x8f8] ss:$20 sps:$4 sm:$0xff]  }
  0xfd   :  { %8443 = vmatprep.subr.bf16.mxu1 %v9022_v33  ;;  %v9071_v33 = vld [vmem:[%s12435_s3 + $0x7c] ss:$12 sps:$4 sm:$0xff]  }
  0xff   :  { %8422 = vmatpush3.bf16.msra.mxu0 %v9023_v35 }
 0x100   :  { %8444 = vmatpush3.bf16.msra.mxu1 %v9024_v36  ;;  %8423 = vmatprep.subr.bf16.mxu0 %v9025_v38  ;;  %v9072_v36 = vld [vmem:[%s12433_s1 + $0x8d0] ss:$20 sps:$4 sm:$0xff]  }
 0x101   :  { %8445 = vmatprep.subr.bf16.mxu1 %v9026_v39  ;;  %v9075_v39 = vld [vmem:[%s12435_s3 + $0x64] ss:$12 sps:$4 sm:$0xff]  }
 0x102   :  { %v2010_v50 = vpop.f32.mrf.mxu0 }
 0x103   :  { %v2051_v51 = vpop.f32.mrf.mxu1  ;;  %v2011_v53 = vadd.f32 %v2010_v50, %v416_v46  ;;  %8424 = vmatpush3.bf16.msra.mxu0 %v9027_v42  ;;  %v9114_v42 = vld [vmem:[%s12435_s3 + $0x22c] ss:$12 sps:$4 sm:$0xff]   ;;  %v9076_v50 = vld [vmem:[%s12435_s3 + $0x48] ss:$12 sps:$4 sm:$0xff]  }
 0x104   :  { %8446 = vmatpush3.bf16.msra.mxu1 %v9028_v43  ;;  %v10343_v55 = vpop.f32.mrf.mxu0  ;;  %8425 = vmatprep.subr.bf16.mxu0 %v9029_v44  ;;  %v10483_v43 = vsub.s32 1, %v10298_v34  ;;  %v9073_v44 = vld [vmem:[%s12435_s3 + $0x60] ss:$12 sps:$4 sm:$0xff]  }
 0x105   :  { %v10345_v56 = vpop.f32.mrf.mxu1  ;;  %8447 = vmatprep.subr.bf16.mxu1 %v9030_v45  ;;  %v10350_v58 = vadd.f32 %v2051_v51, %v2011_v53  ;;  %v9112_v45 = vld [vmem:[%s12435_s3 + $0x228] ss:$12 sps:$4 sm:$0xff]   ;;  %v9078_v46 = vld [vmem:[%s12435_s3 + $0x4c] ss:$12 sps:$4 sm:$0xff]   ;;  %v9115_v51 = vld [vmem:[%s12435_s3 + $0x210] ss:$12 sps:$4 sm:$0xff]  }
 0x106   :  { %v2014_v61 = vpop.f32.mrf.mxu0  ;;  %v9081_v53 = vld [vmem:[%s12435_s3 + $0x34] ss:$12 sps:$4 sm:$0xff]  }
 0x107   :  { %v2055_v60 = vpop.f32.mrf.mxu1  ;;  %8426 = vmatpush3.bf16.msra.mxu0 %v9031_v47  ;;  %v9117_v47 = vld [vmem:[%s12435_s3 + $0x214] ss:$12 sps:$4 sm:$0xff]  }
 0x108   :  { %8448 = vmatpush3.bf16.msra.mxu1 %v9032_v48  ;;  %v2015_v1 = vpop.f32.mrf.mxu0  ;;  %8427 = vmatprep.subr.bf16.mxu0 %v9033_v54  ;;  %v420_v48 = vrot.slane %v10309_v37, %v10483_v43  ;;  %v9084_v60 = vld [vmem:[%s12435_s3 + $0x1c] ss:$12 sps:$4 sm:$0xff]  }
 0x109   :  { %v2056_v0 = vpop.f32.mrf.mxu1  ;;  %8449 = vmatprep.subr.bf16.mxu1 %v9034_v57  ;;  %v9079_v57 = vld [vmem:[%s12435_s3 + $0x30] ss:$12 sps:$4 sm:$0xff]   ;;  %v9121_v1 = vld [vmem:[%s12435_s3 + $0x1e0] ss:$12 sps:$4 sm:$0xff]  }
 0x10a   :  { %v2013_v54 = vadd.f32 %v10343_v55, %v420_v48  ;;  %v9123_v55 = vld [vmem:[%s12435_s3 + $0x1e4] ss:$12 sps:$4 sm:$0xff]   ;;  %v9109_v48 = vld [vmem:[%s12435_s3 + $0xc0] ss:$12 sps:$4 sm:$0xff]  }
 0x10b   :  { %8428 = vmatpush3.bf16.msra.mxu0 %v9035_v59  ;;  %v9118_v59 = vld [vmem:[%s12435_s3 + $0x1f8] ss:$12 sps:$4 sm:$0xff]  }
 0x10c   :  { %8450 = vmatpush3.bf16.msra.mxu1 %v9036_v63  ;;  %8457 = vmatprep.subr.bf16.mxu0 %v9037_v2  ;;  %v2054_v63 = vadd.f32 %v10345_v56, %v2013_v54  ;;  %v9082_v0 = vld [vmem:[%s12435_s3 + $0x18] ss:$12 sps:$4 sm:$0xff]   ;;  %v9151_v54 = vld [vmem:[%s12435_s3 + $0x270] ss:$12 sps:$4 sm:$0xff]  }
 0x10d   :  { %2424 = vmatprep.subr.bf16.mxu1 %v9413_v5  ;;  %v9126_v56 = vld [vmem:[%s12435_s3 + $0x1cc] ss:$12 sps:$4 sm:$0xff]  }
 0x10e   :  { %2337 = vmatmul.mubr.bf16.vlgmr.msra.gmra.mxu0 %v9692_v8  ;;  %v9046_v8 = vld [vmem:[%s12433_s1 + $0x6f0] ss:$20 sps:$4 sm:$0xff]  }
 0x10f   :  { %2377 = vmatmul.mubr.bf16.vlgmr.msra.gmra.mxu1 %v9694_v9  ;;  %8458 = vmatpush3.bf16.msra.mxu0 %v9038_v3  ;;  %v9047_v9 = vld [vmem:[%s12433_s1 + $0x5b0] ss:$20 sps:$4 sm:$0xff]  }
 0x110   :  { %2425 = vmatpush1.bf16.msra.mxu1 %v9039_v4  ;;  %8459 = vmatprep.subr.bf16.mxu0 %v9040_v6  ;;  %v9087_v3 = vld [vmem:[%s12435_s3 + $0x4] ss:$12 sps:$4 sm:$0xff]  }
 0x111   :  { %2426 = vmatprep.subr.bf16.mxu1 %v9413_v5  ;;  %2416 = vmatprep.mubr.bf16.mxu0 %v9789_v40  ;;  %v9048_v40 = vld [vmem:[%s12433_s1 + $0x830] ss:$20 sps:$4 sm:$0xff]  }
 0x112   :  { %7809 = vmatprep.mubr.msk.bf16.mxu1 %vm1972_vm0, %v9737_v23  ;;  %v9049_v23 = vld [vmem:[%s12433_s1 + $0x6c8] ss:$20 sps:$4 sm:$0xff]  }
 0x113   :  { %8460 = vmatpush3.bf16.msra.mxu0 %v9041_v7 }
 0x114   :  { %2427 = vmatpush1.bf16.msra.mxu1 %v9042_v10  ;;  %8461 = vmatprep.subr.bf16.mxu0 %v9043_v11  ;;  %v9085_v10 = vld [vmem:[%s12435_s3] ss:$12 sps:$4 sm:$0xff]   ;;  %v9124_v11 = vld [vmem:[%s12435_s3 + $0x1c8] ss:$12 sps:$4 sm:$0xff]  }
 0x115   :  { %2428 = vmatprep.subr.bf16.mxu1 %v9413_v5 }
 0x117   :  { %8462 = vmatpush3.bf16.msra.mxu0 %v9044_v12 }
 0x118   :  { %2429 = vmatpush1.bf16.msra.mxu1 %v9045_v13  ;;  %8463 = vmatprep.subr.bf16.mxu0 %v9046_v8  ;;  %v9090_v13 = vld [vmem:[%s12435_s3 + $0x16c] ss:$12 sps:$4 sm:$0xff]   ;;  %v9129_v8 = vld [vmem:[%s12435_s3 + $0x1b4] ss:$12 sps:$4 sm:$0xff]  }
 0x119   :  { %2430 = vmatprep.subr.bf16.mxu1 %v9413_v5 }
 0x11b   :  { %8464 = vmatpush3.bf16.msra.mxu0 %v9047_v9 }
 0x11c   :  { %2431 = vmatpush1.bf16.msra.mxu1 %v9048_v40  ;;  %8465 = vmatprep.subr.bf16.mxu0 %v9049_v23  ;;  %v9088_v23 = vld [vmem:[%s12435_s3 + $0x168] ss:$12 sps:$4 sm:$0xff]  }
 0x11d   :  { %2432 = vmatprep.subr.bf16.mxu1 %v9413_v5 }
 0x11f   :  { %8466 = vmatpush3.bf16.msra.mxu0 %v9050_v14  ;;  %v9127_v14 = vld [vmem:[%s12435_s3 + $0x1b0] ss:$12 sps:$4 sm:$0xff]  }
 0x120   :  { %2433 = vmatpush1.bf16.msra.mxu1 %v9051_v15  ;;  %8467 = vmatprep.subr.bf16.mxu0 %v9052_v16  ;;  %v9093_v15 = vld [vmem:[%s12435_s3 + $0x154] ss:$12 sps:$4 sm:$0xff]   ;;  %v9132_v16 = vld [vmem:[%s12435_s3 + $0x19c] ss:$12 sps:$4 sm:$0xff]  }
 0x121   :  { %2434 = vmatprep.subr.bf16.mxu1 %v9413_v5 }
 0x123   :  { %8468 = vmatpush3.bf16.msra.mxu0 %v9053_v17  ;;  %v9091_v17 = vld [vmem:[%s12435_s3 + $0x150] ss:$12 sps:$4 sm:$0xff]  }
 0x124   :  { %2435 = vmatpush1.bf16.msra.mxu1 %v9054_v18  ;;  %8469 = vmatprep.subr.bf16.mxu0 %v9055_v19  ;;  %v9130_v18 = vld [vmem:[%s12435_s3 + $0x198] ss:$12 sps:$4 sm:$0xff]   ;;  %v9096_v19 = vld [vmem:[%s12435_s3 + $0x13c] ss:$12 sps:$4 sm:$0xff]  }
 0x125   :  { %2436 = vmatprep.subr.bf16.mxu1 %v9413_v5 }
 0x127   :  { %8470 = vmatpush3.bf16.msra.mxu0 %v9056_v20  ;;  %v9135_v20 = vld [vmem:[%s12435_s3 + $0x184] ss:$12 sps:$4 sm:$0xff]  }
 0x128   :  { %2437 = vmatpush1.bf16.msra.mxu1 %v9057_v22  ;;  %8471 = vmatprep.subr.bf16.mxu0 %v9058_v24  ;;  %v9094_v22 = vld [vmem:[%s12435_s3 + $0x138] ss:$12 sps:$4 sm:$0xff]   ;;  %v9133_v24 = vld [vmem:[%s12435_s3 + $0x180] ss:$12 sps:$4 sm:$0xff]  }
 0x129   :  { %2438 = vmatprep.subr.bf16.mxu1 %v9413_v5 }
 0x12b   :  { %8472 = vmatpush3.bf16.msra.mxu0 %v9059_v25  ;;  %v9099_v25 = vld [vmem:[%s12435_s3 + $0x124] ss:$12 sps:$4 sm:$0xff]  }
 0x12c   :  { %2439 = vmatpush1.bf16.msra.mxu1 %v9060_v26  ;;  %3295 = vmatprep.subr.bf16.mxu0 %v9063_v27  ;;  %v9138_v26 = vld [vmem:[%s12435_s3 + $0x2ec] ss:$12 sps:$4 sm:$0xff]  }
 0x12d   :  { %2450 = vmatprep.subr.bf16.mxu1 %v9413_v5  ;;  %v9097_v27 = vld [vmem:[%s12435_s3 + $0x120] ss:$12 sps:$4 sm:$0xff]  }
 0x12e   :  { %2417 = vmatmul.mubr.bf16.vlgmr.msra.gmra.mxu0 %v9913_v21  ;;  %v9069_v21 = vld [vmem:[%s12435_s3 + $0x78] ss:$12 sps:$4 sm:$0xff]  }
 0x12f   :  { %v10456_v31 = vpop.f32.mrf.mxu1  ;;  %3296 = vmatpush1.bf16.msra.mxu0 %v9061_v28  ;;  %v9136_v28 = vld [vmem:[%s12435_s3 + $0x2e8] ss:$12 sps:$4 sm:$0xff]  }
 0x130   :  { %2451 = vmatpush2.bf16.msra.mxu1 %v9064_v29  ;;  %3297 = vmatprep.subr.bf16.mxu0 %v9067_v30  ;;  %v9102_v29 = vld [vmem:[%s12435_s3 + $0x10c] ss:$12 sps:$4 sm:$0xff]   ;;  %v9141_v30 = vld [vmem:[%s12435_s3 + $0x2d4] ss:$12 sps:$4 sm:$0xff]  }
 0x131   :  { %v2135_v52 = vpop.f32.mrf.mxu1  ;;  %2452 = vmatprep.subr.bf16.mxu1 %v9413_v5 }
 0x133   :  { %v2137_v35 = vpop.f32.mrf.mxu1  ;;  %3298 = vmatpush1.bf16.msra.mxu0 %v9065_v32  ;;  %v9100_v32 = vld [vmem:[%s12435_s3 + $0x108] ss:$12 sps:$4 sm:$0xff]  }
 0x134   :  { %2453 = vmatpush2.bf16.msra.mxu1 %v9068_v49  ;;  %3299 = vmatprep.subr.bf16.mxu0 %v9071_v33  ;;  %v9139_v49 = vld [vmem:[%s12435_s3 + $0x2d0] ss:$12 sps:$4 sm:$0xff]  }
 0x135   :  { %v2138_v38 = vpop.f32.mrf.mxu1  ;;  %2454 = vmatprep.subr.bf16.mxu1 %v9413_v5  ;;  %v9144_v33 = vld [vmem:[%s12435_s3 + $0x2bc] ss:$12 sps:$4 sm:$0xff]  }
 0x136   :  { %v9103_v35 = vld [vmem:[%s12435_s3 + $0xf0] ss:$12 sps:$4 sm:$0xff]  }
 0x137   :  { %3300 = vmatpush1.bf16.msra.mxu0 %v9069_v21  ;;  %v9142_v21 = vld [vmem:[%s12435_s3 + $0x2b8] ss:$12 sps:$4 sm:$0xff]   ;;  %v9108_v38 = vld [vmem:[%s12435_s3 + $0xdc] ss:$12 sps:$4 sm:$0xff]  }
 0x138   :  { %2455 = vmatpush2.bf16.msra.mxu1 %v9072_v36  ;;  %3301 = vmatprep.subr.bf16.mxu0 %v9075_v39  ;;  %v9147_v39 = vld [vmem:[%s12435_s3 + $0x2a4] ss:$12 sps:$4 sm:$0xff]  }
 0x139   :  { %3336 = vmatprep.subr.bf16.mxu1 %v9114_v42  ;;  %v9106_v42 = vld [vmem:[%s12435_s3 + $0xd8] ss:$12 sps:$4 sm:$0xff]  }
 0x13b   :  { %2457 = vmatmul.mubr.bf16.vlgmr.msra.gmra.mxu1 %v9849_v62  ;;  %3302 = vmatpush1.bf16.msra.mxu0 %v9073_v44  ;;  %v9120_v62 = vld [vmem:[%s12435_s3 + $0x1fc] ss:$12 sps:$4 sm:$0xff]  }
 0x13c   :  { %3337 = vmatpush1.bf16.msra.mxu1 %v9112_v45  ;;  %3303 = vmatprep.subr.bf16.mxu0 %v9078_v46  ;;  %v9111_v45 = vld [vmem:[%s12435_s3 + $0xc4] ss:$12 sps:$4 sm:$0xff]   ;;  %v9150_v46 = vld [vmem:[%s12435_s3 + $0x28c] ss:$12 sps:$4 sm:$0xff]  }
 0x13d   :  { %3338 = vmatprep.subr.bf16.mxu1 %v9117_v47  ;;  %v2630_v47 = vld [vmem:[%s12435_s3 + $0x3a8] sm:$0x77] }
 0x13f   :  { %3304 = vmatpush1.bf16.msra.mxu0 %v9076_v50 }
 0x140   :  { %3339 = vmatpush1.bf16.msra.mxu1 %v9115_v51  ;;  %3305 = vmatprep.subr.bf16.mxu0 %v9081_v53  ;;  %v9153_v51 = vld [vmem:[%s12435_s3 + $0x274] ss:$12 sps:$4 sm:$0xff]   ;;  %v7928_v53 = vcombine.high %v2630_v47, %v2630_v47 }
 0x141   :  { %3340 = vmatprep.subr.bf16.mxu1 %v9120_v62  ;;  %v7927_v62 = vcombine.low %v2630_v47, %v2630_v47 }
 0x142   :  { %v10525_v61 = vpop.f32.mrf.mxu0 }
 0x143   :  { %3306 = vmatpush1.bf16.msra.mxu0 %v9079_v57  ;;  %v2093_v36 = vadd.f32 %v10525_v61, %v10350_v58  ;;  %v9145_v58 = vld [vmem:[%s12435_s3 + $0x2a0] ss:$12 sps:$4 sm:$0xff]  }
 0x144   :  { %3341 = vmatpush1.bf16.msra.mxu1 %v9118_v59  ;;  %v2094_v2 = vpop.f32.mrf.mxu0  ;;  %3307 = vmatprep.subr.bf16.mxu0 %v9084_v60  ;;  %v9156_v59 = vld [vmem:[%s12435_s3 + $0x25c] ss:$12 sps:$4 sm:$0xff]   ;;  %v3287_v60 = vsel %vm3285_vm1, %v7927_v62, 0  ;;  %v9163_v62 = vld [vmem:[%s12435_s3 + $0x98] ss:$12 sps:$4 sm:$0xff]  }
 0x145   :  { %3342 = vmatprep.subr.bf16.mxu1 %v9123_v55  ;;  %v2095_v4 = vadd.f32 %v2094_v2, %v2054_v63  ;;  %v2134_v44 = vadd.f32 %v10456_v31, %v2093_v36  ;;  %v9148_v31 = vld [vmem:[%s12435_s3 + $0x288] ss:$12 sps:$4 sm:$0xff]   ;;  %v9154_v63 = vld [vmem:[%s12435_s3 + $0x258] ss:$12 sps:$4 sm:$0xff]  }
 0x146   :  { %v2096_v6 = vpop.f32.mrf.mxu0  ;;  %v9181_v55 = vld [vmem:[%s12435_s3 + $0x394] ss:$12 sps:$4 sm:$0xff]   ;;  %v9159_v2 = vld [vmem:[%s12435_s3 + $0x244] ss:$12 sps:$4 sm:$0xff]  }
 0x147   :  { %v2136_v7 = vadd.f32 %v2135_v52, %v2095_v4  ;;  %3308 = vmatpush1.bf16.msra.mxu0 %v9082_v0  ;;  %v9105_v52 = vld [vmem:[%s12435_s3 + $0xf4] ss:$12 sps:$4 sm:$0xff]   ;;  %v2464_v50 = vmax.f32 %v2134_v44, 0.0  ;;  %v9179_v0 = vld [vmem:[%s12435_s3 + $0x390] ss:$12 sps:$4 sm:$0xff]  }
 0x148   :  { %3343 = vmatpush1.bf16.msra.mxu1 %v9121_v1  ;;  %v2097_v12 = vpop.f32.mrf.mxu0  ;;  %3309 = vmatprep.subr.bf16.mxu0 %v9087_v3  ;;  %v9185_v3 = vld [vmem:[%s12435_s3 + $0x37c] ss:$12 sps:$4 sm:$0xff]   ;;  %v9157_v4 = vld [vmem:[%s12435_s3 + $0x240] ss:$12 sps:$4 sm:$0xff]   ;;  %v9183_v6 = vld [vmem:[%s12435_s3 + $0x378] ss:$12 sps:$4 sm:$0xff]  }
 0x149   :  { %3344 = vmatprep.subr.bf16.mxu1 %v9126_v56  ;;  %v2465_v9 = vmax.f32 %v2136_v7, 0.0  ;;  %v10657_v57 = vpack.c.bf16 %v2464_v50, %v2464_v50  ;;  %v9187_v12 = vld [vmem:[%s12435_s3 + $0x360] ss:$12 sps:$4 sm:$0xff]   ;;  %v9161_v50 = vld [vmem:[%s12435_s3 + $0xb0] ss:$12 sps:$4 sm:$0xff]  }
 0x14b   :  { %v10552_v40 = vpack.c.bf16 %v2465_v9, %v2465_v9  ;;  %3310 = vmatpush1.bf16.msra.mxu0 %v9085_v10  ;;  %v9160_v10 = vld [vmem:[%s12435_s3 + $0x170] ss:$12 sps:$4 sm:$0xff]   ;;  %v9197_v9 = vld [vmem:[%s12435_s3 + $0x334] ss:$12 sps:$4 sm:$0xff]  }
 0x14c   :  { %3345 = vmatpush1.bf16.msra.mxu1 %v9124_v11  ;;  %3311 = vmatprep.subr.bf16.mxu0 %v9090_v13  ;;  %v9189_v11 = vld [vmem:[%s12435_s3 + $0x364] ss:$12 sps:$4 sm:$0xff]   ;;  %v9193_v13 = vld [vmem:[%s12435_s3 + $0x34c] ss:$12 sps:$4 sm:$0xff]  }
 0x14d   :  { %3346 = vmatprep.subr.bf16.mxu1 %v9129_v8  ;;  %3327 = vmatprep.mubr.bf16.mxu0 %v10552_v40  ;;  %v9191_v8 = vld [vmem:[%s12435_s3 + $0x348] ss:$12 sps:$4 sm:$0xff]  }
 0x14f   :  { %3312 = vmatpush2.bf16.msra.mxu0 %v9088_v23  ;;  %v9195_v23 = vld [vmem:[%s12435_s3 + $0x330] ss:$12 sps:$4 sm:$0xff]  }
 0x150   :  { %3347 = vmatpush1.bf16.msra.mxu1 %v9127_v14  ;;  %3313 = vmatprep.subr.bf16.mxu0 %v9093_v15  ;;  %v9201_v14 = vld [vmem:[%s12435_s3 + $0x31c] ss:$12 sps:$4 sm:$0xff]  }
 0x151   :  { %3348 = vmatprep.subr.bf16.mxu1 %v9132_v16  ;;  %v9199_v16 = vld [vmem:[%s12435_s3 + $0x318] ss:$12 sps:$4 sm:$0xff]  }
 0x153   :  { %3314 = vmatpush2.bf16.msra.mxu0 %v9091_v17 }
 0x154   :  { %3349 = vmatpush1.bf16.msra.mxu1 %v9130_v18  ;;  %3315 = vmatprep.subr.bf16.mxu0 %v9096_v19  ;;  %v9205_v18 = vld [vmem:[%s12435_s3 + $0x304] ss:$12 sps:$4 sm:$0xff]  }
 0x155   :  { %3350 = vmatprep.subr.bf16.mxu1 %v9135_v20  ;;  %v9203_v20 = vld [vmem:[%s12435_s3 + $0x300] ss:$12 sps:$4 sm:$0xff]  }
 0x157   :  { %3316 = vmatpush2.bf16.msra.mxu0 %v9094_v22 }
 0x158   :  { %3351 = vmatpush1.bf16.msra.mxu1 %v9133_v24  ;;  %3317 = vmatprep.subr.bf16.mxu0 %v9099_v25  ;;  %v9207_v24 = vld [vmem:[%s12435_s3 + $0x2f0] ss:$12 sps:$4 sm:$0xff]   ;;  %v10724_v25 = vsub.s32 2, %v10298_v34 }
 0x159   :  { %3352 = vmatprep.subr.bf16.mxu1 %v9138_v26  ;;  %v10727_v26 = vsub.s32 3, %v10298_v34 }
 0x15b   :  { %3318 = vmatpush2.bf16.msra.mxu0 %v9097_v27  ;;  %v424_v27 = vrot.slane %v10309_v37, %v10724_v25 }
 0x15c   :  { %3353 = vmatpush2.bf16.msra.mxu1 %v9136_v28  ;;  %3319 = vmatprep.subr.bf16.mxu0 %v9102_v29  ;;  %v428_v28 = vrot.slane %v10309_v37, %v10727_v26 }
 0x15d   :  { %3354 = vmatprep.subr.bf16.mxu1 %v9141_v30 }
 0x15f   :  { %3320 = vmatpush2.bf16.msra.mxu0 %v9100_v32 }
 0x160   :  { %3355 = vmatpush2.bf16.msra.mxu1 %v9139_v49  ;;  %3321 = vmatprep.subr.bf16.mxu0 %v9105_v52 }
 0x161   :  { %3356 = vmatprep.subr.bf16.mxu1 %v9144_v33 }
 0x163   :  { %3322 = vmatpush2.bf16.msra.mxu0 %v9103_v35 }
 0x164   :  { %3357 = vmatpush2.bf16.msra.mxu1 %v9142_v21  ;;  %3323 = vmatprep.subr.bf16.mxu0 %v9108_v38 }
 0x165   :  { %3358 = vmatprep.subr.bf16.mxu1 %v9147_v39 }
 0x167   :  { %3324 = vmatpush2.bf16.msra.mxu0 %v9106_v42 }
 0x168   :  { %3359 = vmatpush2.bf16.msra.mxu1 %v9145_v58  ;;  %3325 = vmatprep.subr.bf16.mxu0 %v9111_v45 }
 0x169   :  { %3360 = vmatprep.subr.bf16.mxu1 %v9150_v46 }
 0x16b   :  { %3326 = vmatpush2.bf16.msra.mxu0 %v9109_v48 }
 0x16c   :  { %3361 = vmatpush2.bf16.msra.mxu1 %v9148_v31  ;;  %7930 = vmatprep.subr.msk.bf16.mxu0 %vm3285_vm1, %v7928_v53  ;;  %v9162_v53 = vld [vmem:[%s12435_s3 + $0x158] ss:$12 sps:$4 sm:$0xff]  }
 0x16d   :  { %3362 = vmatprep.subr.bf16.mxu1 %v9153_v51 }
 0x16e   :  { %3328 = vmatmul.mubr.bf16.vlgmr.msra.gmra.mxu0 %v10657_v57 }
 0x16f   :  { %v2174_v61 = vpop.f32.mrf.mxu1  ;;  %3378 = vmatpush1.bf16.msra.mxu0 %v3287_v60  ;;  %3409 = vmatprep.mubr.bf16.mxu0 %v9413_v5  ;;  %v9166_v60 = vld [vmem:[%s12435_s3 + $0x128] ss:$12 sps:$4 sm:$0xff]  }
 0x170   :  { %3363 = vmatpush2.bf16.msra.mxu1 %v9151_v54  ;;  %3379 = vmatprep.subr.bf16.mxu0 %v9181_v55  ;;  %v2175_v29 = vadd.f32 %v2174_v61, %v424_v27  ;;  %v9164_v54 = vld [vmem:[%s12435_s3 + $0x140] ss:$12 sps:$4 sm:$0xff]   ;;  %v9168_v55 = vld [vmem:[%s12435_s3 + $0x110] ss:$12 sps:$4 sm:$0xff]  }
 0x171   :  { %v2176_v1 = vpop.f32.mrf.mxu1  ;;  %3364 = vmatprep.subr.bf16.mxu1 %v9156_v59  ;;  %v9165_v59 = vld [vmem:[%s12435_s3 + $0x80] ss:$12 sps:$4 sm:$0xff]   ;;  %v9169_v61 = vld [vmem:[%s12435_s3 + $0x50] ss:$12 sps:$4 sm:$0xff]  }
 0x172   :  { %v2177_v30 = vadd.f32 %v2176_v1, %v428_v28  ;;  %v9172_v1 = vld [vmem:[%s12435_s3 + $0xe0] ss:$12 sps:$4 sm:$0xff]  }
 0x173   :  { %v2178_v56 = vpop.f32.mrf.mxu1  ;;  %3380 = vmatpush1.bf16.msra.mxu0 %v9179_v0  ;;  %v9171_v0 = vld [vmem:[%s12435_s3 + $0x38] ss:$12 sps:$4 sm:$0xff]   ;;  %v9202_v27 = vld [vmem:[%s12435_s3 + $0x320] ss:$12 sps:$4 sm:$0xff]  }
 0x174   :  { %3365 = vmatpush2.bf16.msra.mxu1 %v9154_v63  ;;  %3381 = vmatprep.subr.bf16.mxu0 %v9185_v3  ;;  %v9170_v63 = vld [vmem:[%s12435_s3 + $0xf8] ss:$12 sps:$4 sm:$0xff]   ;;  %v9173_v56 = vld [vmem:[%s12435_s3 + $0x20] ss:$12 sps:$4 sm:$0xff]  }
 0x175   :  { %v2179_v7 = vpop.f32.mrf.mxu1  ;;  %3366 = vmatprep.subr.bf16.mxu1 %v9159_v2 }
 0x176   :  { %v9174_v7 = vld [vmem:[%s12435_s3 + $0xc8] ss:$12 sps:$4 sm:$0xff]  }
 0x177   :  { %3382 = vmatpush1.bf16.msra.mxu0 %v9183_v6 }
 0x178   :  { %3367 = vmatpush2.bf16.msra.mxu1 %v9157_v4  ;;  %3383 = vmatprep.subr.bf16.mxu0 %v9189_v11 }
 0x179   :  { %8479 = vmatprep.subr.bf16.mxu1 %v9160_v10 }
 0x17b   :  { %3384 = vmatpush1.bf16.msra.mxu0 %v9187_v12  ;;  %v9175_v12 = vld [vmem:[%s12435_s3 + $0x8] ss:$12 sps:$4 sm:$0xff]  }
 0x17c   :  { %3385 = vmatprep.subr.bf16.mxu0 %v9193_v13 }
 0x17f   :  { %3386 = vmatpush1.bf16.msra.mxu0 %v9191_v8 }
 0x180   :  { %3387 = vmatprep.subr.bf16.mxu0 %v9197_v9  ;;  %v9178_v9 = vld [vmem:[%s12435_s3 + $0x3b0] ss:$0 sps:$4 sm:$0x77]  }
 0x182   :  { %v2215_v15 = vpop.f32.mrf.mxu0 }
 0x183   :  { %3388 = vmatpush1.bf16.msra.mxu0 %v9195_v23  ;;  %v2216_v32 = vadd.f32 %v2215_v15, %v2175_v29  ;;  %v9414_v23 = vmov 0.0   ;;  %v9182_v15 = vld [vmem:[%s12435_s3 + $0x398] ss:$12 sps:$4 sm:$0xff]  }
 0x184   :  { %v2217_v17 = vpop.f32.mrf.mxu0  ;;  %3389 = vmatprep.subr.bf16.mxu0 %v9201_v14  ;;  %v3293_v14 = vsel %vm3285_vm1, %v9178_v9, 0  ;;  %v9238_v9 = vld [vmem:[%s12437_s5 + $0x50] ss:$20 sps:$4 sm:$0xff]  }
 0x185   :  { %v2218_v33 = vadd.f32 %v2217_v17, %v2177_v30  ;;  %v9194_v17 = vld [vmem:[%s12435_s3 + $0x350] ss:$12 sps:$4 sm:$0xff]  }
 0x186   :  { %v2219_v19 = vpop.f32.mrf.mxu0 }
 0x187   :  { %3390 = vmatpush1.bf16.msra.mxu0 %v9199_v16  ;;  %v9186_v16 = vld [vmem:[%s12435_s3 + $0x380] ss:$12 sps:$4 sm:$0xff]   ;;  %v9198_v19 = vld [vmem:[%s12435_s3 + $0x338] ss:$12 sps:$4 sm:$0xff]  }
 0x188   :  { %v2220_v22 = vpop.f32.mrf.mxu0  ;;  %3391 = vmatprep.subr.bf16.mxu0 %v9205_v18  ;;  %v10810_v18 = vsub.s32 4, %v10298_v34 }
 0x18a   :  { %v432_v22 = vrot.slane %v10309_v37, %v10810_v18 }
 0x18b   :  { %3392 = vmatpush1.bf16.msra.mxu0 %v9203_v20 }
 0x18c   :  { %8501 = vmatprep.subr.bf16.mxu0 %v9207_v24 }
 0x1ae   :  { %v2297_v52 = vpop.f32.mrf.mxu0 }
 0x1af   :  { %v2256_v49 = vpop.f32.mrf.mxu1 }
 0x1b0   :  { %v2257_v35 = vadd.f32 %v2256_v49, %v2216_v32  ;;  %v2299_v36 = vpop.f32.mrf.mxu0  ;;  %v9206_v32 = vld [vmem:[%s12435_s3 + $0x308] ss:$12 sps:$4 sm:$0xff]  }
 0x1b1   :  { %v2258_v21 = vpop.f32.mrf.mxu1 }
 0x1b2   :  { %v2298_v38 = vadd.f32 %v2297_v52, %v2257_v35  ;;  %v2259_v39 = vadd.f32 %v2258_v21, %v2218_v33  ;;  %v2301_v58 = vpop.f32.mrf.mxu0 }
 0x1b3   :  { %v2260_v42 = vpop.f32.mrf.mxu1  ;;  %v9208_v58 = vld [vmem:[%s12435_s3 + $0x230] ss:$12 sps:$4 sm:$0xff]  }
 0x1b4   :  { %v2300_v44 = vadd.f32 %v2299_v36, %v2259_v39  ;;  %v2466_v45 = vmax.f32 %v2298_v38, 0.0  ;;  %v2302_v47 = vpop.f32.mrf.mxu0 }
 0x1b5   :  { %v2261_v46 = vpop.f32.mrf.mxu1  ;;  %v9210_v47 = vld [vmem:[%s12435_s3 + $0x218] ss:$12 sps:$4 sm:$0xff]  }
 0x1b6   :  { %v2467_v48 = vmax.f32 %v2300_v44, 0.0  ;;  %v10738_v51 = vpack.c.bf16 %v2466_v45, %v2466_v45  ;;  %v9209_v45 = vld [vmem:[%s12435_s3 + $0x2d8] ss:$12 sps:$4 sm:$0xff]  }
 0x1b8   :  { %v10733_v31 = vpack.c.bf16 %v2467_v48, %v2467_v48  ;;  %v9211_v48 = vld [vmem:[%s12435_s3 + $0x2c0] ss:$12 sps:$4 sm:$0xff]  }
 0x1ba   :  { %3368 = vmatprep.mubr.bf16.mxu1 %v10733_v31 }
 0x1bb   :  { %3369 = vmatmul.mubr.bf16.vlgmr.msra.gmra.mxu1 %v10738_v51 }
 0x1bc   :  { %8480 = vmatpush3.bf16.msra.mxu1 %v9161_v50  ;;  %3450 = vmatprep.mubr.bf16.mxu1 %v10552_v40  ;;  %v9167_v40 = vld [vmem:[%s12435_s3 + $0x68] ss:$12 sps:$4 sm:$0xff]   ;;  %v9212_v50 = vld [vmem:[%s12435_s3 + $0x200] ss:$12 sps:$4 sm:$0xff]  }
 0x1bd   :  { %8481 = vmatprep.subr.bf16.mxu1 %v9162_v53  ;;  %v9214_v53 = vld [vmem:[%s12435_s3 + $0x1e8] ss:$12 sps:$4 sm:$0xff]  }
 0x1c0   :  { %8482 = vmatpush3.bf16.msra.mxu1 %v9163_v62  ;;  %v9215_v62 = vld [vmem:[%s12435_s3 + $0x290] ss:$12 sps:$4 sm:$0xff]  }
 0x1c1   :  { %8483 = vmatprep.subr.bf16.mxu1 %v9164_v54  ;;  %v9216_v54 = vld [vmem:[%s12435_s3 + $0x1d0] ss:$12 sps:$4 sm:$0xff]  }
 0x1c4   :  { %8484 = vmatpush3.bf16.msra.mxu1 %v9165_v59  ;;  %v9217_v59 = vld [vmem:[%s12435_s3 + $0x278] ss:$12 sps:$4 sm:$0xff]  }
 0x1c5   :  { %8485 = vmatprep.subr.bf16.mxu1 %v9166_v60  ;;  %v9218_v60 = vld [vmem:[%s12435_s3 + $0x1b8] ss:$12 sps:$4 sm:$0xff]  }
 0x1c8   :  { %8486 = vmatpush3.bf16.msra.mxu1 %v9167_v40  ;;  %v9219_v40 = vld [vmem:[%s12435_s3 + $0x260] ss:$12 sps:$4 sm:$0xff]  }
 0x1c9   :  { %8487 = vmatprep.subr.bf16.mxu1 %v9168_v55  ;;  %v9220_v55 = vld [vmem:[%s12435_s3 + $0x1a0] ss:$12 sps:$4 sm:$0xff]  }
 0x1cc   :  { %8488 = vmatpush3.bf16.msra.mxu1 %v9169_v61  ;;  %v9221_v61 = vld [vmem:[%s12435_s3 + $0x248] ss:$12 sps:$4 sm:$0xff]  }
 0x1cd   :  { %8489 = vmatprep.subr.bf16.mxu1 %v9170_v63  ;;  %v9222_v63 = vld [vmem:[%s12435_s3 + $0x188] ss:$12 sps:$4 sm:$0xff]  }
 0x1ce   :  { %v8429_v2 = vpop.f32.mrf.mxu0 }
 0x1cf   :  { %v8451_v3 = vpop.f32.mrf.mxu1 }
 0x1d0   :  { %8490 = vmatpush3.bf16.msra.mxu1 %v9171_v0  ;;  %v8430_v4 = vpop.f32.mrf.mxu0  ;;  %v9225_v0 = vld [vmem:[%s12437_s5 + $0x11c] ss:$20 sps:$4 sm:$0xff]  }
 0x1d1   :  { %v8452_v6 = vpop.f32.mrf.mxu1  ;;  %8491 = vmatprep.subr.bf16.mxu1 %v9172_v1  ;;  %v8431_v24 = vadd.f32 %v8430_v4, %v8429_v2  ;;  %v9223_v1 = vld [vmem:[%s12437_s5 + $0x118] ss:$20 sps:$4 sm:$0xff]   ;;  %v9228_v2 = vld [vmem:[%s12437_s5 + $0xf4] ss:$20 sps:$4 sm:$0xff]  }
 0x1d2   :  { %v8432_v11 = vpop.f32.mrf.mxu0  ;;  %v8453_v37 = vadd.f32 %v8452_v6, %v8451_v3  ;;  %v9226_v3 = vld [vmem:[%s12437_s5 + $0xf0] ss:$20 sps:$4 sm:$0xff]   ;;  %v9229_v4 = vld [vmem:[%s12437_s5 + $0xc8] ss:$20 sps:$4 sm:$0xff]  }
 0x1d3   :  { %v8454_v10 = vpop.f32.mrf.mxu1  ;;  %v2339_v30 = vadd.f32 %v8431_v24, %v432_v22  ;;  %v9234_v6 = vld [vmem:[%s12437_s5 + $0xa4] ss:$20 sps:$4 sm:$0xff]   ;;  %v9252_v22 = vld [vmem:[%s12437_s5 + $0x234] ss:$20 sps:$4 sm:$0xff]  }
 0x1d4   :  { %8492 = vmatpush3.bf16.msra.mxu1 %v9173_v56  ;;  %v8433_v8 = vpop.f32.mrf.mxu0  ;;  %v9231_v56 = vld [vmem:[%s12437_s5 + $0xcc] ss:$20 sps:$4 sm:$0xff]   ;;  %v9250_v24 = vld [vmem:[%s12437_s5 + $0x230] ss:$20 sps:$4 sm:$0xff]  }
 0x1d5   :  { %v8455_v13 = vpop.f32.mrf.mxu1  ;;  %8493 = vmatprep.subr.bf16.mxu1 %v9174_v7  ;;  %v2379_v33 = vadd.f32 %v8453_v37, %v2339_v30  ;;  %v9237_v7 = vld [vmem:[%s12437_s5 + $0x7c] ss:$20 sps:$4 sm:$0xff]   ;;  %v9235_v11 = vld [vmem:[%s12437_s5 + $0x78] ss:$20 sps:$4 sm:$0xff]   ;;  %v9256_v30 = vld [vmem:[%s12437_s5 + $0x1e0] ss:$20 sps:$4 sm:$0xff]  }
 0x1d6   :  { %v9264_v37 = vld [vmem:[%s12437_s5 + $0x194] ss:$20 sps:$4 sm:$0xff]  }
 0x1d8   :  { %8494 = vmatpush3.bf16.msra.mxu1 %v9175_v12  ;;  %v9240_v12 = vld [vmem:[%s12437_s5 + $0x54] ss:$20 sps:$4 sm:$0xff]  }
 0x1d9   :  { %8622 = vmatprep.subr.bf16.mxu1 %v9414_v23 }
 0x1db   :  { %3451 = vmatmul.mubr.bf16.vlgmr.msra.gmra.mxu1 %v10657_v57  ;;  %v9190_v57 = vld [vmem:[%s12435_s3 + $0x368] ss:$12 sps:$4 sm:$0xff]  }
 0x1dc   :  { %8623 = vmatpush3.bf16.msra.mxu1 %v3293_v14  ;;  %8638 = vmatprep.mubr.msk.bf16.mxu1 %vm9415_vm2, %v9414_v23  ;;  %v9243_v14 = vld [vmem:[%s12437_s5 + $0x2c] ss:$20 sps:$4 sm:$0xff]  }
 0x1dd   :  { %8624 = vmatprep.subr.bf16.mxu1 %v9414_v23 }
 0x1e0   :  { %8625 = vmatpush3.bf16.msra.mxu1 %v9182_v15 }
 0x1e1   :  { %8626 = vmatprep.subr.bf16.mxu1 %v9414_v23 }
 0x1e4   :  { %8627 = vmatpush3.bf16.msra.mxu1 %v9186_v16  ;;  %v9241_v16 = vld [vmem:[%s12437_s5 + $0x28] ss:$20 sps:$4 sm:$0xff]  }
 0x1e5   :  { %8628 = vmatprep.subr.bf16.mxu1 %v9414_v23 }
 0x1e8   :  { %8629 = vmatpush3.bf16.msra.mxu1 %v9190_v57  ;;  %v9246_v57 = vld [vmem:[%s12437_s5 + $0x4] ss:$20 sps:$4 sm:$0xff]  }
 0x1e9   :  { %8630 = vmatprep.subr.bf16.mxu1 %v9414_v23 }
 0x1ec   :  { %8631 = vmatpush3.bf16.msra.mxu1 %v9194_v17  ;;  %v9244_v17 = vld [vmem:[%s12437_s5] ss:$20 sps:$4 sm:$0xff]  }
 0x1ed   :  { %8632 = vmatprep.subr.bf16.mxu1 %v9414_v23 }
 0x1ee   :  { %v8473_v20 = vpop.f32.mrf.mxu0 }
 0x1f0   :  { %8633 = vmatpush3.bf16.msra.mxu1 %v9198_v19  ;;  %v8474_v28 = vpop.f32.mrf.mxu0  ;;  %v9249_v19 = vld [vmem:[%s12437_s5 + $0x25c] ss:$20 sps:$4 sm:$0xff]  }
 0x1f1   :  { %8634 = vmatprep.subr.bf16.mxu1 %v9414_v23  ;;  %v8475_v52 = vadd.f32 %v8474_v28, %v8473_v20  ;;  %v9247_v20 = vld [vmem:[%s12437_s5 + $0x258] ss:$20 sps:$4 sm:$0xff]   ;;  %v9253_v28 = vld [vmem:[%s12437_s5 + $0x208] ss:$20 sps:$4 sm:$0xff]  }
 0x1f2   :  { %v8476_v29 = vpop.f32.mrf.mxu0 }
 0x1f3   :  { %v2419_v35 = vadd.f32 %v8475_v52, %v2379_v33  ;;  %v9258_v29 = vld [vmem:[%s12437_s5 + $0x1e4] ss:$20 sps:$4 sm:$0xff]   ;;  %v9267_v33 = vld [vmem:[%s12437_s5 + $0x16c] ss:$20 sps:$4 sm:$0xff]  }
 0x1f4   :  { %8635 = vmatpush3.bf16.msra.mxu1 %v9202_v27  ;;  %v8477_v49 = vpop.f32.mrf.mxu0  ;;  %v9255_v27 = vld [vmem:[%s12437_s5 + $0x20c] ss:$20 sps:$4 sm:$0xff]   ;;  %v9262_v52 = vld [vmem:[%s12437_s5 + $0x190] ss:$20 sps:$4 sm:$0xff]  }
 0x1f5   :  { %8636 = vmatprep.subr.bf16.mxu1 %v9414_v23  ;;  %v9259_v49 = vld [vmem:[%s12437_s5 + $0x1b8] ss:$20 sps:$4 sm:$0xff]  }
 0x1f8   :  { %8637 = vmatpush3.bf16.msra.mxu1 %v9206_v32  ;;  %v9261_v32 = vld [vmem:[%s12437_s5 + $0x1bc] ss:$20 sps:$4 sm:$0xff]  }
 0x1fb   :  { %v2458_v21 = vpop.f32.mrf.mxu1 }
 0x1fc   :  { %v2459_v36 = vadd.f32 %v2458_v21, %v2419_v35  ;;  %v9265_v35 = vld [vmem:[%s12437_s5 + $0x168] ss:$20 sps:$4 sm:$0xff]   ;;  %v9270_v21 = vld [vmem:[%s12437_s5 + $0x144] ss:$20 sps:$4 sm:$0xff]  }
 0x1fd   :  { %v2460_v38 = vpop.f32.mrf.mxu1 }
 0x1fe   :  { %v2468_v39 = vmax.f32 %v2459_v36, 0.0  ;;  %v9268_v36 = vld [vmem:[%s12437_s5 + $0x140] ss:$20 sps:$4 sm:$0xff]   ;;  %v9271_v38 = vld [vmem:[%s12437_s5 + $0x268] ss:$20 sps:$4 sm:$0xff]  }
 0x1ff   :  { %v2461_v42 = vpop.f32.mrf.mxu1 }
 0x200   :  { %v2473_v44 = vpack.c.bf16 %v2468_v39, %v2468_v39  ;;  %v9285_v39 = vld [vmem:[%s12437_s5 + $0x284] ss:$20 sps:$4 sm:$0x7f]   ;;  %v9287_v42 = vld [vmem:[%s12437_s5 + $0x280] ss:$20 sps:$4 sm:$0x7f]  }
 0x201   :  { %v2462_v46 = vpop.f32.mrf.mxu1  ;;  %8018 = vmatprep.subr.msk.bf16.mxu1 %vm4114_vm4, %v9285_v39 }
 0x202   :  { %7931 = vmatmul.mubr.msk.bf16.vlgmr.msra.gmra.mxu0 %vm3281_vm3, %v2473_v44  ;;  %8639 = vmatmul.mubr.msk.bf16.vlgmr.msra.gmra.mxu1 %vm3281_vm3, %v2473_v44  ;;  %v9292_v44 = vld [vmem:[%s12437_s5 + $0x124] ss:$20 sps:$4 sm:$0xff]  }
 0x203   :  { %8502 = vmatpush3.bf16.msra.mxu0 %v9208_v58  ;;  %3490 = vmatprep.mubr.bf16.mxu0 %v10733_v31  ;;  %v9213_v31 = vld [vmem:[%s12435_s3 + $0x2a8] ss:$12 sps:$4 sm:$0xff]   ;;  %v4116_v58 = vsel %vm4114_vm4, %v9287_v42, 0 }
 0x204   :  { %8503 = vmatprep.subr.bf16.mxu0 %v9209_v45  ;;  %4203 = vmatprep.mubr.bf16.mxu1 %v9413_v5  ;;  %v10993_v45 = vld [vmem:[%s12438_s4] sm:$0x7] }
 0x205   :  { %4186 = vmatpush1.bf16.msra.mxu1 %v4116_v58  ;;  %v2637_v46 = vrot.slane %v10993_v45, %v10318_v41 }
 0x206   :  { %4212 = vmatprep.subr.bf16.mxu1 %v9292_v44  ;;  %v9290_v44 = vld [vmem:[%s12437_s5 + $0x120] ss:$20 sps:$4 sm:$0xff]  }
 0x207   :  { %8504 = vmatpush3.bf16.msra.mxu0 %v9210_v47  ;;  %v2641_v47 = vrot.slane %v10993_v45, %v10483_v43 }
 0x208   :  { %8505 = vmatprep.subr.bf16.mxu0 %v9211_v48 }
 0x20b   :  { %8506 = vmatpush3.bf16.msra.mxu0 %v9212_v50 }
 0x20c   :  { %8507 = vmatprep.subr.bf16.mxu0 %v9213_v31 }
 0x20f   :  { %8508 = vmatpush3.bf16.msra.mxu0 %v9214_v53 }
 0x210   :  { %8509 = vmatprep.subr.bf16.mxu0 %v9215_v62 }
 0x213   :  { %8510 = vmatpush3.bf16.msra.mxu0 %v9216_v54 }
 0x214   :  { %8511 = vmatprep.subr.bf16.mxu0 %v9217_v59 }
 0x217   :  { %8512 = vmatpush3.bf16.msra.mxu0 %v9218_v60 }
 0x218   :  { %8513 = vmatprep.subr.bf16.mxu0 %v9219_v40 }
 0x21b   :  { %8514 = vmatpush3.bf16.msra.mxu0 %v9220_v55 }
 0x21c   :  { %8515 = vmatprep.subr.bf16.mxu0 %v9221_v61 }
 0x21f   :  { %8516 = vmatpush3.bf16.msra.mxu0 %v9222_v63 }
 0x220   :  { %4130 = vmatprep.subr.bf16.mxu0 %v9225_v0 }
 0x222   :  { %3491 = vmatmul.mubr.bf16.vlgmr.msra.gmra.mxu0 %v10738_v51  ;;  %v9232_v51 = vld [vmem:[%s12437_s5 + $0xa0] ss:$20 sps:$4 sm:$0xff]  }
 0x223   :  { %4131 = vmatpush1.bf16.msra.mxu0 %v9223_v1 }
 0x224   :  { %4132 = vmatprep.subr.bf16.mxu0 %v9228_v2 }
 0x227   :  { %4133 = vmatpush1.bf16.msra.mxu0 %v9226_v3 }
 0x228   :  { %4134 = vmatprep.subr.bf16.mxu0 %v9231_v56 }
 0x22b   :  { %4135 = vmatpush1.bf16.msra.mxu0 %v9229_v4 }
 0x22c   :  { %4136 = vmatprep.subr.bf16.mxu0 %v9234_v6 }
 0x22e   :  { %v10903_v10 = vpop.f32.mrf.mxu0 }
 0x22f   :  { %4137 = vmatpush1.bf16.msra.mxu0 %v9232_v51  ;;  %v3330_v48 = vadd.f32 %v10903_v10, %v2637_v46  ;;  %v9295_v46 = vld [vmem:[%s12437_s5 + $0xfc] ss:$20 sps:$4 sm:$0xff]  }
 0x230   :  { %4138 = vmatprep.subr.bf16.mxu0 %v9237_v7  ;;  %v10911_v13 = vpop.f32.mrf.mxu0 }
 0x231   :  { %v3332_v31 = vadd.f32 %v10911_v13, %v2641_v47  ;;  %v9293_v47 = vld [vmem:[%s12437_s5 + $0xf8] ss:$20 sps:$4 sm:$0xff]  }
 0x232   :  { %v3333_v8 = vpop.f32.mrf.mxu0 }
 0x233   :  { %4139 = vmatpush1.bf16.msra.mxu0 %v9235_v11 }
 0x234   :  { %4140 = vmatprep.subr.bf16.mxu0 %v9240_v12  ;;  %v3334_v15 = vpop.f32.mrf.mxu0 }
 0x235   :  { %v9273_v15 = vld [vmem:[%s12437_s5 + $0x240] ss:$20 sps:$4 sm:$0xff]  }
 0x237   :  { %4141 = vmatpush1.bf16.msra.mxu0 %v9238_v9  ;;  %v9272_v9 = vld [vmem:[%s12437_s5 + $0x128] ss:$20 sps:$4 sm:$0xff]  }
 0x238   :  { %4142 = vmatprep.subr.bf16.mxu0 %v9243_v14 }
 0x23b   :  { %4143 = vmatpush1.bf16.msra.mxu0 %v9241_v16  ;;  %v9274_v16 = vld [vmem:[%s12437_s5 + $0x100] ss:$20 sps:$4 sm:$0xff]  }
 0x23c   :  { %4144 = vmatprep.subr.bf16.mxu0 %v9246_v57  ;;  %v9275_v57 = vld [vmem:[%s12437_s5 + $0x218] ss:$20 sps:$4 sm:$0xff]  }
 0x23f   :  { %4145 = vmatpush1.bf16.msra.mxu0 %v9244_v17  ;;  %v9276_v17 = vld [vmem:[%s12437_s5 + $0xd8] ss:$20 sps:$4 sm:$0xff]  }
 0x240   :  { %4146 = vmatprep.subr.bf16.mxu0 %v9249_v19  ;;  %v9277_v19 = vld [vmem:[%s12437_s5 + $0x1f0] ss:$20 sps:$4 sm:$0xff]  }
 0x243   :  { %4147 = vmatpush2.bf16.msra.mxu0 %v9247_v20  ;;  %v9278_v20 = vld [vmem:[%s12437_s5 + $0xb0] ss:$20 sps:$4 sm:$0xff]  }
 0x244   :  { %4148 = vmatprep.subr.bf16.mxu0 %v9252_v22  ;;  %v9279_v22 = vld [vmem:[%s12437_s5 + $0x1c8] ss:$20 sps:$4 sm:$0xff]  }
 0x247   :  { %4149 = vmatpush2.bf16.msra.mxu0 %v9250_v24  ;;  %v9280_v24 = vld [vmem:[%s12437_s5 + $0x88] ss:$20 sps:$4 sm:$0xff]  }
 0x248   :  { %4150 = vmatprep.subr.bf16.mxu0 %v9255_v27  ;;  %v9281_v27 = vld [vmem:[%s12437_s5 + $0x1a0] ss:$20 sps:$4 sm:$0xff]  }
 0x24b   :  { %4151 = vmatpush2.bf16.msra.mxu0 %v9253_v28  ;;  %v9282_v28 = vld [vmem:[%s12437_s5 + $0x60] ss:$20 sps:$4 sm:$0xff]  }
 0x24c   :  { %4152 = vmatprep.subr.bf16.mxu0 %v9258_v29  ;;  %v9283_v29 = vld [vmem:[%s12437_s5 + $0x178] ss:$20 sps:$4 sm:$0xff]  }
 0x24f   :  { %4153 = vmatpush2.bf16.msra.mxu0 %v9256_v30  ;;  %v2645_v30 = vrot.slane %v10993_v45, %v10724_v25 }
 0x250   :  { %4154 = vmatprep.subr.bf16.mxu0 %v9261_v32  ;;  %v9284_v32 = vld [vmem:[%s12437_s5 + $0x38] ss:$20 sps:$4 sm:$0xff]  }
 0x253   :  { %4155 = vmatpush2.bf16.msra.mxu0 %v9259_v49 }
 0x254   :  { %4156 = vmatprep.subr.bf16.mxu0 %v9264_v37  ;;  %v9288_v37 = vld [vmem:[%s12437_s5 + $0x150] ss:$20 sps:$4 sm:$0xff]  }
 0x257   :  { %4157 = vmatpush2.bf16.msra.mxu0 %v9262_v52 }
 0x258   :  { %4158 = vmatprep.subr.bf16.mxu0 %v9267_v33 }
 0x25b   :  { %4159 = vmatpush2.bf16.msra.mxu0 %v9265_v35 }
 0x25c   :  { %4160 = vmatprep.subr.bf16.mxu0 %v9270_v21  ;;  %v9289_v21 = vld [vmem:[%s12437_s5 + $0x10] ss:$20 sps:$4 sm:$0xff]  }
 0x25f   :  { %4161 = vmatpush2.bf16.msra.mxu0 %v9268_v36 }
 0x260   :  { %8532 = vmatprep.subr.bf16.mxu0 %v9271_v38 }
 0x27b   :  { %v3370_v50 = vpop.f32.mrf.mxu1 }
 0x27c   :  { %v3371_v53 = vadd.f32 %v3370_v50, %v3330_v48  ;;  %v9298_v48 = vld [vmem:[%s12437_s5 + $0xd4] ss:$20 sps:$4 sm:$0xff]   ;;  %v9296_v50 = vld [vmem:[%s12437_s5 + $0xd0] ss:$20 sps:$4 sm:$0xff]  }
 0x27d   :  { %v3372_v62 = vpop.f32.mrf.mxu1 }
 0x27e   :  { %v3373_v54 = vadd.f32 %v3372_v62, %v3332_v31  ;;  %v9301_v31 = vld [vmem:[%s12437_s5 + $0xac] ss:$20 sps:$4 sm:$0xff]   ;;  %v9304_v62 = vld [vmem:[%s12437_s5 + $0x84] ss:$20 sps:$4 sm:$0xff]  }
 0x27f   :  { %v3374_v59 = vpop.f32.mrf.mxu1 }
 0x280   :  { %v9307_v59 = vld [vmem:[%s12437_s5 + $0x5c] ss:$20 sps:$4 sm:$0xff]  }
 0x281   :  { %v3375_v60 = vpop.f32.mrf.mxu1 }
 0x282   :  { %v9305_v60 = vld [vmem:[%s12437_s5 + $0x58] ss:$20 sps:$4 sm:$0xff]  }
 0x29b   :  { %v8495_v40 = vpop.f32.mrf.mxu1 }
 0x29d   :  { %v8496_v55 = vpop.f32.mrf.mxu1 }
 0x29e   :  { %v8497_v61 = vadd.f32 %v8496_v55, %v8495_v40  ;;  %v9310_v40 = vld [vmem:[%s12437_s5 + $0x34] ss:$20 sps:$4 sm:$0xff]   ;;  %v9308_v55 = vld [vmem:[%s12437_s5 + $0x30] ss:$20 sps:$4 sm:$0xff]  }
 0x29f   :  { %v8498_v63 = vpop.f32.mrf.mxu1 }
 0x2a0   :  { %v3453_v33 = vadd.f32 %v8497_v61, %v2645_v30  ;;  %v9313_v61 = vld [vmem:[%s12437_s5 + $0xc] ss:$20 sps:$4 sm:$0xff]   ;;  %v9311_v63 = vld [vmem:[%s12437_s5 + $0x8] ss:$20 sps:$4 sm:$0xff]  }
 0x2a1   :  { %v8499_v0 = vpop.f32.mrf.mxu1  ;;  %v4432_v30 = vld [vmem:[%s12439_s7 + $0x180] sm:$0xff] }
 0x2a2   :  { %v9316_v0 = vld [vmem:[%s12437_s5 + $0x264] ss:$20 sps:$4 sm:$0xff]  }
 0x2c2   :  { %v3411_v1 = vpop.f32.mrf.mxu0  ;;  %v3532_v2 = vpop.f32.mrf.mxu1 }
 0x2c3   :  { %v3412_v3 = vadd.f32 %v3411_v1, %v3371_v53  ;;  %v9299_v53 = vld [vmem:[%s12437_s5 + $0xa8] ss:$20 sps:$4 sm:$0xff]   ;;  %v9314_v1 = vld [vmem:[%s12437_s5 + $0x260] ss:$20 sps:$4 sm:$0xff]  }
 0x2c4   :  { %v3413_v56 = vpop.f32.mrf.mxu0  ;;  %v8640_v4 = vpop.f32.mrf.mxu1 }
 0x2c5   :  { %v3414_v6 = vadd.f32 %v3413_v56, %v3373_v54  ;;  %v3538_v51 = vmax.f32 %v3412_v3, 0.0  ;;  %v9302_v54 = vld [vmem:[%s12437_s5 + $0x80] ss:$20 sps:$4 sm:$0xff]   ;;  %v9317_v3 = vld [vmem:[%s12437_s5 + $0x238] ss:$20 sps:$4 sm:$0xff]  }
 0x2c6   :  { %v3415_v7 = vpop.f32.mrf.mxu0  ;;  %v3535_v10 = vpop.f32.mrf.mxu1  ;;  %v9322_v56 = vld [vmem:[%s12437_s5 + $0x214] ss:$20 sps:$4 sm:$0xff]   ;;  %v9320_v4 = vld [vmem:[%s12437_s5 + $0x210] ss:$20 sps:$4 sm:$0xff]  }
 0x2c7   :  { %v3539_v11 = vmax.f32 %v3414_v6, 0.0  ;;  %v11004_v14 = vpack.c.bf16 %v3538_v51, %v3538_v51  ;;  %v9325_v6 = vld [vmem:[%s12437_s5 + $0x1ec] ss:$20 sps:$4 sm:$0xff]   ;;  %v9323_v51 = vld [vmem:[%s12437_s5 + $0x1e8] ss:$20 sps:$4 sm:$0xff]  }
 0x2c8   :  { %v3416_v12 = vpop.f32.mrf.mxu0  ;;  %v8641_v13 = vpop.f32.mrf.mxu1  ;;  %v9328_v7 = vld [vmem:[%s12437_s5 + $0x1c4] ss:$20 sps:$4 sm:$0xff]   ;;  %v9326_v10 = vld [vmem:[%s12437_s5 + $0x1c0] ss:$20 sps:$4 sm:$0xff]  }
 0x2c9   :  { %v3542_v8 = vpack.c.bf16 %v3539_v11, %v3539_v11  ;;  %v9331_v11 = vld [vmem:[%s12437_s5 + $0x19c] ss:$20 sps:$4 sm:$0xff]   ;;  %v9329_v12 = vld [vmem:[%s12437_s5 + $0x198] ss:$20 sps:$4 sm:$0xff]   ;;  %v9334_v13 = vld [vmem:[%s12437_s5 + $0x174] ss:$20 sps:$4 sm:$0xff]  }
 0x2cb   :  { %4162 = vmatprep.mubr.bf16.mxu0 %v3542_v8 }
 0x2cc   :  { %4163 = vmatmul.mubr.bf16.vlgmr.msra.gmra.mxu0 %v11004_v14 }
 0x2cd   :  { %8533 = vmatpush3.bf16.msra.mxu0 %v9272_v9  ;;  %4326 = vmatprep.mubr.bf16.mxu0 %v3542_v8  ;;  %v9337_v9 = vld [vmem:[%s12437_s5 + $0x14c] ss:$20 sps:$4 sm:$0xff]  }
 0x2ce   :  { %8534 = vmatprep.subr.bf16.mxu0 %v9273_v15  ;;  %v9335_v15 = vld [vmem:[%s12437_s5 + $0x148] ss:$20 sps:$4 sm:$0xff]  }
 0x2d1   :  { %8535 = vmatpush3.bf16.msra.mxu0 %v9274_v16  ;;  %v9338_v16 = vld [vmem:[%s12437_s5 + $0x28c] ss:$20 sps:$4 sm:$0x7f]  }
 0x2d2   :  { %8536 = vmatprep.subr.bf16.mxu0 %v9275_v57  ;;  %v9340_v57 = vld [vmem:[%s12437_s5 + $0x288] ss:$20 sps:$4 sm:$0x7f]  }
 0x2d5   :  { %8537 = vmatpush3.bf16.msra.mxu0 %v9276_v17  ;;  %v4122_v17 = vsel %vm4114_vm4, %v9340_v57, 0  ;;  %v4516_v57 = vld [vmem:[%s12439_s7 + $0x420] sm:$0xff] }
 0x2d6   :  { %8538 = vmatprep.subr.bf16.mxu0 %v9277_v19  ;;  %v9341_v19 = vld [vmem:[%s12437_s5 + $0x290] ss:$20 sps:$4 sm:$0x7f]  }
 0x2d9   :  { %8539 = vmatpush3.bf16.msra.mxu0 %v9278_v20  ;;  %v4440_v20 = vld [vmem:[%s12439_s7 + $0x1c0] sm:$0xff] }
 0x2da   :  { %8540 = vmatprep.subr.bf16.mxu0 %v9279_v22  ;;  %v4444_v22 = vld [vmem:[%s12439_s7 + $0x1e0] sm:$0xff] }
 0x2dd   :  { %8541 = vmatpush3.bf16.msra.mxu0 %v9280_v24  ;;  %v4128_v24 = vsel %vm4114_vm4, %v9341_v19, 0 }
 0x2de   :  { %8542 = vmatprep.subr.bf16.mxu0 %v9281_v27  ;;  %v4568_v27 = vld [vmem:[%s12439_s7 + $0x5c0] sm:$0xff] }
 0x2e1   :  { %8543 = vmatpush3.bf16.msra.mxu0 %v9282_v28  ;;  %v4572_v28 = vld [vmem:[%s12439_s7 + $0x5e0] sm:$0xff] }
 0x2e2   :  { %v8517_v49 = vpop.f32.mrf.mxu0  ;;  %8544 = vmatprep.subr.bf16.mxu0 %v9283_v29  ;;  %v4560_v29 = vld [vmem:[%s12439_s7 + $0x580] sm:$0xff] }
 0x2e4   :  { %v8518_v52 = vpop.f32.mrf.mxu0 }
 0x2e5   :  { %v8519_v35 = vadd.f32 %v8518_v52, %v8517_v49  ;;  %8545 = vmatpush3.bf16.msra.mxu0 %v9284_v32  ;;  %v8207_v32 = vcombine.low %v4568_v27, %v4572_v28  ;;  %v8208_v49 = vcombine.high %v4568_v27, %v4572_v28  ;;  %v4632_v27 = vld [vmem:[%s12439_s7 + $0x7c0] sm:$0xff] }
 0x2e6   :  { %v8520_v36 = vpop.f32.mrf.mxu0  ;;  %8546 = vmatprep.subr.bf16.mxu0 %v9288_v37  ;;  %v4564_v37 = vld [vmem:[%s12439_s7 + $0x5a0] sm:$0xff] }
 0x2e7   :  { %v3493_v38 = vadd.f32 %v8519_v35, %v3453_v33  ;;  %v8200_v52 = vcombine.high %v4560_v29, %v4564_v37  ;;  %v4552_v33 = vld [vmem:[%s12439_s7 + $0x540] sm:$0xff] }
 0x2e8   :  { %v8521_v39 = vpop.f32.mrf.mxu0  ;;  %v4556_v35 = vld [vmem:[%s12439_s7 + $0x560] sm:$0xff] }
 0x2e9   :  { %v3533_v42 = vadd.f32 %v3532_v2, %v3493_v38  ;;  %8547 = vmatpush3.bf16.msra.mxu0 %v9289_v21  ;;  %v9319_v2 = vld [vmem:[%s12437_s5 + $0x23c] ss:$20 sps:$4 sm:$0xff]   ;;  %v8079_v21 = vcombine.low %v4440_v20, %v4444_v22  ;;  %v8199_v38 = vcombine.low %v4560_v29, %v4564_v37  ;;  %v4424_v39 = vld [vmem:[%s12439_s7 + $0x140] sm:$0xff] }
 0x2ea   :  { %6390 = vmatprep.subr.bf16.mxu0 %v8208_v49  ;;  %v4636_v28 = vld [vmem:[%s12439_s7 + $0x7e0] sm:$0xff] }
 0x2eb   :  { %v3540_v58 = vmax.f32 %v3533_v42, 0.0  ;;  %v4428_v42 = vld [vmem:[%s12439_s7 + $0x160] sm:$0xff]  ;;  %v8272_v37 = vcombine.high %v4632_v27, %v4636_v28 }
 0x2ec   :  { %4327 = vmatmul.mubr.bf16.vlgmr.msra.gmra.mxu0 %v11004_v14  ;;  %v4508_v49 = vld [vmem:[%s12439_s7 + $0x3e0] sm:$0xff] }
 0x2ed   :  { %v11055_v45 = vpack.c.bf16 %v3540_v58, %v3540_v58  ;;  %6391 = vmatpush1.bf16.msra.mxu0 %v8207_v32  ;;  %v8192_v58 = vcombine.high %v4552_v33, %v4556_v35  ;;  %v4504_v32 = vld [vmem:[%s12439_s7 + $0x3c0] sm:$0xff] }
 0x2ee   :  { %6392 = vmatprep.subr.bf16.mxu0 %v8200_v52  ;;  %v4624_v52 = vld [vmem:[%s12439_s7 + $0x780] sm:$0xff] }
 0x2ef   :  { %8019 = vmatmul.mubr.msk.bf16.vlgmr.msra.gmra.mxu1 %vm4110_vm5, %v11055_v45 }
 0x2f0   :  { %4213 = vmatpush1.bf16.msra.mxu1 %v9290_v44  ;;  %4244 = vmatprep.mubr.bf16.mxu1 %v3542_v8  ;;  %v9332_v8 = vld [vmem:[%s12437_s5 + $0x170] ss:$20 sps:$4 sm:$0xff]  }
 0x2f1   :  { %4214 = vmatprep.subr.bf16.mxu1 %v9295_v46  ;;  %v4544_v44 = vld [vmem:[%s12439_s7 + $0x500] sm:$0xff]  ;;  %6393 = vmatpush1.bf16.msra.mxu0 %v8199_v38 }
 0x2f2   :  { %v4548_v46 = vld [vmem:[%s12439_s7 + $0x520] sm:$0xff]  ;;  %6394 = vmatprep.subr.bf16.mxu0 %v8192_v58 }
 0x2f3   :  { %v4496_v38 = vld [vmem:[%s12439_s7 + $0x380] sm:$0xff] }
 0x2f4   :  { %4215 = vmatpush1.bf16.msra.mxu1 %v9293_v47  ;;  %v4616_v58 = vld [vmem:[%s12439_s7 + $0x740] sm:$0xff] }
 0x2f5   :  { %4216 = vmatprep.subr.bf16.mxu1 %v9298_v48  ;;  %v8064_v48 = vcombine.high %v4424_v39, %v4428_v42 }
 0x2f8   :  { %4217 = vmatpush1.bf16.msra.mxu1 %v9296_v50  ;;  %v8191_v50 = vcombine.low %v4552_v33, %v4556_v35  ;;  %v4628_v33 = vld [vmem:[%s12439_s7 + $0x7a0] sm:$0xff] }
 0x2f9   :  { %4218 = vmatprep.subr.bf16.mxu1 %v9301_v31  ;;  %v4416_v31 = vld [vmem:[%s12439_s7 + $0x100] sm:$0xff] }
 0x2fa   :  { %6395 = vmatpush1.bf16.msra.mxu0 %v8191_v50  ;;  %v4488_v50 = vld [vmem:[%s12439_s7 + $0x340] sm:$0xff] }
 0x2fc   :  { %4219 = vmatpush1.bf16.msra.mxu1 %v9299_v53  ;;  %v8184_v53 = vcombine.high %v4544_v44, %v4548_v46 }
 0x2fd   :  { %4220 = vmatprep.subr.bf16.mxu1 %v9304_v62  ;;  %v4536_v62 = vld [vmem:[%s12439_s7 + $0x4c0] sm:$0xff] }
 0x2fe   :  { %6396 = vmatprep.subr.bf16.mxu0 %v8184_v53  ;;  %v4608_v53 = vld [vmem:[%s12439_s7 + $0x700] sm:$0xff] }
 0x300   :  { %4221 = vmatpush1.bf16.msra.mxu1 %v9302_v54  ;;  %v4540_v54 = vld [vmem:[%s12439_s7 + $0x4e0] sm:$0xff] }
 0x301   :  { %4222 = vmatprep.subr.bf16.mxu1 %v9307_v59  ;;  %v8063_v59 = vcombine.low %v4424_v39, %v4428_v42  ;;  %v4500_v39 = vld [vmem:[%s12439_s7 + $0x3a0] sm:$0xff]  ;;  %v8264_v42 = vcombine.high %v4624_v52, %v4628_v33 }
 0x304   :  { %4223 = vmatpush1.bf16.msra.mxu1 %v9305_v60 }
 0x305   :  { %4224 = vmatprep.subr.bf16.mxu1 %v9310_v40  ;;  %v8183_v40 = vcombine.low %v4544_v44, %v4548_v46  ;;  %v4620_v44 = vld [vmem:[%s12439_s7 + $0x760] sm:$0xff]  ;;  %v8143_v46 = vcombine.low %v4504_v32, %v4508_v49 }
 0x307   :  { %6397 = vmatpush1.bf16.msra.mxu0 %v8183_v40  ;;  %v4480_v40 = vld [vmem:[%s12439_s7 + $0x300] sm:$0xff] }
 0x308   :  { %4225 = vmatpush1.bf16.msra.mxu1 %v9308_v55  ;;  %v4408_v55 = vld [vmem:[%s12439_s7 + $0xc0] sm:$0xff] }
 0x309   :  { %4226 = vmatprep.subr.bf16.mxu1 %v9313_v61  ;;  %v4412_v61 = vld [vmem:[%s12439_s7 + $0xe0] sm:$0xff] }
 0x30c   :  { %4227 = vmatpush1.bf16.msra.mxu1 %v9311_v63  ;;  %v8176_v63 = vcombine.high %v4536_v62, %v4540_v54 }
 0x30d   :  { %4228 = vmatprep.subr.bf16.mxu1 %v9316_v0  ;;  %v4528_v0 = vld [vmem:[%s12439_s7 + $0x480] sm:$0xff] }
 0x30e   :  { %6398 = vmatprep.subr.bf16.mxu0 %v8176_v63 }
 0x310   :  { %4229 = vmatpush2.bf16.msra.mxu1 %v9314_v1  ;;  %v4532_v1 = vld [vmem:[%s12439_s7 + $0x4a0] sm:$0xff] }
 0x311   :  { %4230 = vmatprep.subr.bf16.mxu1 %v9319_v2 }
 0x314   :  { %4231 = vmatpush2.bf16.msra.mxu1 %v9317_v3  ;;  %v8048_v3 = vcombine.high %v4408_v55, %v4412_v61 }
 0x315   :  { %4232 = vmatprep.subr.bf16.mxu1 %v9322_v56  ;;  %v8175_v56 = vcombine.low %v4536_v62, %v4540_v54  ;;  %v4612_v62 = vld [vmem:[%s12439_s7 + $0x720] sm:$0xff]  ;;  %v8135_v54 = vcombine.low %v4496_v38, %v4500_v39 }
 0x317   :  { %6399 = vmatpush1.bf16.msra.mxu0 %v8175_v56 }
 0x318   :  { %4233 = vmatpush2.bf16.msra.mxu1 %v9320_v4  ;;  %v4400_v4 = vld [vmem:[%s12439_s7 + $0x80] sm:$0xff] }
 0x319   :  { %4234 = vmatprep.subr.bf16.mxu1 %v9325_v6  ;;  %v4404_v6 = vld [vmem:[%s12439_s7 + $0xa0] sm:$0xff] }
 0x31c   :  { %4235 = vmatpush2.bf16.msra.mxu1 %v9323_v51  ;;  %v8168_v51 = vcombine.high %v4528_v0, %v4532_v1 }
 0x31d   :  { %4236 = vmatprep.subr.bf16.mxu1 %v9328_v7  ;;  %v4520_v7 = vld [vmem:[%s12439_s7 + $0x440] sm:$0xff] }
 0x31e   :  { %6400 = vmatprep.subr.bf16.mxu0 %v8168_v51  ;;  %v4468_v51 = vld [vmem:[%s12439_s7 + $0x2a0] sm:$0xff] }
 0x320   :  { %4237 = vmatpush2.bf16.msra.mxu1 %v9326_v10  ;;  %v4524_v10 = vld [vmem:[%s12439_s7 + $0x460] sm:$0xff] }
 0x321   :  { %4238 = vmatprep.subr.bf16.mxu1 %v9331_v11  ;;  %v8047_v11 = vcombine.low %v4408_v55, %v4412_v61  ;;  %v4484_v55 = vld [vmem:[%s12439_s7 + $0x320] sm:$0xff]  ;;  %v8248_v61 = vcombine.high %v4608_v53, %v4612_v62 }
 0x322   :  { %v8119_v56 = vcombine.low %v4480_v40, %v4484_v55 }
 0x324   :  { %4239 = vmatpush2.bf16.msra.mxu1 %v9329_v12  ;;  %v8040_v12 = vcombine.high %v4400_v4, %v4404_v6 }
 0x325   :  { %4240 = vmatprep.subr.bf16.mxu1 %v9334_v13  ;;  %v8167_v13 = vcombine.low %v4528_v0, %v4532_v1  ;;  %v8120_v0 = vcombine.high %v4480_v40, %v4484_v55  ;;  %v8247_v1 = vcombine.low %v4608_v53, %v4612_v62 }
 0x327   :  { %6401 = vmatpush1.bf16.msra.mxu0 %v8167_v13  ;;  %v4456_v13 = vld [vmem:[%s12439_s7 + $0x240] sm:$0xff] }
 0x328   :  { %4241 = vmatpush2.bf16.msra.mxu1 %v9332_v8  ;;  %v4392_v8 = vld [vmem:[%s12439_s7 + $0x40] sm:$0xff] }
 0x329   :  { %4242 = vmatprep.subr.bf16.mxu1 %v9337_v9  ;;  %v4396_v9 = vld [vmem:[%s12439_s7 + $0x60] sm:$0xff] }
 0x32a   :  { %v8032_v19 = vcombine.high %v4392_v8, %v4396_v9  ;;  %v8031_v29 = vcombine.low %v4392_v8, %v4396_v9  ;;  %v4460_v8 = vld [vmem:[%s12439_s7 + $0x260] sm:$0xff] }
 0x32c   :  { %4243 = vmatpush2.bf16.msra.mxu1 %v9335_v15  ;;  %v8160_v15 = vcombine.high %v4520_v7, %v4524_v10 }
 0x32d   :  { %8020 = vmatprep.subr.msk.bf16.mxu1 %vm4114_vm4, %v9338_v16  ;;  %v4512_v16 = vld [vmem:[%s12439_s7 + $0x400] sm:$0xff] }
 0x32e   :  { %6402 = vmatprep.subr.bf16.mxu0 %v8160_v15 }
 0x32f   :  { %4245 = vmatmul.mubr.bf16.vlgmr.msra.gmra.mxu1 %v11004_v14  ;;  %v8080_v14 = vcombine.high %v4440_v20, %v4444_v22  ;;  %v8159_v20 = vcombine.low %v4520_v7, %v4524_v10  ;;  %v4384_v22 = vld [vmem:[%s12439_s7] sm:$0xff] }
 0x330   :  { %4268 = vmatpush1.bf16.msra.mxu1 %v4122_v17  ;;  %4285 = vmatprep.mubr.bf16.mxu1 %v9413_v5  ;;  %v8039_v17 = vcombine.low %v4400_v4, %v4404_v6  ;;  %v4464_v6 = vld [vmem:[%s12439_s7 + $0x280] sm:$0xff] }
 0x331   :  { %8642 = vmatprep.subr.bf16.mxu1 %v9414_v23  ;;  %6403 = vmatpush1.bf16.msra.mxu0 %v8159_v20  ;;  %v8104_v10 = vcombine.high %v4464_v6, %v4468_v51  ;;  %v4448_v20 = vld [vmem:[%s12439_s7 + $0x200] sm:$0xff] }
 0x337   :  { %8021 = vmatmul.mubr.msk.bf16.vlgmr.msra.gmra.mxu1 %vm4110_vm5, %v11055_v45 }
 0x338   :  { %8643 = vmatpush3.bf16.msra.mxu1 %v4128_v24  ;;  %8644 = vmatprep.mubr.msk.bf16.mxu1 %vm9415_vm2, %v9414_v23  ;;  %v4436_v23 = vld [vmem:[%s12439_s7 + $0x1a0] sm:$0xff] }
 0x339   :  { %6349 = vmatprep.subr.bf16.mxu1 %v8080_v14  ;;  %v8072_v36 = vcombine.high %v4432_v30, %v4436_v23  ;;  %v8071_v47 = vcombine.low %v4432_v30, %v4436_v23  ;;  %v4388_v24 = vld [vmem:[%s12439_s7 + $0x20] sm:$0xff]  ;;  %v8152_v14 = vcombine.high %v4512_v16, %v4516_v57  ;;  %v8151_v23 = vcombine.low %v4512_v16, %v4516_v57 }
 0x33a   :  { %v8024_v30 = vcombine.high %v4384_v22, %v4388_v24  ;;  %v8023_v35 = vcombine.low %v4384_v22, %v4388_v24  ;;  %v8103_v16 = vcombine.low %v4464_v6, %v4468_v51  ;;  %v8096_v57 = vcombine.high %v4456_v13, %v4460_v8  ;;  %v4452_v22 = vld [vmem:[%s12439_s7 + $0x220] sm:$0xff] }
 0x33b   :  { %6404 = vmatprep.subr.bf16.mxu0 %v8152_v14  ;;  %v4688_v6 = vld [vmem:[%s12439_s7 + $0x980] sm:$0xff] }
 0x33c   :  { %6405 = vmatpush1.bf16.msra.mxu0 %v8151_v23  ;;  %v4696_v23 = vld [vmem:[%s12439_s7 + $0x9c0] sm:$0x77] }
 0x33d   :  { %6406 = vmatprep.subr.bf16.mxu0 %v8272_v37  ;;  %v8087_v37 = vcombine.low %v4448_v20, %v4452_v22  ;;  %v4692_v51 = vld [vmem:[%s12439_s7 + $0x9a0] sm:$0xff] }
 0x33f   :  { %8645 = vmatmul.mubr.msk.bf16.vlgmr.msra.gmra.mxu1 %vm4110_vm5, %v11055_v45  ;;  %v4420_v45 = vld [vmem:[%s12439_s7 + $0x120] sm:$0xff] }
 0x340   :  { %6350 = vmatpush1.bf16.msra.mxu1 %v8079_v21  ;;  %v8056_v60 = vcombine.high %v4416_v31, %v4420_v45  ;;  %v8055_v2 = vcombine.low %v4416_v31, %v4420_v45  ;;  %v8144_v21 = vcombine.high %v4504_v32, %v4508_v49  ;;  %v4492_v31 = vld [vmem:[%s12439_s7 + $0x360] sm:$0xff]  ;;  %v8256_v45 = vcombine.high %v4616_v58, %v4620_v44 }
 0x341   :  { %6351 = vmatprep.subr.bf16.mxu1 %v8072_v36  ;;  %v8271_v36 = vcombine.low %v4632_v27, %v4636_v28  ;;  %v8127_v63 = vcombine.low %v4488_v50, %v4492_v31  ;;  %v8095_v27 = vcombine.low %v4456_v13, %v4460_v8  ;;  %v8088_v28 = vcombine.high %v4448_v20, %v4452_v22  ;;  %v4680_v8 = vld [vmem:[%s12439_s7 + $0x940] sm:$0xff] }
 0x342   :  { %v8328_v13 = vcombine.high %v4688_v6, %v4692_v51  ;;  %v4664_v22 = vld [vmem:[%s12439_s7 + $0x8c0] sm:$0xff] }
 0x343   :  { %6407 = vmatpush2.bf16.msra.mxu0 %v8271_v36 }
 0x344   :  { %6352 = vmatpush1.bf16.msra.mxu1 %v8071_v47  ;;  %v8136_v47 = vcombine.high %v4496_v38, %v4500_v39  ;;  %6408 = vmatprep.subr.bf16.mxu0 %v8264_v42  ;;  %v11369_v38 = vld [vmem:[%s12439_s7 + $0x1c8] sm:$0xff] }
 0x345   :  { %6353 = vmatprep.subr.bf16.mxu1 %v8064_v48  ;;  %v8263_v48 = vcombine.low %v4624_v52, %v4628_v33  ;;  %v8336_v52 = vcombine.high %v4696_v23, %v4696_v23  ;;  %v4576_v33 = vld [vmem:[%s12439_s7 + $0x600] sm:$0xff]  ;;  %v11374_v39 = vld [vmem:[%s12439_s7 + $0x1e8] sm:$0xff] }
 0x346   :  { %v8082_v42 = vcombine.high %v11369_v38, %v11374_v39 }
 0x347   :  { %6409 = vmatpush2.bf16.msra.mxu0 %v8263_v48 }
 0x348   :  { %6354 = vmatpush1.bf16.msra.mxu1 %v8063_v59  ;;  %v8128_v59 = vcombine.high %v4488_v50, %v4492_v31  ;;  %6410 = vmatprep.subr.bf16.mxu0 %v8256_v45  ;;  %v11383_v50 = vld [vmem:[%s12440_s6] sm:$0x1f] }
 0x349   :  { %6355 = vmatprep.subr.bf16.mxu1 %v8056_v60  ;;  %v8255_v60 = vcombine.low %v4616_v58, %v4620_v44  ;;  %v8081_v58 = vcombine.low %v11369_v38, %v11374_v39  ;;  %v3651_v31 = vrot.slane %v11383_v50, %v10318_v41  ;;  %v3655_v45 = vrot.slane %v11383_v50, %v10483_v43  ;;  %v4553_v39 = vld [vmem:[%s12439_s7 + $0x548] sm:$0xff] }
 0x34b   :  { %6411 = vmatpush2.bf16.msra.mxu0 %v8255_v60 }
 0x34c   :  { %6356 = vmatpush1.bf16.msra.mxu1 %v8055_v2  ;;  %v4472_v2 = vld [vmem:[%s12439_s7 + $0x2c0] sm:$0xff]  ;;  %6412 = vmatprep.subr.bf16.mxu0 %v8248_v61 }
 0x34d   :  { %6357 = vmatprep.subr.bf16.mxu1 %v8048_v3  ;;  %v4476_v3 = vld [vmem:[%s12439_s7 + $0x2e0] sm:$0xff] }
 0x34e   :  { %v8112_v4 = vcombine.high %v4472_v2, %v4476_v3  ;;  %v8111_v7 = vcombine.low %v4472_v2, %v4476_v3 }
 0x34f   :  { %6413 = vmatpush2.bf16.msra.mxu0 %v8247_v1 }
 0x350   :  { %6358 = vmatpush1.bf16.msra.mxu1 %v8047_v11  ;;  %v4600_v11 = vld [vmem:[%s12439_s7 + $0x6c0] sm:$0xff] }
 0x351   :  { %6359 = vmatprep.subr.bf16.mxu1 %v8040_v12  ;;  %v4604_v12 = vld [vmem:[%s12439_s7 + $0x6e0] sm:$0xff] }
 0x352   :  { %v8240_v9 = vcombine.high %v4600_v11, %v4604_v12  ;;  %v8239_v15 = vcombine.low %v4600_v11, %v4604_v12 }
 0x354   :  { %6360 = vmatpush1.bf16.msra.mxu1 %v8039_v17  ;;  %6414 = vmatprep.subr.bf16.mxu0 %v8240_v9  ;;  %v4592_v17 = vld [vmem:[%s12439_s7 + $0x680] sm:$0xff] }
 0x355   :  { %6361 = vmatprep.subr.bf16.mxu1 %v8032_v19  ;;  %6415 = vmatpush2.bf16.msra.mxu0 %v8239_v15  ;;  %v4596_v19 = vld [vmem:[%s12439_s7 + $0x6a0] sm:$0xff]  ;;  %v8327_v15 = vcombine.low %v4688_v6, %v4692_v51  ;;  %v4437_v6 = vld [vmem:[%s12439_s7 + $0x1a8] sm:$0xff] }
 0x356   :  { %v8232_v24 = vcombine.high %v4592_v17, %v4596_v19  ;;  %v8231_v14 = vcombine.low %v4592_v17, %v4596_v19  ;;  %v4684_v9 = vld [vmem:[%s12439_s7 + $0x960] sm:$0xff] }
 0x357   :  { %v4676_v17 = vld [vmem:[%s12439_s7 + $0x920] sm:$0xff]  ;;  %v8319_v19 = vcombine.low %v4680_v8, %v4684_v9 }
 0x358   :  { %6362 = vmatpush1.bf16.msra.mxu1 %v8031_v29  ;;  %6416 = vmatprep.subr.bf16.mxu0 %v8232_v24  ;;  %v4584_v29 = vld [vmem:[%s12439_s7 + $0x640] sm:$0xff] }
 0x359   :  { %6363 = vmatprep.subr.bf16.mxu1 %v8024_v30  ;;  %6417 = vmatpush2.bf16.msra.mxu0 %v8231_v14  ;;  %v4588_v30 = vld [vmem:[%s12439_s7 + $0x660] sm:$0xff] }
 0x35a   :  { %v8224_v32 = vcombine.high %v4584_v29, %v4588_v30  ;;  %v8223_v49 = vcombine.low %v4584_v29, %v4588_v30  ;;  %v4668_v24 = vld [vmem:[%s12439_s7 + $0x8e0] sm:$0xff] }
 0x35b   :  { %v4660_v29 = vld [vmem:[%s12439_s7 + $0x8a0] sm:$0xff]  ;;  %v8303_v30 = vcombine.low %v4664_v22, %v4668_v24 }
 0x35c   :  { %6364 = vmatpush1.bf16.msra.mxu1 %v8023_v35  ;;  %6418 = vmatprep.subr.bf16.mxu0 %v8224_v32  ;;  %v4580_v35 = vld [vmem:[%s12439_s7 + $0x620] sm:$0xff] }
 0x35d   :  { %6365 = vmatprep.subr.bf16.mxu1 %v8144_v21  ;;  %6419 = vmatpush2.bf16.msra.mxu0 %v8223_v49  ;;  %v8216_v21 = vcombine.high %v4576_v33, %v4580_v35  ;;  %v8215_v36 = vcombine.low %v4576_v33, %v4580_v35  ;;  %v4648_v32 = vld [vmem:[%s12439_s7 + $0x840] sm:$0xff] }
 0x35e   :  { %v4652_v49 = vld [vmem:[%s12439_s7 + $0x860] sm:$0xff] }
 0x35f   :  { %6420 = vmatprep.subr.bf16.mxu0 %v8216_v21  ;;  %v4640_v33 = vld [vmem:[%s12439_s7 + $0x800] sm:$0xff]  ;;  %v8287_v21 = vcombine.low %v4648_v32, %v4652_v49 }
 0x360   :  { %6366 = vmatpush2.bf16.msra.mxu1 %v8143_v46  ;;  %v4644_v35 = vld [vmem:[%s12439_s7 + $0x820] sm:$0xff] }
 0x361   :  { %6367 = vmatprep.subr.bf16.mxu1 %v8136_v47  ;;  %6421 = vmatpush2.bf16.msra.mxu0 %v8215_v36  ;;  %v8280_v36 = vcombine.high %v4640_v33, %v4644_v35 }
 0x362   :  { %6472 = vmatprep.subr.bf16.mxu0 %v8082_v42  ;;  %v4569_v42 = vld [vmem:[%s12439_s7 + $0x5c8] sm:$0xff] }
 0x364   :  { %6368 = vmatpush2.bf16.msra.mxu1 %v8135_v54 }
 0x365   :  { %6369 = vmatprep.subr.bf16.mxu1 %v8128_v59 }
 0x368   :  { %6370 = vmatpush2.bf16.msra.mxu1 %v8127_v63 }
 0x369   :  { %6371 = vmatprep.subr.bf16.mxu1 %v8120_v0 }
 0x36c   :  { %6372 = vmatpush2.bf16.msra.mxu1 %v8119_v56  ;;  %v8335_v56 = vcombine.low %v4696_v23, %v4696_v23 }
 0x36d   :  { %6373 = vmatprep.subr.bf16.mxu1 %v8112_v4 }
 0x36e   :  { %v6326_v12 = vsel %vm3285_vm1, %v8335_v56, 0 }
 0x370   :  { %6374 = vmatpush2.bf16.msra.mxu1 %v8111_v7 }
 0x371   :  { %6375 = vmatprep.subr.bf16.mxu1 %v8104_v10 }
 0x374   :  { %6376 = vmatpush2.bf16.msra.mxu1 %v8103_v16  ;;  %v8320_v16 = vcombine.high %v4680_v8, %v4684_v9 }
 0x375   :  { %6377 = vmatprep.subr.bf16.mxu1 %v8096_v57  ;;  %v4672_v57 = vld [vmem:[%s12439_s7 + $0x900] sm:$0xff] }
 0x376   :  { %v8312_v20 = vcombine.high %v4672_v57, %v4676_v17  ;;  %v8311_v14 = vcombine.low %v4672_v57, %v4676_v17  ;;  %v4429_v57 = vld [vmem:[%s12439_s7 + $0x168] sm:$0xff] }
 0x377   :  { %v4565_v17 = vld [vmem:[%s12439_s7 + $0x5a8] sm:$0xff] }
 0x378   :  { %6378 = vmatpush2.bf16.msra.mxu1 %v8095_v27  ;;  %v8304_v27 = vcombine.high %v4664_v22, %v4668_v24 }
 0x379   :  { %6379 = vmatprep.subr.bf16.mxu1 %v8088_v28  ;;  %v4656_v28 = vld [vmem:[%s12439_s7 + $0x880] sm:$0xff] }
 0x37a   :  { %v8296_v23 = vcombine.high %v4656_v28, %v4660_v29 }
 0x37c   :  { %6380 = vmatpush2.bf16.msra.mxu1 %v8087_v37  ;;  %v8295_v37 = vcombine.low %v4656_v28, %v4660_v29  ;;  %v4417_v29 = vld [vmem:[%s12439_s7 + $0x108] sm:$0xff] }
 0x37d   :  { %8343 = vmatprep.subr.msk.bf16.mxu1 %vm3285_vm1, %v8336_v52  ;;  %v8288_v52 = vcombine.high %v4648_v32, %v4652_v49 }
 0x38c   :  { %v4164_v44 = vpop.f32.mrf.mxu0 }
 0x38d   :  { %v4165_v62 = vadd.f32 %v4164_v44, %v3651_v31  ;;  %v4573_v44 = vld [vmem:[%s12439_s7 + $0x5e8] sm:$0xff] }
 0x38e   :  { %v4166_v46 = vpop.f32.mrf.mxu0  ;;  %v8209_v24 = vcombine.low %v4569_v42, %v4573_v44 }
 0x38f   :  { %v4167_v40 = vadd.f32 %v4166_v46, %v3655_v45  ;;  %v8279_v46 = vcombine.low %v4640_v33, %v4644_v35  ;;  %v3659_v45 = vrot.slane %v11383_v50, %v10724_v25  ;;  %v4413_v33 = vld [vmem:[%s12439_s7 + $0xe8] sm:$0xff] }
 0x390   :  { %v4168_v47 = vpop.f32.mrf.mxu0  ;;  %v4545_v35 = vld [vmem:[%s12439_s7 + $0x508] sm:$0xff] }
 0x391   :  { %v8210_v47 = vcombine.high %v4569_v42, %v4573_v44 }
 0x392   :  { %v4169_v48 = vpop.f32.mrf.mxu0 }
 0x3ac   :  { %v8548_v53 = vpop.f32.mrf.mxu0 }
 0x3ae   :  { %v8549_v54 = vpop.f32.mrf.mxu0 }
 0x3af   :  { %v11389_v59 = vadd.f32 %v8549_v54, %v8548_v53  ;;  %v4205_v60 = vpop.f32.mrf.mxu1 }
 0x3b0   :  { %v4206_v55 = vadd.f32 %v4205_v60, %v4165_v62  ;;  %v8551_v61 = vpop.f32.mrf.mxu0  ;;  %v3663_v62 = vrot.slane %v11383_v50, %v10727_v26 }
 0x3b1   :  { %v4207_v63 = vpop.f32.mrf.mxu1 }
 0x3b2   :  { %v4208_v0 = vadd.f32 %v4207_v63, %v4167_v40  ;;  %v8552_v1 = vpop.f32.mrf.mxu0  ;;  %v4374_v2 = vmax.f32 %v4206_v55, 0.0 }
 0x3b3   :  { %v4209_v3 = vpop.f32.mrf.mxu1  ;;  %v3667_v1 = vrot.slane %v11383_v50, %v10810_v18 }
 0x3b4   :  { %v4375_v4 = vmax.f32 %v4208_v0, 0.0  ;;  %v11399_v11 = vpack.c.bf16 %v4374_v2, %v4374_v2 }
 0x3b5   :  { %v4210_v7 = vpop.f32.mrf.mxu1 }
 0x3b6   :  { %v11397_v10 = vpack.c.bf16 %v4375_v4, %v4375_v4  ;;  %v4433_v4 = vld [vmem:[%s12439_s7 + $0x188] sm:$0xff] }
 0x3b7   :  { %v8074_v50 = vcombine.high %v4433_v4, %v4437_v6 }
 0x3b8   :  { %6381 = vmatprep.mubr.bf16.mxu1 %v11397_v10 }
 0x3b9   :  { %6382 = vmatmul.mubr.bf16.vlgmr.msra.gmra.mxu1 %v11399_v11 }
 0x3ba   :  { %6432 = vmatpush1.bf16.msra.mxu1 %v6326_v12  ;;  %6463 = vmatprep.mubr.bf16.mxu1 %v9413_v5  ;;  %v4329_v12 = vadd.f32 %v11389_v59, %v3667_v1  ;;  %v4561_v59 = vld [vmem:[%s12439_s7 + $0x588] sm:$0xff] }
 0x3bb   :  { %6433 = vmatprep.subr.bf16.mxu1 %v8328_v13  ;;  %v8202_v28 = vcombine.high %v4561_v59, %v4565_v17  ;;  %v8201_v32 = vcombine.low %v4561_v59, %v4565_v17  ;;  %v4517_v59 = vld [vmem:[%s12439_s7 + $0x428] sm:$0xff] }
 0x3be   :  { %6434 = vmatpush1.bf16.msra.mxu1 %v8327_v15  ;;  %v4425_v15 = vld [vmem:[%s12439_s7 + $0x148] sm:$0xff] }
 0x3bf   :  { %6435 = vmatprep.subr.bf16.mxu1 %v8320_v16 }
 0x3c2   :  { %6436 = vmatpush1.bf16.msra.mxu1 %v8319_v19 }
 0x3c3   :  { %6437 = vmatprep.subr.bf16.mxu1 %v8312_v20  ;;  %v8073_v20 = vcombine.low %v4433_v4, %v4437_v6  ;;  %v4389_v4 = vld [vmem:[%s12439_s7 + $0x28] sm:$0xff] }
 0x3c4   :  { %v4521_v6 = vld [vmem:[%s12439_s7 + $0x448] sm:$0xff] }
 0x3c6   :  { %6438 = vmatpush1.bf16.msra.mxu1 %v8311_v14 }
 0x3c7   :  { %6439 = vmatprep.subr.bf16.mxu1 %v8304_v27  ;;  %v8066_v27 = vcombine.high %v4425_v15, %v4429_v57 }
 0x3ca   :  { %6440 = vmatpush1.bf16.msra.mxu1 %v8303_v30  ;;  %v4421_v30 = vld [vmem:[%s12439_s7 + $0x128] sm:$0xff] }
 0x3cb   :  { %6441 = vmatprep.subr.bf16.mxu1 %v8296_v23  ;;  %v8065_v23 = vcombine.low %v4425_v15, %v4429_v57  ;;  %v8058_v49 = vcombine.high %v4417_v29, %v4421_v30  ;;  %v4505_v15 = vld [vmem:[%s12439_s7 + $0x3c8] sm:$0xff] }
 0x3cc   :  { %v4513_v57 = vld [vmem:[%s12439_s7 + $0x408] sm:$0xff] }
 0x3ce   :  { %6442 = vmatpush1.bf16.msra.mxu1 %v8295_v37 }
 0x3cf   :  { %6443 = vmatprep.subr.bf16.mxu1 %v8288_v52  ;;  %v4409_v52 = vld [vmem:[%s12439_s7 + $0xc8] sm:$0xff] }
 0x3d0   :  { %v8050_v44 = vcombine.high %v4409_v52, %v4413_v33 }
 0x3d2   :  { %6444 = vmatpush1.bf16.msra.mxu1 %v8287_v21  ;;  %v4549_v21 = vld [vmem:[%s12439_s7 + $0x528] sm:$0xff] }
 0x3d3   :  { %6445 = vmatprep.subr.bf16.mxu1 %v8280_v36  ;;  %v8057_v36 = vcombine.low %v4417_v29, %v4421_v30  ;;  %v4637_v29 = vld [vmem:[%s12439_s7 + $0x7e8] sm:$0xff] }
 0x3d6   :  { %6446 = vmatpush1.bf16.msra.mxu1 %v8279_v46  ;;  %v8186_v46 = vcombine.high %v4545_v35, %v4549_v21 }
 0x3d7   :  { %6513 = vmatprep.subr.bf16.mxu1 %v8210_v47  ;;  %v4401_v47 = vld [vmem:[%s12439_s7 + $0x88] sm:$0xff] }
 0x3ef   :  { %v4246_v48 = vpop.f32.mrf.mxu1 }
 0x3f0   :  { %v4247_v60 = vadd.f32 %v4246_v48, %v3659_v45  ;;  %v4405_v48 = vld [vmem:[%s12439_s7 + $0xa8] sm:$0xff] }
 0x3f1   :  { %v4248_v31 = vpop.f32.mrf.mxu1  ;;  %v4541_v45 = vld [vmem:[%s12439_s7 + $0x4e8] sm:$0xff] }
 0x3f2   :  { %v4249_v55 = vadd.f32 %v4248_v31, %v3663_v62  ;;  %v4537_v31 = vld [vmem:[%s12439_s7 + $0x4c8] sm:$0xff]  ;;  %v8185_v62 = vcombine.low %v4545_v35, %v4549_v21 }
 0x3f3   :  { %v4250_v53 = vpop.f32.mrf.mxu1  ;;  %v8177_v1 = vcombine.low %v4537_v31, %v4541_v45 }
 0x3f4   :  { %v8049_v53 = vcombine.low %v4409_v52, %v4413_v33 }
 0x3f5   :  { %v4251_v54 = vpop.f32.mrf.mxu1 }
 0x3f6   :  { %v8042_v54 = vcombine.high %v4401_v47, %v4405_v48 }
 0x3f7   :  { %v4287_v40 = vpop.f32.mrf.mxu1 }
 0x3f8   :  { %v4288_v61 = vadd.f32 %v4287_v40, %v4247_v60  ;;  %v8178_v60 = vcombine.high %v4537_v31, %v4541_v45  ;;  %v4393_v40 = vld [vmem:[%s12439_s7 + $0x48] sm:$0xff] }
 0x3f9   :  { %v4289_v63 = vpop.f32.mrf.mxu1 }
 0x3fa   :  { %v4290_v0 = vadd.f32 %v4289_v63, %v4249_v55  ;;  %v4376_v2 = vmax.f32 %v4288_v61, 0.0  ;;  %v4397_v55 = vld [vmem:[%s12439_s7 + $0x68] sm:$0xff] }
 0x3fb   :  { %v4291_v3 = vpop.f32.mrf.mxu1  ;;  %v4529_v61 = vld [vmem:[%s12439_s7 + $0x488] sm:$0xff] }
 0x3fc   :  { %v4377_v56 = vmax.f32 %v4290_v0, 0.0  ;;  %v11462_v13 = vpack.c.bf16 %v4376_v2, %v4376_v2  ;;  %v4533_v63 = vld [vmem:[%s12439_s7 + $0x4a8] sm:$0xff]  ;;  %v8041_v0 = vcombine.low %v4401_v47, %v4405_v48  ;;  %v8034_v2 = vcombine.high %v4393_v40, %v4397_v55 }
 0x3fd   :  { %v4292_v51 = vpop.f32.mrf.mxu1  ;;  %v8170_v3 = vcombine.high %v4529_v61, %v4533_v63 }
 0x3fe   :  { %v11459_v7 = vpack.c.bf16 %v4377_v56, %v4377_v56  ;;  %v4385_v56 = vld [vmem:[%s12439_s7 + $0x8] sm:$0xff] }
 0x3ff   :  { %v4368_v8 = vpop.f32.mrf.mxu1  ;;  %v4525_v51 = vld [vmem:[%s12439_s7 + $0x468] sm:$0xff]  ;;  %v8025_v17 = vcombine.low %v4385_v56, %v4389_v4 }
 0x400   :  { %v4369_v9 = vadd.f32 %v4368_v8, %v4329_v12  ;;  %6422 = vmatprep.mubr.bf16.mxu0 %v11459_v7  ;;  %v8033_v12 = vcombine.low %v4393_v40, %v4397_v55  ;;  %v8169_v8 = vcombine.low %v4529_v61, %v4533_v63 }
 0x401   :  { %v8646_v16 = vpop.f32.mrf.mxu1  ;;  %6423 = vmatmul.mubr.bf16.vlgmr.msra.gmra.mxu0 %v11462_v13 }
 0x402   :  { %v4378_v19 = vmax.f32 %v4369_v9, 0.0  ;;  %6473 = vmatpush1.bf16.msra.mxu0 %v8081_v58  ;;  %6504 = vmatprep.mubr.bf16.mxu0 %v11397_v10  ;;  %v4557_v58 = vld [vmem:[%s12439_s7 + $0x568] sm:$0xff]  ;;  %v8162_v9 = vcombine.high %v4521_v6, %v4525_v51 }
 0x403   :  { %v4371_v22 = vpop.f32.mrf.mxu1  ;;  %6474 = vmatprep.subr.bf16.mxu0 %v8074_v50  ;;  %v8194_v37 = vcombine.high %v4553_v39, %v4557_v58  ;;  %v8193_v42 = vcombine.low %v4553_v39, %v4557_v58  ;;  %v8026_v50 = vcombine.high %v4385_v56, %v4389_v4  ;;  %v4509_v16 = vld [vmem:[%s12439_s7 + $0x3e8] sm:$0xff] }
 0x404   :  { %v11482_v14 = vpack.c.bf16 %v4378_v19, %v4378_v19  ;;  %v8161_v19 = vcombine.low %v4521_v6, %v4525_v51  ;;  %v8154_v22 = vcombine.high %v4513_v57, %v4517_v59  ;;  %v8145_v30 = vcombine.low %v4505_v15, %v4509_v16 }
 0x405   :  { %v8647_v38 = vpop.f32.mrf.mxu1 }
 0x406   :  { %6475 = vmatpush1.bf16.msra.mxu0 %v8073_v20  ;;  %8344 = vmatmul.mubr.msk.bf16.vlgmr.msra.gmra.mxu1 %vm3281_vm3, %v11482_v14  ;;  %v8146_v20 = vcombine.high %v4505_v15, %v4509_v16  ;;  %v8153_v38 = vcombine.low %v4513_v57, %v4517_v59 }
 0x407   :  { %6514 = vmatpush1.bf16.msra.mxu1 %v8209_v24  ;;  %6545 = vmatprep.mubr.bf16.mxu1 %v11459_v7  ;;  %v4497_v24 = vld [vmem:[%s12439_s7 + $0x388] sm:$0xff] }
 0x408   :  { %6476 = vmatprep.subr.bf16.mxu0 %v8066_v27  ;;  %6515 = vmatprep.subr.bf16.mxu1 %v8202_v28  ;;  %v4501_v27 = vld [vmem:[%s12439_s7 + $0x3a8] sm:$0xff] }
 0x409   :  { %v4633_v28 = vld [vmem:[%s12439_s7 + $0x7c8] sm:$0xff]  ;;  %v8138_v39 = vcombine.high %v4497_v24, %v4501_v27  ;;  %v8137_v52 = vcombine.low %v4497_v24, %v4501_v27 }
 0x40a   :  { %6477 = vmatpush1.bf16.msra.mxu0 %v8065_v23  ;;  %v8274_v58 = vcombine.high %v4633_v28, %v4637_v29  ;;  %v4489_v23 = vld [vmem:[%s12439_s7 + $0x348] sm:$0xff]  ;;  %v8273_v33 = vcombine.low %v4633_v28, %v4637_v29 }
 0x40b   :  { %6516 = vmatpush1.bf16.msra.mxu1 %v8201_v32  ;;  %6478 = vmatprep.subr.bf16.mxu0 %v8058_v49  ;;  %v4493_v32 = vld [vmem:[%s12439_s7 + $0x368] sm:$0xff] }
 0x40c   :  { %6517 = vmatprep.subr.bf16.mxu1 %v8194_v37  ;;  %v4625_v49 = vld [vmem:[%s12439_s7 + $0x788] sm:$0xff]  ;;  %v8130_v35 = vcombine.high %v4489_v23, %v4493_v32  ;;  %v8129_v47 = vcombine.low %v4489_v23, %v4493_v32 }
 0x40d   :  { %v4629_v37 = vld [vmem:[%s12439_s7 + $0x7a8] sm:$0xff] }
 0x40e   :  { %6479 = vmatpush1.bf16.msra.mxu0 %v8057_v36  ;;  %v8266_v21 = vcombine.high %v4625_v49, %v4629_v37  ;;  %v4481_v36 = vld [vmem:[%s12439_s7 + $0x308] sm:$0xff]  ;;  %v8265_v48 = vcombine.low %v4625_v49, %v4629_v37 }
 0x40f   :  { %6518 = vmatpush1.bf16.msra.mxu1 %v8193_v42  ;;  %6480 = vmatprep.subr.bf16.mxu0 %v8050_v44  ;;  %v4485_v42 = vld [vmem:[%s12439_s7 + $0x328] sm:$0xff] }
 0x410   :  { %6519 = vmatprep.subr.bf16.mxu1 %v8186_v46  ;;  %v4617_v44 = vld [vmem:[%s12439_s7 + $0x748] sm:$0xff]  ;;  %v8122_v31 = vcombine.high %v4481_v36, %v4485_v42  ;;  %v8121_v40 = vcombine.low %v4481_v36, %v4485_v42 }
 0x411   :  { %v4621_v46 = vld [vmem:[%s12439_s7 + $0x768] sm:$0xff] }
 0x412   :  { %6481 = vmatpush1.bf16.msra.mxu0 %v8049_v53  ;;  %v8258_v45 = vcombine.high %v4617_v44, %v4621_v46  ;;  %v4473_v53 = vld [vmem:[%s12439_s7 + $0x2c8] sm:$0xff]  ;;  %v8257_v55 = vcombine.low %v4617_v44, %v4621_v46 }
 0x413   :  { %6520 = vmatpush1.bf16.msra.mxu1 %v8185_v62  ;;  %6482 = vmatprep.subr.bf16.mxu0 %v8042_v54  ;;  %v4477_v62 = vld [vmem:[%s12439_s7 + $0x2e8] sm:$0xff] }
 0x414   :  { %6521 = vmatprep.subr.bf16.mxu1 %v8178_v60  ;;  %v4609_v54 = vld [vmem:[%s12439_s7 + $0x708] sm:$0xff]  ;;  %v8114_v61 = vcombine.high %v4473_v53, %v4477_v62  ;;  %v8113_v56 = vcombine.low %v4473_v53, %v4477_v62 }
 0x415   :  { %v4613_v60 = vld [vmem:[%s12439_s7 + $0x728] sm:$0xff] }
 0x416   :  { %6483 = vmatpush1.bf16.msra.mxu0 %v8041_v0  ;;  %v8250_v63 = vcombine.high %v4609_v54, %v4613_v60  ;;  %v4465_v0 = vld [vmem:[%s12439_s7 + $0x288] sm:$0xff]  ;;  %v8249_v4 = vcombine.low %v4609_v54, %v4613_v60 }
 0x417   :  { %6522 = vmatpush1.bf16.msra.mxu1 %v8177_v1  ;;  %6484 = vmatprep.subr.bf16.mxu0 %v8034_v2  ;;  %v4469_v1 = vld [vmem:[%s12439_s7 + $0x2a8] sm:$0xff] }
 0x418   :  { %6523 = vmatprep.subr.bf16.mxu1 %v8170_v3  ;;  %v4601_v2 = vld [vmem:[%s12439_s7 + $0x6c8] sm:$0xff]  ;;  %v8106_v6 = vcombine.high %v4465_v0, %v4469_v1  ;;  %v8105_v15 = vcombine.low %v4465_v0, %v4469_v1 }
 0x419   :  { %v4605_v3 = vld [vmem:[%s12439_s7 + $0x6e8] sm:$0xff] }
 0x41a   :  { %6485 = vmatpush1.bf16.msra.mxu0 %v8033_v12  ;;  %v8242_v51 = vcombine.high %v4601_v2, %v4605_v3  ;;  %v4457_v12 = vld [vmem:[%s12439_s7 + $0x248] sm:$0xff]  ;;  %v8241_v16 = vcombine.low %v4601_v2, %v4605_v3 }
 0x41b   :  { %6524 = vmatpush1.bf16.msra.mxu1 %v8169_v8  ;;  %6486 = vmatprep.subr.bf16.mxu0 %v8026_v50  ;;  %v4461_v8 = vld [vmem:[%s12439_s7 + $0x268] sm:$0xff] }
 0x41c   :  { %6525 = vmatprep.subr.bf16.mxu1 %v8162_v9  ;;  %v4593_v50 = vld [vmem:[%s12439_s7 + $0x688] sm:$0xff]  ;;  %v8098_v57 = vcombine.high %v4457_v12, %v4461_v8  ;;  %v8097_v24 = vcombine.low %v4457_v12, %v4461_v8 }
 0x41d   :  { %v4597_v9 = vld [vmem:[%s12439_s7 + $0x6a8] sm:$0xff] }
 0x41e   :  { %6487 = vmatpush1.bf16.msra.mxu0 %v8025_v17  ;;  %v8234_v59 = vcombine.high %v4593_v50, %v4597_v9  ;;  %v4449_v17 = vld [vmem:[%s12439_s7 + $0x208] sm:$0xff]  ;;  %v8233_v27 = vcombine.low %v4593_v50, %v4597_v9 }
 0x41f   :  { %6526 = vmatpush1.bf16.msra.mxu1 %v8161_v19  ;;  %6488 = vmatprep.subr.bf16.mxu0 %v8146_v20  ;;  %v4453_v19 = vld [vmem:[%s12439_s7 + $0x228] sm:$0xff] }
 0x420   :  { %6527 = vmatprep.subr.bf16.mxu1 %v8154_v22  ;;  %v4585_v20 = vld [vmem:[%s12439_s7 + $0x648] sm:$0xff]  ;;  %v8090_v28 = vcombine.high %v4449_v17, %v4453_v19 }
 0x421   :  { %v4589_v22 = vld [vmem:[%s12439_s7 + $0x668] sm:$0xff] }
 0x422   :  { %6489 = vmatpush2.bf16.msra.mxu0 %v8145_v30  ;;  %v8226_v29 = vcombine.high %v4585_v20, %v4589_v22  ;;  %v4697_v30 = vld [vmem:[%s12439_s7 + $0x9c8] sm:$0x77]  ;;  %v8225_v23 = vcombine.low %v4585_v20, %v4589_v22 }
 0x423   :  { %6528 = vmatpush1.bf16.msra.mxu1 %v8153_v38  ;;  %6490 = vmatprep.subr.bf16.mxu0 %v8138_v39  ;;  %v4577_v38 = vld [vmem:[%s12439_s7 + $0x608] sm:$0xff]  ;;  %v8338_v32 = vcombine.high %v4697_v30, %v4697_v30  ;;  %v8337_v49 = vcombine.low %v4697_v30, %v4697_v30 }
 0x424   :  { %6529 = vmatprep.subr.bf16.mxu1 %v8274_v58  ;;  %v4581_v39 = vld [vmem:[%s12439_s7 + $0x628] sm:$0xff]  ;;  %v8089_v58 = vcombine.low %v4449_v17, %v4453_v19 }
 0x425   :  { %v8218_v37 = vcombine.high %v4577_v38, %v4581_v39  ;;  %v8217_v36 = vcombine.low %v4577_v38, %v4581_v39  ;;  %v6332_v42 = vsel %vm3285_vm1, %v8337_v49, 0  ;;  %v4394_v49 = vld [vmem:[%s12439_s7 + $0x50] sm:$0xff] }
 0x426   :  { %6491 = vmatpush2.bf16.msra.mxu0 %v8137_v52  ;;  %v4689_v52 = vld [vmem:[%s12439_s7 + $0x988] sm:$0xff] }
 0x427   :  { %6530 = vmatpush2.bf16.msra.mxu1 %v8273_v33  ;;  %6492 = vmatprep.subr.bf16.mxu0 %v8130_v35  ;;  %v4693_v33 = vld [vmem:[%s12439_s7 + $0x9a8] sm:$0xff]  ;;  %v4442_v35 = vld [vmem:[%s12439_s7 + $0x1d0] sm:$0xff] }
 0x428   :  { %6531 = vmatprep.subr.bf16.mxu1 %v8266_v21  ;;  %v4446_v21 = vld [vmem:[%s12439_s7 + $0x1f0] sm:$0xff]  ;;  %v8330_v44 = vcombine.high %v4689_v52, %v4693_v33  ;;  %v8329_v53 = vcombine.low %v4689_v52, %v4693_v33 }
 0x429   :  { %v8084_v46 = vcombine.high %v4442_v35, %v4446_v21  ;;  %v8083_v62 = vcombine.low %v4442_v35, %v4446_v21 }
 0x42a   :  { %6493 = vmatpush2.bf16.msra.mxu0 %v8129_v47  ;;  %v4681_v47 = vld [vmem:[%s12439_s7 + $0x948] sm:$0xff] }
 0x42b   :  { %6532 = vmatpush2.bf16.msra.mxu1 %v8265_v48  ;;  %6494 = vmatprep.subr.bf16.mxu0 %v8122_v31  ;;  %v4685_v48 = vld [vmem:[%s12439_s7 + $0x968] sm:$0xff]  ;;  %v4434_v31 = vld [vmem:[%s12439_s7 + $0x190] sm:$0xff] }
 0x42c   :  { %6533 = vmatprep.subr.bf16.mxu1 %v8258_v45  ;;  %v4438_v45 = vld [vmem:[%s12439_s7 + $0x1b0] sm:$0xff]  ;;  %v8322_v54 = vcombine.high %v4681_v47, %v4685_v48  ;;  %v8321_v0 = vcombine.low %v4681_v47, %v4685_v48 }
 0x42d   :  { %v8076_v60 = vcombine.high %v4434_v31, %v4438_v45  ;;  %v8075_v1 = vcombine.low %v4434_v31, %v4438_v45 }
 0x42e   :  { %6495 = vmatpush2.bf16.msra.mxu0 %v8121_v40  ;;  %v4673_v40 = vld [vmem:[%s12439_s7 + $0x908] sm:$0xff] }
 0x42f   :  { %6534 = vmatpush2.bf16.msra.mxu1 %v8257_v55  ;;  %6496 = vmatprep.subr.bf16.mxu0 %v8114_v61  ;;  %v4677_v55 = vld [vmem:[%s12439_s7 + $0x928] sm:$0xff]  ;;  %v4426_v61 = vld [vmem:[%s12439_s7 + $0x150] sm:$0xff] }
 0x430   :  { %6535 = vmatprep.subr.bf16.mxu1 %v8250_v63  ;;  %v4430_v63 = vld [vmem:[%s12439_s7 + $0x170] sm:$0xff]  ;;  %v8314_v2 = vcombine.high %v4673_v40, %v4677_v55  ;;  %v8313_v12 = vcombine.low %v4673_v40, %v4677_v55 }
 0x431   :  { %v8068_v3 = vcombine.high %v4426_v61, %v4430_v63  ;;  %v8067_v8 = vcombine.low %v4426_v61, %v4430_v63 }
 0x432   :  { %6497 = vmatpush2.bf16.msra.mxu0 %v8113_v56  ;;  %v4665_v56 = vld [vmem:[%s12439_s7 + $0x8c8] sm:$0xff] }
 0x433   :  { %6536 = vmatpush2.bf16.msra.mxu1 %v8249_v4  ;;  %6498 = vmatprep.subr.bf16.mxu0 %v8106_v6  ;;  %v4669_v4 = vld [vmem:[%s12439_s7 + $0x8e8] sm:$0xff]  ;;  %v4418_v6 = vld [vmem:[%s12439_s7 + $0x110] sm:$0xff] }
 0x434   :  { %6537 = vmatprep.subr.bf16.mxu1 %v8242_v51  ;;  %v4422_v51 = vld [vmem:[%s12439_s7 + $0x130] sm:$0xff]  ;;  %v8306_v50 = vcombine.high %v4665_v56, %v4669_v4  ;;  %v8305_v17 = vcombine.low %v4665_v56, %v4669_v4 }
 0x435   :  { %v8060_v9 = vcombine.high %v4418_v6, %v4422_v51  ;;  %v8059_v19 = vcombine.low %v4418_v6, %v4422_v51  ;;  %v4546_v51 = vld [vmem:[%s12439_s7 + $0x510] sm:$0xff] }
 0x436   :  { %6499 = vmatpush2.bf16.msra.mxu0 %v8105_v15  ;;  %v4657_v15 = vld [vmem:[%s12439_s7 + $0x888] sm:$0xff] }
 0x437   :  { %6538 = vmatpush2.bf16.msra.mxu1 %v8241_v16  ;;  %6500 = vmatprep.subr.bf16.mxu0 %v8098_v57  ;;  %v4661_v16 = vld [vmem:[%s12439_s7 + $0x8a8] sm:$0xff]  ;;  %v4410_v57 = vld [vmem:[%s12439_s7 + $0xd0] sm:$0xff] }
 0x438   :  { %6539 = vmatprep.subr.bf16.mxu1 %v8234_v59  ;;  %v4414_v59 = vld [vmem:[%s12439_s7 + $0xf0] sm:$0xff]  ;;  %v8298_v20 = vcombine.high %v4657_v15, %v4661_v16  ;;  %v8297_v30 = vcombine.low %v4657_v15, %v4661_v16 }
 0x439   :  { %v8052_v22 = vcombine.high %v4410_v57, %v4414_v59  ;;  %v8051_v38 = vcombine.low %v4410_v57, %v4414_v59  ;;  %v4538_v16 = vld [vmem:[%s12439_s7 + $0x4d0] sm:$0xff] }
 0x43a   :  { %6501 = vmatpush2.bf16.msra.mxu0 %v8097_v24  ;;  %v4649_v24 = vld [vmem:[%s12439_s7 + $0x848] sm:$0xff]  ;;  %v4542_v57 = vld [vmem:[%s12439_s7 + $0x4f0] sm:$0xff] }
 0x43b   :  { %6540 = vmatpush2.bf16.msra.mxu1 %v8233_v27  ;;  %6502 = vmatprep.subr.bf16.mxu0 %v8090_v28  ;;  %v4653_v27 = vld [vmem:[%s12439_s7 + $0x868] sm:$0xff]  ;;  %v4402_v28 = vld [vmem:[%s12439_s7 + $0x90] sm:$0xff] }
 0x43c   :  { %6541 = vmatprep.subr.bf16.mxu1 %v8226_v29  ;;  %v4406_v29 = vld [vmem:[%s12439_s7 + $0xb0] sm:$0xff]  ;;  %v8290_v39 = vcombine.high %v4649_v24, %v4653_v27  ;;  %v8289_v52 = vcombine.low %v4649_v24, %v4653_v27 }
 0x43d   :  { %v8043_v33 = vcombine.low %v4402_v28, %v4406_v29  ;;  %v4530_v27 = vld [vmem:[%s12439_s7 + $0x490] sm:$0xff] }
 0x43e   :  { %6503 = vmatpush2.bf16.msra.mxu0 %v8089_v58  ;;  %v8044_v58 = vcombine.high %v4402_v28, %v4406_v29  ;;  %v4534_v28 = vld [vmem:[%s12439_s7 + $0x4b0] sm:$0xff] }
 0x43f   :  { %6542 = vmatpush2.bf16.msra.mxu1 %v8225_v23  ;;  %8345 = vmatprep.subr.msk.bf16.mxu0 %vm3285_vm1, %v8338_v32  ;;  %v4641_v23 = vld [vmem:[%s12439_s7 + $0x808] sm:$0xff] }
 0x440   :  { %6543 = vmatprep.subr.bf16.mxu1 %v8218_v37  ;;  %v4645_v32 = vld [vmem:[%s12439_s7 + $0x828] sm:$0xff]  ;;  %v4398_v37 = vld [vmem:[%s12439_s7 + $0x70] sm:$0xff] }
 0x441   :  { %6505 = vmatmul.mubr.bf16.vlgmr.msra.gmra.mxu0 %v11399_v11  ;;  %v8282_v35 = vcombine.high %v4641_v23, %v4645_v32  ;;  %v8036_v21 = vcombine.high %v4394_v49, %v4398_v37  ;;  %v8281_v47 = vcombine.low %v4641_v23, %v4645_v32  ;;  %v8035_v48 = vcombine.low %v4394_v49, %v4398_v37  ;;  %v4522_v32 = vld [vmem:[%s12439_s7 + $0x450] sm:$0xff] }
 0x442   :  { %6555 = vmatpush1.bf16.msra.mxu0 %v6332_v42  ;;  %6586 = vmatprep.mubr.bf16.mxu0 %v9413_v5  ;;  %v4574_v42 = vld [vmem:[%s12439_s7 + $0x5f0] sm:$0xff]  ;;  %v8179_v23 = vcombine.low %v4538_v16, %v4542_v57 }
 0x443   :  { %6544 = vmatpush2.bf16.msra.mxu1 %v8217_v36  ;;  %6556 = vmatprep.subr.bf16.mxu0 %v8330_v44  ;;  %v4570_v36 = vld [vmem:[%s12439_s7 + $0x5d0] sm:$0xff] }
 0x444   :  { %6595 = vmatprep.subr.bf16.mxu1 %v8084_v46  ;;  %v4386_v44 = vld [vmem:[%s12439_s7 + $0x10] sm:$0xff]  ;;  %v8212_v31 = vcombine.high %v4570_v36, %v4574_v42  ;;  %v8211_v40 = vcombine.low %v4570_v36, %v4574_v42  ;;  %v8171_v36 = vcombine.low %v4530_v27, %v4534_v28 }
 0x445   :  { %v4390_v46 = vld [vmem:[%s12439_s7 + $0x30] sm:$0xff] }
 0x446   :  { %6546 = vmatmul.mubr.bf16.vlgmr.msra.gmra.mxu1 %v11462_v13  ;;  %6557 = vmatpush1.bf16.msra.mxu0 %v8329_v53  ;;  %v8028_v45 = vcombine.high %v4386_v44, %v4390_v46  ;;  %v4562_v53 = vld [vmem:[%s12439_s7 + $0x590] sm:$0xff]  ;;  %v8027_v55 = vcombine.low %v4386_v44, %v4390_v46 }
 0x447   :  { %6596 = vmatpush1.bf16.msra.mxu1 %v8083_v62  ;;  %6627 = vmatprep.mubr.bf16.mxu1 %v11397_v10  ;;  %v4566_v62 = vld [vmem:[%s12439_s7 + $0x5b0] sm:$0xff] }
 0x448   :  { %6558 = vmatprep.subr.bf16.mxu0 %v8322_v54  ;;  %6597 = vmatprep.subr.bf16.mxu1 %v8076_v60  ;;  %v4506_v54 = vld [vmem:[%s12439_s7 + $0x3d0] sm:$0xff]  ;;  %v8204_v61 = vcombine.high %v4562_v53, %v4566_v62  ;;  %v8203_v56 = vcombine.low %v4562_v53, %v4566_v62 }
 0x449   :  { %v4510_v60 = vld [vmem:[%s12439_s7 + $0x3f0] sm:$0xff] }
 0x44a   :  { %6559 = vmatpush1.bf16.msra.mxu0 %v8321_v0  ;;  %v8148_v63 = vcombine.high %v4506_v54, %v4510_v60  ;;  %v4554_v0 = vld [vmem:[%s12439_s7 + $0x550] sm:$0xff]  ;;  %v8147_v4 = vcombine.low %v4506_v54, %v4510_v60 }
 0x44b   :  { %6598 = vmatpush1.bf16.msra.mxu1 %v8075_v1  ;;  %6560 = vmatprep.subr.bf16.mxu0 %v8314_v2  ;;  %v4558_v1 = vld [vmem:[%s12439_s7 + $0x570] sm:$0xff] }
 0x44c   :  { %6599 = vmatprep.subr.bf16.mxu1 %v8068_v3  ;;  %v4498_v2 = vld [vmem:[%s12439_s7 + $0x390] sm:$0xff]  ;;  %v8196_v6 = vcombine.high %v4554_v0, %v4558_v1  ;;  %v8195_v15 = vcombine.low %v4554_v0, %v4558_v1 }
 0x44d   :  { %v4502_v3 = vld [vmem:[%s12439_s7 + $0x3b0] sm:$0xff] }
 0x44e   :  { %6561 = vmatpush1.bf16.msra.mxu0 %v8313_v12  ;;  %v4550_v12 = vld [vmem:[%s12439_s7 + $0x530] sm:$0xff]  ;;  %v8139_v59 = vcombine.low %v4498_v2, %v4502_v3 }
 0x44f   :  { %6600 = vmatpush1.bf16.msra.mxu1 %v8067_v8  ;;  %6562 = vmatprep.subr.bf16.mxu0 %v8306_v50  ;;  %v8140_v8 = vcombine.high %v4498_v2, %v4502_v3  ;;  %v4490_v50 = vld [vmem:[%s12439_s7 + $0x350] sm:$0xff]  ;;  %v8187_v24 = vcombine.low %v4546_v51, %v4550_v12 }
 0x450   :  { %6601 = vmatprep.subr.bf16.mxu1 %v8060_v9  ;;  %v4494_v9 = vld [vmem:[%s12439_s7 + $0x370] sm:$0xff] }
 0x451   :  { %v8131_v29 = vcombine.low %v4490_v50, %v4494_v9  ;;  %v4526_v49 = vld [vmem:[%s12439_s7 + $0x470] sm:$0xff] }
 0x452   :  { %6563 = vmatpush1.bf16.msra.mxu0 %v8305_v17  ;;  %v8188_v17 = vcombine.high %v4546_v51, %v4550_v12  ;;  %v4514_v42 = vld [vmem:[%s12439_s7 + $0x410] sm:$0xff]  ;;  %v8163_v53 = vcombine.low %v4522_v32, %v4526_v49 }
 0x453   :  { %6602 = vmatpush1.bf16.msra.mxu1 %v8059_v19  ;;  %6564 = vmatprep.subr.bf16.mxu0 %v8298_v20  ;;  %v8132_v19 = vcombine.high %v4490_v50, %v4494_v9  ;;  %v4482_v20 = vld [vmem:[%s12439_s7 + $0x310] sm:$0xff] }
 0x454   :  { %6603 = vmatprep.subr.bf16.mxu1 %v8052_v22  ;;  %v4486_v22 = vld [vmem:[%s12439_s7 + $0x330] sm:$0xff] }
 0x455   :  { %v8123_v37 = vcombine.low %v4482_v20, %v4486_v22  ;;  %v4518_v44 = vld [vmem:[%s12439_s7 + $0x430] sm:$0xff] }
 0x456   :  { %6565 = vmatpush1.bf16.msra.mxu0 %v8297_v30  ;;  %v8180_v30 = vcombine.high %v4538_v16, %v4542_v57  ;;  %v4634_v62 = vld [vmem:[%s12439_s7 + $0x7d0] sm:$0xff]  ;;  %v8155_v1 = vcombine.low %v4514_v42, %v4518_v44 }
 0x457   :  { %6604 = vmatpush1.bf16.msra.mxu1 %v8051_v38  ;;  %6566 = vmatprep.subr.bf16.mxu0 %v8290_v39  ;;  %v8124_v38 = vcombine.high %v4482_v20, %v4486_v22  ;;  %v4474_v39 = vld [vmem:[%s12439_s7 + $0x2d0] sm:$0xff] }
 0x458   :  { %6605 = vmatprep.subr.bf16.mxu1 %v8044_v58  ;;  %v4478_v58 = vld [vmem:[%s12439_s7 + $0x2f0] sm:$0xff] }
 0x459   :  { %v8115_v46 = vcombine.low %v4474_v39, %v4478_v58  ;;  %v4638_v54 = vld [vmem:[%s12439_s7 + $0x7f0] sm:$0xff] }
 0x45a   :  { %6567 = vmatpush1.bf16.msra.mxu0 %v8289_v52  ;;  %v8172_v52 = vcombine.high %v4530_v27, %v4534_v28  ;;  %v4454_v0 = vld [vmem:[%s12439_s7 + $0x230] sm:$0xff]  ;;  %v8275_v9 = vcombine.low %v4634_v62, %v4638_v54 }
 0x45b   :  { %6606 = vmatpush1.bf16.msra.mxu1 %v8043_v33  ;;  %6568 = vmatprep.subr.bf16.mxu0 %v8282_v35  ;;  %v8116_v33 = vcombine.high %v4474_v39, %v4478_v58  ;;  %v4466_v35 = vld [vmem:[%s12439_s7 + $0x290] sm:$0xff] }
 0x45c   :  { %6607 = vmatprep.subr.bf16.mxu1 %v8036_v21  ;;  %v4470_v21 = vld [vmem:[%s12439_s7 + $0x2b0] sm:$0xff] }
 0x45d   :  { %v8107_v60 = vcombine.low %v4466_v35, %v4470_v21  ;;  %v4626_v2 = vld [vmem:[%s12439_s7 + $0x790] sm:$0xff] }
 0x45e   :  { %6569 = vmatpush1.bf16.msra.mxu0 %v8281_v47  ;;  %v8164_v47 = vcombine.high %v4522_v32, %v4526_v49  ;;  %v4698_v3 = vld [vmem:[%s12439_s7 + $0x9d0] sm:$0x77] }
 0x45f   :  { %6608 = vmatpush1.bf16.msra.mxu1 %v8035_v48  ;;  %6636 = vmatprep.subr.bf16.mxu0 %v8212_v31  ;;  %v8108_v48 = vcombine.high %v4466_v35, %v4470_v21  ;;  %v4458_v31 = vld [vmem:[%s12439_s7 + $0x250] sm:$0xff]  ;;  %v8339_v50 = vcombine.low %v4698_v3, %v4698_v3 }
 0x460   :  { %6609 = vmatprep.subr.bf16.mxu1 %v8028_v45  ;;  %v4462_v45 = vld [vmem:[%s12439_s7 + $0x270] sm:$0xff] }
 0x461   :  { %8346 = vmatmul.mubr.msk.bf16.vlgmr.msra.gmra.mxu0 %vm3281_vm3, %v11482_v14  ;;  %v4630_v12 = vld [vmem:[%s12439_s7 + $0x7b0] sm:$0xff]  ;;  %v6338_v22 = vsel %vm3285_vm1, %v8339_v50, 0 }
 0x462   :  { %6637 = vmatpush1.bf16.msra.mxu0 %v8211_v40  ;;  %6668 = vmatprep.mubr.bf16.mxu0 %v11459_v7  ;;  %v8156_v40 = vcombine.high %v4514_v42, %v4518_v44  ;;  %v4622_v16 = vld [vmem:[%s12439_s7 + $0x770] sm:$0xff]  ;;  %v8267_v27 = vcombine.low %v4626_v2, %v4630_v12 }
 0x463   :  { %6610 = vmatpush1.bf16.msra.mxu1 %v8027_v55  ;;  %6638 = vmatprep.subr.bf16.mxu0 %v8204_v61  ;;  %v8100_v55 = vcombine.high %v4458_v31, %v4462_v45  ;;  %v4450_v61 = vld [vmem:[%s12439_s7 + $0x210] sm:$0xff] }
 0x464   :  { %6611 = vmatprep.subr.bf16.mxu1 %v8148_v63  ;;  %v8092_v51 = vcombine.high %v4450_v61, %v4454_v0  ;;  %v4690_v20 = vld [vmem:[%s12439_s7 + $0x990] sm:$0xff] }
 0x465   :  { %v4610_v28 = vld [vmem:[%s12439_s7 + $0x710] sm:$0xff] }
 0x466   :  { %6639 = vmatpush1.bf16.msra.mxu0 %v8203_v56  ;;  %v4686_v39 = vld [vmem:[%s12439_s7 + $0x970] sm:$0xff] }
 0x467   :  { %6612 = vmatpush2.bf16.msra.mxu1 %v8147_v4  ;;  %6640 = vmatprep.subr.bf16.mxu0 %v8196_v6  ;;  %v8099_v4 = vcombine.low %v4458_v31, %v4462_v45  ;;  %v8276_v6 = vcombine.high %v4634_v62, %v4638_v54  ;;  %v4602_v32 = vld [vmem:[%s12439_s7 + $0x6d0] sm:$0xff] }
 0x468   :  { %6613 = vmatprep.subr.bf16.mxu1 %v8140_v8  ;;  %v4606_v49 = vld [vmem:[%s12439_s7 + $0x6f0] sm:$0xff] }
 0x469   :  { %v4678_v21 = vld [vmem:[%s12439_s7 + $0x930] sm:$0xff]  ;;  %v8244_v44 = vcombine.high %v4602_v32, %v4606_v49 }
 0x46a   :  { %6641 = vmatpush1.bf16.msra.mxu0 %v8195_v15  ;;  %v4618_v15 = vld [vmem:[%s12439_s7 + $0x750] sm:$0xff] }
 0x46b   :  { %6614 = vmatpush2.bf16.msra.mxu1 %v8139_v59  ;;  %6642 = vmatprep.subr.bf16.mxu0 %v8188_v17  ;;  %v8091_v59 = vcombine.low %v4450_v61, %v4454_v0  ;;  %v8268_v17 = vcombine.high %v4626_v2, %v4630_v12  ;;  %v4666_v31 = vld [vmem:[%s12439_s7 + $0x8d0] sm:$0xff] }
 0x46c   :  { %6615 = vmatprep.subr.bf16.mxu1 %v8132_v19  ;;  %v8340_v19 = vcombine.high %v4698_v3, %v4698_v3  ;;  %v4670_v45 = vld [vmem:[%s12439_s7 + $0x8f0] sm:$0xff] }
 0x46d   :  { %v4586_v62 = vld [vmem:[%s12439_s7 + $0x650] sm:$0xff]  ;;  %v8308_v0 = vcombine.high %v4666_v31, %v4670_v45 }
 0x46e   :  { %6643 = vmatpush1.bf16.msra.mxu0 %v8187_v24  ;;  %v4694_v24 = vld [vmem:[%s12439_s7 + $0x9b0] sm:$0xff] }
 0x46f   :  { %6616 = vmatpush2.bf16.msra.mxu1 %v8131_v29  ;;  %6644 = vmatprep.subr.bf16.mxu0 %v8180_v30  ;;  %v4614_v29 = vld [vmem:[%s12439_s7 + $0x730] sm:$0xff]  ;;  %v8260_v30 = vcombine.high %v4618_v15, %v4622_v16  ;;  %v8332_v58 = vcombine.high %v4690_v20, %v4694_v24 }
 0x470   :  { %6617 = vmatprep.subr.bf16.mxu1 %v8124_v38  ;;  %v4682_v38 = vld [vmem:[%s12439_s7 + $0x950] sm:$0xff] }
 0x471   :  { %v8324_v35 = vcombine.high %v4682_v38, %v4686_v39  ;;  %v8323_v42 = vcombine.low %v4682_v38, %v4686_v39  ;;  %v4590_v54 = vld [vmem:[%s12439_s7 + $0x670] sm:$0xff]  ;;  %v4575_v38 = vld [vmem:[%s12439_s7 + $0x5f8] sm:$0xff] }
 0x472   :  { %6645 = vmatpush1.bf16.msra.mxu0 %v8179_v23  ;;  %v8259_v23 = vcombine.low %v4618_v15, %v4622_v16  ;;  %v4662_v61 = vld [vmem:[%s12439_s7 + $0x8b0] sm:$0xff]  ;;  %v8227_v50 = vcombine.low %v4586_v62, %v4590_v54 }
 0x473   :  { %6618 = vmatpush2.bf16.msra.mxu1 %v8123_v37  ;;  %6646 = vmatprep.subr.bf16.mxu0 %v8172_v52  ;;  %v8331_v37 = vcombine.low %v4690_v20, %v4694_v24  ;;  %v8252_v52 = vcombine.high %v4610_v28, %v4614_v29  ;;  %v4578_v2 = vld [vmem:[%s12439_s7 + $0x610] sm:$0xff] }
 0x474   :  { %6619 = vmatprep.subr.bf16.mxu1 %v8116_v33  ;;  %v4674_v33 = vld [vmem:[%s12439_s7 + $0x910] sm:$0xff] }
 0x475   :  { %v4582_v3 = vld [vmem:[%s12439_s7 + $0x630] sm:$0xff] }
 0x476   :  { %6647 = vmatpush1.bf16.msra.mxu0 %v8171_v36  ;;  %v8251_v36 = vcombine.low %v4610_v28, %v4614_v29  ;;  %v4654_v12 = vld [vmem:[%s12439_s7 + $0x870] sm:$0xff]  ;;  %v8220_v16 = vcombine.high %v4578_v2, %v4582_v3  ;;  %v8219_v20 = vcombine.low %v4578_v2, %v4582_v3  ;;  %v4435_v28 = vld [vmem:[%s12439_s7 + $0x198] sm:$0xff] }
 0x477   :  { %6620 = vmatpush2.bf16.msra.mxu1 %v8115_v46  ;;  %6648 = vmatprep.subr.bf16.mxu0 %v8164_v47  ;;  %v8316_v46 = vcombine.high %v4674_v33, %v4678_v21  ;;  %v4594_v47 = vld [vmem:[%s12439_s7 + $0x690] sm:$0xff]  ;;  %v4439_v29 = vld [vmem:[%s12439_s7 + $0x1b8] sm:$0xff] }
 0x478   :  { %6621 = vmatprep.subr.bf16.mxu1 %v8108_v48  ;;  %v4598_v48 = vld [vmem:[%s12439_s7 + $0x6b0] sm:$0xff]  ;;  %v4407_v2 = vld [vmem:[%s12439_s7 + $0xb8] sm:$0xff] }
 0x479   :  { %v11850_v63 = vpop.f32.mrf.mxu1  ;;  %v4539_v3 = vld [vmem:[%s12439_s7 + $0x4d8] sm:$0xff] }
 0x47a   :  { %6649 = vmatpush1.bf16.msra.mxu0 %v8163_v53  ;;  %v8243_v53 = vcombine.low %v4602_v32, %v4606_v49  ;;  %v4427_v49 = vld [vmem:[%s12439_s7 + $0x158] sm:$0xff] }
 0x47b   :  { %6622 = vmatpush2.bf16.msra.mxu1 %v8107_v60  ;;  %v11861_v56 = vpop.f32.mrf.mxu1  ;;  %6650 = vmatprep.subr.bf16.mxu0 %v8156_v40  ;;  %v8315_v60 = vcombine.low %v4674_v33, %v4678_v21  ;;  %v8236_v40 = vcombine.high %v4594_v47, %v4598_v48  ;;  %v4567_v33 = vld [vmem:[%s12439_s7 + $0x5b8] sm:$0xff] }
 0x47c   :  { %6623 = vmatprep.subr.bf16.mxu1 %v8100_v55  ;;  %v4658_v55 = vld [vmem:[%s12439_s7 + $0x890] sm:$0xff] }
 0x47d   :  { %v6387_v8 = vpop.f32.mrf.mxu1  ;;  %v8299_v15 = vcombine.low %v4658_v55, %v4662_v61 }
 0x47e   :  { %6651 = vmatpush1.bf16.msra.mxu0 %v8155_v1  ;;  %v8235_v1 = vcombine.low %v4594_v47, %v4598_v48  ;;  %v8300_v8 = vcombine.high %v4658_v55, %v4662_v61  ;;  %v4555_v47 = vld [vmem:[%s12439_s7 + $0x558] sm:$0xff] }
 0x47f   :  { %6624 = vmatpush2.bf16.msra.mxu1 %v8099_v4  ;;  %v6388_v57 = vpop.f32.mrf.mxu1  ;;  %6652 = vmatprep.subr.bf16.mxu0 %v8276_v6  ;;  %v8307_v4 = vcombine.low %v4666_v31, %v4670_v45  ;;  %v8228_v6 = vcombine.high %v4586_v62, %v4590_v54  ;;  %v4411_v62 = vld [vmem:[%s12439_s7 + $0xd8] sm:$0xff] }
 0x480   :  { %6625 = vmatprep.subr.bf16.mxu1 %v8092_v51  ;;  %v4650_v51 = vld [vmem:[%s12439_s7 + $0x850] sm:$0xff]  ;;  %v4415_v54 = vld [vmem:[%s12439_s7 + $0xf8] sm:$0xff] }
 0x481   :  { %v8292_v57 = vcombine.high %v4650_v51, %v4654_v12  ;;  %v8054_v61 = vcombine.high %v4411_v62, %v4415_v54 }
 0x482   :  { %6653 = vmatpush2.bf16.msra.mxu0 %v8275_v9  ;;  %v4443_v9 = vld [vmem:[%s12439_s7 + $0x1d8] sm:$0xff] }
 0x483   :  { %6626 = vmatpush2.bf16.msra.mxu1 %v8091_v59  ;;  %6654 = vmatprep.subr.bf16.mxu0 %v8268_v17  ;;  %v4447_v59 = vld [vmem:[%s12439_s7 + $0x1f8] sm:$0xff]  ;;  %v4642_v17 = vld [vmem:[%s12439_s7 + $0x810] sm:$0xff] }
 0x484   :  { %8347 = vmatprep.subr.msk.bf16.mxu1 %vm3285_vm1, %v8340_v19  ;;  %v4646_v19 = vld [vmem:[%s12439_s7 + $0x830] sm:$0xff]  ;;  %v8086_v24 = vcombine.high %v4443_v9, %v4447_v59  ;;  %v8085_v39 = vcombine.low %v4443_v9, %v4447_v59  ;;  %v4399_v9 = vld [vmem:[%s12439_s7 + $0x78] sm:$0xff] }
 0x486   :  { %6628 = vmatmul.mubr.bf16.vlgmr.msra.gmra.mxu1 %v11399_v11  ;;  %6655 = vmatpush2.bf16.msra.mxu0 %v8267_v27  ;;  %v8284_v27 = vcombine.high %v4642_v17, %v4646_v19 }
 0x487   :  { %6678 = vmatpush1.bf16.msra.mxu1 %v6338_v22  ;;  %6656 = vmatprep.subr.bf16.mxu0 %v8260_v30  ;;  %v8291_v22 = vcombine.low %v4650_v51, %v4654_v12  ;;  %v4571_v30 = vld [vmem:[%s12439_s7 + $0x5d8] sm:$0xff] }
 0x488   :  { %6679 = vmatprep.subr.bf16.mxu1 %v8332_v58  ;;  %6709 = vmatprep.mubr.bf16.mxu1 %v9413_v5  ;;  %v8283_v58 = vcombine.low %v4642_v17, %v4646_v19  ;;  %v8214_v32 = vcombine.high %v4571_v30, %v4575_v38  ;;  %v8213_v21 = vcombine.low %v4571_v30, %v4575_v38 }
 0x48a   :  { %6657 = vmatpush2.bf16.msra.mxu0 %v8259_v23  ;;  %v8078_v23 = vcombine.high %v4435_v28, %v4439_v29 }
 0x48b   :  { %6680 = vmatpush1.bf16.msra.mxu1 %v8331_v37  ;;  %6658 = vmatprep.subr.bf16.mxu0 %v8252_v52  ;;  %v4431_v37 = vld [vmem:[%s12439_s7 + $0x178] sm:$0xff] }
 0x48c   :  { %6681 = vmatprep.subr.bf16.mxu1 %v8324_v35  ;;  %v4563_v52 = vld [vmem:[%s12439_s7 + $0x598] sm:$0xff]  ;;  %v8077_v35 = vcombine.low %v4435_v28, %v4439_v29  ;;  %v8069_v48 = vcombine.low %v4427_v49, %v4431_v37 }
 0x48d   :  { %v8205_v31 = vcombine.low %v4563_v52, %v4567_v33 }
 0x48e   :  { %6659 = vmatpush2.bf16.msra.mxu0 %v8251_v36  ;;  %v8070_v36 = vcombine.high %v4427_v49, %v4431_v37 }
 0x48f   :  { %6682 = vmatpush1.bf16.msra.mxu1 %v8323_v42  ;;  %6660 = vmatprep.subr.bf16.mxu0 %v8244_v44  ;;  %v8206_v42 = vcombine.high %v4563_v52, %v4567_v33  ;;  %v4419_v44 = vld [vmem:[%s12439_s7 + $0x118] sm:$0xff] }
 0x490   :  { %6683 = vmatprep.subr.bf16.mxu1 %v8316_v46  ;;  %v4423_v46 = vld [vmem:[%s12439_s7 + $0x138] sm:$0xff] }
 0x491   :  { %v8062_v45 = vcombine.high %v4419_v44, %v4423_v46 }
 0x492   :  { %6661 = vmatpush2.bf16.msra.mxu0 %v8243_v53 }
 0x493   :  { %6684 = vmatpush1.bf16.msra.mxu1 %v8315_v60  ;;  %6662 = vmatprep.subr.bf16.mxu0 %v8236_v40  ;;  %v4547_v60 = vld [vmem:[%s12439_s7 + $0x518] sm:$0xff]  ;;  %v8061_v40 = vcombine.low %v4419_v44, %v4423_v46 }
 0x494   :  { %6685 = vmatprep.subr.bf16.mxu1 %v8308_v0 }
 0x496   :  { %6663 = vmatpush2.bf16.msra.mxu0 %v8235_v1  ;;  %v4403_v1 = vld [vmem:[%s12439_s7 + $0x98] sm:$0xff] }
 0x497   :  { %6686 = vmatpush1.bf16.msra.mxu1 %v8307_v4  ;;  %6664 = vmatprep.subr.bf16.mxu0 %v8228_v6  ;;  %v4543_v4 = vld [vmem:[%s12439_s7 + $0x4f8] sm:$0xff]  ;;  %v8053_v6 = vcombine.low %v4411_v62, %v4415_v54  ;;  %v8046_v12 = vcombine.high %v4403_v1, %v4407_v2 }
 0x498   :  { %6687 = vmatprep.subr.bf16.mxu1 %v8300_v8  ;;  %v8182_v8 = vcombine.high %v4539_v3, %v4543_v4  ;;  %v8181_v59 = vcombine.low %v4539_v3, %v4543_v4  ;;  %v4631_v62 = vld [vmem:[%s12439_s7 + $0x7b8] sm:$0xff] }
 0x499   :  { %v4623_v3 = vld [vmem:[%s12439_s7 + $0x778] sm:$0xff] }
 0x49a   :  { %6665 = vmatpush2.bf16.msra.mxu0 %v8227_v50  ;;  %v4395_v50 = vld [vmem:[%s12439_s7 + $0x58] sm:$0xff] }
 0x49b   :  { %6688 = vmatpush1.bf16.msra.mxu1 %v8299_v15  ;;  %6666 = vmatprep.subr.bf16.mxu0 %v8220_v16  ;;  %v4531_v15 = vld [vmem:[%s12439_s7 + $0x498] sm:$0xff]  ;;  %v8038_v17 = vcombine.high %v4395_v50, %v4399_v9  ;;  %v8037_v28 = vcombine.low %v4395_v50, %v4399_v9 }
 0x49c   :  { %6689 = vmatprep.subr.bf16.mxu1 %v8292_v57  ;;  %v4535_v16 = vld [vmem:[%s12439_s7 + $0x4b8] sm:$0xff]  ;;  %v8045_v57 = vcombine.low %v4403_v1, %v4407_v2 }
 0x49d   :  { %v8174_v19 = vcombine.high %v4531_v15, %v4535_v16  ;;  %v8173_v29 = vcombine.low %v4531_v15, %v4535_v16  ;;  %v4619_v2 = vld [vmem:[%s12439_s7 + $0x758] sm:$0xff] }
 0x49e   :  { %6667 = vmatpush2.bf16.msra.mxu0 %v8219_v20  ;;  %v4387_v20 = vld [vmem:[%s12439_s7 + $0x18] sm:$0xff]  ;;  %v8262_v9 = vcombine.high %v4619_v2, %v4623_v3 }
 0x49f   :  { %6690 = vmatpush1.bf16.msra.mxu1 %v8291_v22  ;;  %6718 = vmatprep.subr.bf16.mxu0 %v8086_v24  ;;  %v4391_v22 = vld [vmem:[%s12439_s7 + $0x38] sm:$0xff] }
 0x4a0   :  { %6691 = vmatprep.subr.bf16.mxu1 %v8284_v27  ;;  %v4523_v24 = vld [vmem:[%s12439_s7 + $0x458] sm:$0xff]  ;;  %v8030_v30 = vcombine.high %v4387_v20, %v4391_v22  ;;  %v8029_v49 = vcombine.low %v4387_v20, %v4391_v22  ;;  %v8261_v20 = vcombine.low %v4619_v2, %v4623_v3 }
 0x4a1   :  { %6669 = vmatmul.mubr.bf16.vlgmr.msra.gmra.mxu0 %v11462_v13  ;;  %v4527_v27 = vld [vmem:[%s12439_s7 + $0x478] sm:$0xff] }
 0x4a2   :  { %6719 = vmatpush1.bf16.msra.mxu0 %v8085_v39  ;;  %6750 = vmatprep.mubr.bf16.mxu0 %v11397_v10  ;;  %v4559_v10 = vld [vmem:[%s12439_s7 + $0x578] sm:$0xff]  ;;  %v8166_v38 = vcombine.high %v4523_v24, %v4527_v27  ;;  %v8165_v37 = vcombine.low %v4523_v24, %v4527_v27 }
 0x4a3   :  { %6692 = vmatpush1.bf16.msra.mxu1 %v8283_v58  ;;  %6720 = vmatprep.subr.bf16.mxu0 %v8078_v23  ;;  %v8198_v53 = vcombine.high %v4555_v47, %v4559_v10  ;;  %v8197_v55 = vcombine.low %v4555_v47, %v4559_v10  ;;  %v4507_v39 = vld [vmem:[%s12439_s7 + $0x3d8] sm:$0xff] }
 0x4a4   :  { %6759 = vmatprep.subr.bf16.mxu1 %v8214_v32  ;;  %v4511_v58 = vld [vmem:[%s12439_s7 + $0x3f8] sm:$0xff] }
 0x4a5   :  { %v4515_v23 = vld [vmem:[%s12439_s7 + $0x418] sm:$0xff]  ;;  %v8150_v52 = vcombine.high %v4507_v39, %v4511_v58  ;;  %v8149_v44 = vcombine.low %v4507_v39, %v4511_v58 }
 0x4a6   :  { %8348 = vmatmul.mubr.msk.bf16.vlgmr.msra.gmra.mxu1 %vm3281_vm3, %v11482_v14  ;;  %6721 = vmatpush1.bf16.msra.mxu0 %v8077_v35  ;;  %v4519_v32 = vld [vmem:[%s12439_s7 + $0x438] sm:$0xff] }
 0x4a7   :  { %6760 = vmatpush1.bf16.msra.mxu1 %v8213_v21  ;;  %6791 = vmatprep.mubr.bf16.mxu1 %v11459_v7  ;;  %v4551_v7 = vld [vmem:[%s12439_s7 + $0x538] sm:$0xff]  ;;  %v8158_v33 = vcombine.high %v4515_v23, %v4519_v32  ;;  %v8157_v46 = vcombine.low %v4515_v23, %v4519_v32 }
 0x4a8   :  { %6722 = vmatprep.subr.bf16.mxu0 %v8070_v36  ;;  %6761 = vmatprep.subr.bf16.mxu1 %v8206_v42  ;;  %v8190_v0 = vcombine.high %v4547_v60, %v4551_v7  ;;  %v8189_v51 = vcombine.low %v4547_v60, %v4551_v7  ;;  %v4499_v35 = vld [vmem:[%s12439_s7 + $0x398] sm:$0xff] }
 0x4a9   :  { %v4503_v21 = vld [vmem:[%s12439_s7 + $0x3b8] sm:$0xff] }
 0x4aa   :  { %6723 = vmatpush1.bf16.msra.mxu0 %v8069_v48  ;;  %v4635_v36 = vld [vmem:[%s12439_s7 + $0x7d8] sm:$0xff]  ;;  %v8142_v47 = vcombine.high %v4499_v35, %v4503_v21  ;;  %v8141_v54 = vcombine.low %v4499_v35, %v4503_v21 }
 0x4ab   :  { %6762 = vmatpush1.bf16.msra.mxu1 %v8205_v31  ;;  %6724 = vmatprep.subr.bf16.mxu0 %v8062_v45  ;;  %v4639_v42 = vld [vmem:[%s12439_s7 + $0x7f8] sm:$0xff] }
 0x4ac   :  { %6763 = vmatprep.subr.bf16.mxu1 %v8198_v53  ;;  %v8278_v10 = vcombine.high %v4635_v36, %v4639_v42  ;;  %v4491_v48 = vld [vmem:[%s12439_s7 + $0x358] sm:$0xff]  ;;  %v8277_v7 = vcombine.low %v4635_v36, %v4639_v42  ;;  %v12138_v42 = vld [vmem:[%s12442_s8] sm:$0xff] }
 0x4ad   :  { %v4495_v31 = vld [vmem:[%s12439_s7 + $0x378] sm:$0xff] }
 0x4ae   :  { %6725 = vmatpush1.bf16.msra.mxu0 %v8061_v40  ;;  %v4627_v53 = vld [vmem:[%s12439_s7 + $0x798] sm:$0xff]  ;;  %v8134_v40 = vcombine.high %v4491_v48, %v4495_v31 }
 0x4af   :  { %6764 = vmatpush1.bf16.msra.mxu1 %v8197_v55  ;;  %6726 = vmatprep.subr.bf16.mxu0 %v8054_v61  ;;  %v8270_v55 = vcombine.high %v4627_v53, %v4631_v62  ;;  %v4483_v61 = vld [vmem:[%s12439_s7 + $0x318] sm:$0xff] }
 0x4b0   :  { %6765 = vmatprep.subr.bf16.mxu1 %v8190_v0  ;;  %v4487_v0 = vld [vmem:[%s12439_s7 + $0x338] sm:$0xff] }
 0x4b1   :  { %v4475_v15 = vld [vmem:[%s12439_s7 + $0x2d8] sm:$0xff] }
 0x4b2   :  { %6727 = vmatpush1.bf16.msra.mxu0 %v8053_v6  ;;  %v8133_v6 = vcombine.low %v4491_v48, %v4495_v31  ;;  %v4479_v16 = vld [vmem:[%s12439_s7 + $0x2f8] sm:$0xff] }
 0x4b3   :  { %6766 = vmatpush1.bf16.msra.mxu1 %v8189_v51  ;;  %6728 = vmatprep.subr.bf16.mxu0 %v8046_v12  ;;  %v8269_v12 = vcombine.low %v4627_v53, %v4631_v62  ;;  %v8118_v22 = vcombine.high %v4475_v15, %v4479_v16  ;;  %v8117_v39 = vcombine.low %v4475_v15, %v4479_v16  ;;  %v4587_v48 = vld [vmem:[%s12439_s7 + $0x658] sm:$0xff] }
 0x4b4   :  { %6767 = vmatprep.subr.bf16.mxu1 %v8182_v8  ;;  %v8126_v8 = vcombine.high %v4483_v61, %v4487_v0  ;;  %v4591_v31 = vld [vmem:[%s12439_s7 + $0x678] sm:$0xff] }
 0x4b5   :  { %v9350_v16 = vld [vmem:[%s12441_s9 + $0x78] sm:$0xff]  }
 0x4b6   :  { %6729 = vmatpush1.bf16.msra.mxu0 %v8045_v57  ;;  %v4611_v57 = vld [vmem:[%s12439_s7 + $0x718] sm:$0xff] }
 0x4b7   :  { %6768 = vmatpush1.bf16.msra.mxu1 %v8181_v59  ;;  %6730 = vmatprep.subr.bf16.mxu0 %v8038_v17  ;;  %v4615_v59 = vld [vmem:[%s12439_s7 + $0x738] sm:$0xff] }
 0x4b8   :  { %6769 = vmatprep.subr.bf16.mxu1 %v8174_v19  ;;  %v8125_v19 = vcombine.low %v4483_v61, %v4487_v0  ;;  %v8254_v27 = vcombine.high %v4611_v57, %v4615_v59  ;;  %v8253_v58 = vcombine.low %v4611_v57, %v4615_v59  ;;  %v4583_v61 = vld [vmem:[%s12439_s7 + $0x638] sm:$0xff] }
 0x4b9   :  { %v4687_v59 = vld [vmem:[%s12439_s7 + $0x978] sm:$0xff] }
 0x4ba   :  { %6731 = vmatpush1.bf16.msra.mxu0 %v8037_v28  ;;  %v4467_v28 = vld [vmem:[%s12439_s7 + $0x298] sm:$0xff] }
 0x4bb   :  { %6770 = vmatpush1.bf16.msra.mxu1 %v8173_v29  ;;  %6732 = vmatprep.subr.bf16.mxu0 %v8030_v30  ;;  %v4471_v29 = vld [vmem:[%s12439_s7 + $0x2b8] sm:$0xff] }
 0x4bc   :  { %6771 = vmatprep.subr.bf16.mxu1 %v8166_v38  ;;  %v4603_v30 = vld [vmem:[%s12439_s7 + $0x6d8] sm:$0xff]  ;;  %v8110_v23 = vcombine.high %v4467_v28, %v4471_v29  ;;  %v8109_v35 = vcombine.low %v4467_v28, %v4471_v29  ;;  %v9353_v29 = vld [vmem:[%s12441_s9 + $0x30] sm:$0xff]  }
 0x4bd   :  { %v4607_v38 = vld [vmem:[%s12439_s7 + $0x6f8] sm:$0xff] }
 0x4be   :  { %6733 = vmatpush1.bf16.msra.mxu0 %v8029_v49  ;;  %v8246_v32 = vcombine.high %v4603_v30, %v4607_v38  ;;  %v4459_v49 = vld [vmem:[%s12439_s7 + $0x258] sm:$0xff]  ;;  %v8245_v21 = vcombine.low %v4603_v30, %v4607_v38  ;;  %v9354_v38 = vld [vmem:[%s12441_s9 + $0x68] sm:$0xff]  }
 0x4bf   :  { %6772 = vmatpush1.bf16.msra.mxu1 %v8165_v37  ;;  %6734 = vmatprep.subr.bf16.mxu0 %v8150_v52  ;;  %v4463_v37 = vld [vmem:[%s12439_s7 + $0x278] sm:$0xff] }
 0x4c0   :  { %6773 = vmatprep.subr.bf16.mxu1 %v8158_v33  ;;  %v4595_v52 = vld [vmem:[%s12439_s7 + $0x698] sm:$0xff]  ;;  %v8102_v36 = vcombine.high %v4459_v49, %v4463_v37  ;;  %v8101_v53 = vcombine.low %v4459_v49, %v4463_v37  ;;  %v9356_v49 = vld [vmem:[%s12441_s9 + $0x60] sm:$0xff]  }
 0x4c1   :  { %v12073_v45 = vpop.f32.mrf.mxu0  ;;  %v4599_v33 = vld [vmem:[%s12439_s7 + $0x6b8] sm:$0xff] }
 0x4c2   :  { %6735 = vmatpush2.bf16.msra.mxu0 %v8149_v44  ;;  %v8238_v44 = vcombine.high %v4595_v52, %v4599_v33  ;;  %v8237_v62 = vcombine.low %v4595_v52, %v4599_v33  ;;  %v4659_v37 = vld [vmem:[%s12439_s7 + $0x898] sm:$0xff] }
 0x4c3   :  { %6774 = vmatpush1.bf16.msra.mxu1 %v8157_v46  ;;  %v12081_v60 = vpop.f32.mrf.mxu0  ;;  %6736 = vmatprep.subr.bf16.mxu0 %v8142_v47  ;;  %v4451_v46 = vld [vmem:[%s12439_s7 + $0x218] sm:$0xff] }
 0x4c4   :  { %6775 = vmatprep.subr.bf16.mxu1 %v8278_v10  ;;  %v4455_v47 = vld [vmem:[%s12439_s7 + $0x238] sm:$0xff]  ;;  %v4709_v10 = vrot.slane %v12138_v42, %v10483_v43 }
 0x4c5   :  { %v6428_v1 = vpop.f32.mrf.mxu0  ;;  %v4699_v43 = vld [vmem:[%s12439_s7 + $0x9d8] sm:$0x77]  ;;  %v8093_v0 = vcombine.low %v4451_v46, %v4455_v47 }
 0x4c6   :  { %6737 = vmatpush2.bf16.msra.mxu0 %v8141_v54  ;;  %v12095_v4 = vpop.f32.mrf.mxu1  ;;  %v8094_v54 = vcombine.high %v4451_v46, %v4455_v47  ;;  %v8229_v1 = vcombine.low %v4587_v48, %v4591_v31  ;;  %v8342_v3 = vcombine.high %v4699_v43, %v4699_v43  ;;  %v4663_v52 = vld [vmem:[%s12439_s7 + $0x8b8] sm:$0xff] }
 0x4c7   :  { %6776 = vmatpush2.bf16.msra.mxu1 %v8277_v7  ;;  %v6429_v51 = vpop.f32.mrf.mxu0  ;;  %6738 = vmatprep.subr.bf16.mxu0 %v8134_v40  ;;  %v8230_v7 = vcombine.high %v4587_v48, %v4591_v31  ;;  %v6386_v40 = vadd.f32 %v11861_v56, %v4709_v10  ;;  %v4691_v56 = vld [vmem:[%s12439_s7 + $0x998] sm:$0xff]  ;;  %v8301_v47 = vcombine.low %v4659_v37, %v4663_v52 }
 0x4c8   :  { %v12097_v50 = vpop.f32.mrf.mxu1  ;;  %6777 = vmatprep.subr.bf16.mxu1 %v8270_v55  ;;  %v4579_v55 = vld [vmem:[%s12439_s7 + $0x618] sm:$0xff]  ;;  %v4705_v31 = vrot.slane %v12138_v42, %v10318_v41  ;;  %v9361_v41 = vld [vmem:[%s12441_s9 + $0x10] sm:$0xff]  }
 0x4c9   :  { %v6427_v2 = vadd.f32 %v12081_v60, %v6386_v40  ;;  %v8222_v51 = vcombine.high %v4579_v55, %v4583_v61  ;;  %v8221_v60 = vcombine.low %v4579_v55, %v4583_v61  ;;  %v4655_v46 = vld [vmem:[%s12439_s7 + $0x878] sm:$0xff]  ;;  %v9362_v55 = vld [vmem:[%s12441_s9 + $0x48] sm:$0xff]  }
 0x4ca   :  { %6739 = vmatpush2.bf16.msra.mxu0 %v8133_v6  ;;  %v6469_v17 = vpop.f32.mrf.mxu1  ;;  %v8341_v6 = vcombine.low %v4699_v43, %v4699_v43  ;;  %v9359_v10 = vld [vmem:[%s12441_s9 + $0x18] sm:$0xff]   ;;  %v6384_v40 = vadd.f32 %v11850_v63, %v4705_v31  ;;  %v9397_v31 = vld [vmem:[%s12441_s9 + $0x100] sm:$0xff]  }
 0x4cb   :  { %6778 = vmatpush2.bf16.msra.mxu1 %v8269_v12  ;;  %6740 = vmatprep.subr.bf16.mxu0 %v8126_v8  ;;  %v4695_v12 = vld [vmem:[%s12439_s7 + $0x9b8] sm:$0xff]  ;;  %v6468_v8 = vadd.f32 %v12097_v50, %v6427_v2 }
 0x4cc   :  { %v6470_v24 = vpop.f32.mrf.mxu1  ;;  %6779 = vmatprep.subr.bf16.mxu1 %v8262_v9  ;;  %v6344_v9 = vsel %vm3285_vm1, %v8341_v6, 0  ;;  %v8334_v15 = vcombine.high %v4691_v56, %v4695_v12  ;;  %v4683_v50 = vld [vmem:[%s12439_s7 + $0x958] sm:$0xff]  ;;  %v8333_v17 = vcombine.low %v4691_v56, %v4695_v12  ;;  %v6425_v61 = vadd.f32 %v12073_v45, %v6384_v40  ;;  %v9365_v6 = vld [vmem:[%s12441_s9] sm:$0xff]  }
 0x4cd   :  { %v6842_v57 = vmax.f32 %v6468_v8, 0.0  ;;  %v4679_v24 = vld [vmem:[%s12439_s7 + $0x938] sm:$0xff]  ;;  %v8325_v28 = vcombine.low %v4683_v50, %v4687_v59  ;;  %v9369_v8 = vld [vmem:[%s12441_s9 + $0xb0] sm:$0xff]  }
 0x4ce   :  { %6741 = vmatpush2.bf16.msra.mxu0 %v8125_v19  ;;  %v9351_v19 = vld [vmem:[%s12441_s9 + $0x38] sm:$0xff]   ;;  %v6466_v63 = vadd.f32 %v12095_v4, %v6425_v61  ;;  %v9368_v4 = vld [vmem:[%s12441_s9 + $0xf0] sm:$0xff]  }
 0x4cf   :  { %6780 = vmatpush2.bf16.msra.mxu1 %v8261_v20  ;;  %6742 = vmatprep.subr.bf16.mxu0 %v8118_v22  ;;  %v9352_v20 = vld [vmem:[%s12441_s9 + $0x70] sm:$0xff]   ;;  %v4675_v22 = vld [vmem:[%s12439_s7 + $0x918] sm:$0xff] }
 0x4d0   :  { %6781 = vmatprep.subr.bf16.mxu1 %v8254_v27  ;;  %v6850_v27 = vpack.c.bf16 %v6842_v57, %v6842_v57  ;;  %v8318_v30 = vcombine.high %v4675_v22, %v4679_v24  ;;  %v9366_v2 = vld [vmem:[%s12441_s9 + $0xf8] sm:$0xff]  }
 0x4d1   :  { %v9367_v45 = vld [vmem:[%s12441_s9 + $0xb8] sm:$0xff]  }
 0x4d2   :  { %6743 = vmatpush2.bf16.msra.mxu0 %v8117_v39  ;;  %v4667_v39 = vld [vmem:[%s12439_s7 + $0x8d8] sm:$0xff] }
 0x4d3   :  { %6782 = vmatpush2.bf16.msra.mxu1 %v8253_v58  ;;  %6744 = vmatprep.subr.bf16.mxu0 %v8110_v23  ;;  %v8317_v58 = vcombine.low %v4675_v22, %v4679_v24  ;;  %v9355_v23 = vld [vmem:[%s12441_s9 + $0x28] sm:$0xff]   ;;  %v9382_v56 = vld [vmem:[%s12441_s9 + $0x178] sm:$0xff]  }
 0x4d4   :  { %6783 = vmatprep.subr.bf16.mxu1 %v8246_v32  ;;  %v9386_v22 = vld [vmem:[%s12441_s9 + $0x168] sm:$0xff]  }
 0x4d6   :  { %6745 = vmatpush2.bf16.msra.mxu0 %v8109_v35  ;;  %v9357_v35 = vld [vmem:[%s12441_s9 + $0x20] sm:$0xff]  }
 0x4d7   :  { %6784 = vmatpush2.bf16.msra.mxu1 %v8245_v21  ;;  %6746 = vmatprep.subr.bf16.mxu0 %v8102_v36  ;;  %v8302_v21 = vcombine.high %v4659_v37, %v4663_v52  ;;  %v9358_v36 = vld [vmem:[%s12441_s9 + $0x58] sm:$0xff]   ;;  %v9392_v52 = vld [vmem:[%s12441_s9 + $0x150] sm:$0xff]  }
 0x4d8   :  { %6785 = vmatprep.subr.bf16.mxu1 %v8238_v44  ;;  %v4651_v44 = vld [vmem:[%s12439_s7 + $0x858] sm:$0xff] }
 0x4d9   :  { %v8294_v48 = vcombine.high %v4651_v44, %v4655_v46  ;;  %v9391_v37 = vld [vmem:[%s12441_s9 + $0x118] sm:$0xff]  }
 0x4da   :  { %6747 = vmatpush2.bf16.msra.mxu0 %v8101_v53  ;;  %v9360_v53 = vld [vmem:[%s12441_s9 + $0x50] sm:$0xff]  }
 0x4db   :  { %6786 = vmatpush2.bf16.msra.mxu1 %v8237_v62  ;;  %6748 = vmatprep.subr.bf16.mxu0 %v8094_v54  ;;  %v4643_v62 = vld [vmem:[%s12439_s7 + $0x818] sm:$0xff] }
 0x4dc   :  { %6787 = vmatprep.subr.bf16.mxu1 %v8230_v7  ;;  %v4647_v54 = vld [vmem:[%s12439_s7 + $0x838] sm:$0xff]  ;;  %v8293_v7 = vcombine.low %v4651_v44, %v4655_v46  ;;  %v4713_v44 = vrot.slane %v12138_v42, %v10724_v25  ;;  %v9381_v46 = vld [vmem:[%s12441_s9 + $0x80] sm:$0xff]  }
 0x4dd   :  { %v8286_v43 = vcombine.high %v4643_v62, %v4647_v54 }
 0x4de   :  { %6749 = vmatpush2.bf16.msra.mxu0 %v8093_v0  ;;  %v8285_v0 = vcombine.low %v4643_v62, %v4647_v54 }
 0x4df   :  { %6788 = vmatpush2.bf16.msra.mxu1 %v8229_v1  ;;  %8349 = vmatprep.subr.msk.bf16.mxu0 %vm3285_vm1, %v8342_v3  ;;  %v9363_v1 = vld [vmem:[%s12441_s9 + $0x8] sm:$0xff]   ;;  %v9364_v3 = vld [vmem:[%s12441_s9 + $0x40] sm:$0xff]  }
 0x4e0   :  { %6789 = vmatprep.subr.bf16.mxu1 %v8222_v51  ;;  %v6841_v51 = vmax.f32 %v6466_v63, 0.0 }
 0x4e1   :  { %6751 = vmatmul.mubr.bf16.vlgmr.msra.gmra.mxu0 %v11399_v11  ;;  %v8326_v11 = vcombine.high %v4683_v50, %v4687_v59  ;;  %v9371_v59 = vld [vmem:[%s12441_s9 + $0xa8] sm:$0xff]  }
 0x4e2   :  { %6801 = vmatpush1.bf16.msra.mxu0 %v6344_v9  ;;  %6832 = vmatprep.mubr.bf16.mxu0 %v9413_v5  ;;  %v9370_v9 = vld [vmem:[%s12441_s9 + $0xe8] sm:$0xff]  }
 0x4e3   :  { %6790 = vmatpush2.bf16.msra.mxu1 %v8221_v60  ;;  %6802 = vmatprep.subr.bf16.mxu0 %v8334_v15  ;;  %v9383_v15 = vld [vmem:[%s12441_s9 + $0x138] sm:$0xff]  }
 0x4e4   :  { %8556 = vmatprep.subr.bf16.mxu1 %v9350_v16  ;;  %v6849_v16 = vpack.c.bf16 %v6841_v51, %v6841_v51  ;;  %v9403_v51 = vld [vmem:[%s12441_s9 + $0x190] sm:$0xff]  }
 0x4e6   :  { %6792 = vmatmul.mubr.bf16.vlgmr.msra.gmra.mxu1 %v11462_v13  ;;  %6803 = vmatpush1.bf16.msra.mxu0 %v8333_v17  ;;  %v4671_v13 = vld [vmem:[%s12439_s7 + $0x8f8] sm:$0xff] }
 0x4e7   :  { %8557 = vmatpush3.bf16.msra.mxu1 %v9351_v19  ;;  %7364 = vmatprep.mubr.bf16.mxu1 %v6850_v27  ;;  %v8310_v32 = vcombine.high %v4667_v39, %v4671_v13  ;;  %v8309_v33 = vcombine.low %v4667_v39, %v4671_v13  ;;  %v9372_v19 = vld [vmem:[%s12441_s9 + $0xe0] sm:$0xff]   ;;  %v9375_v39 = vld [vmem:[%s12441_s9 + $0x98] sm:$0xff]   ;;  %v9376_v13 = vld [vmem:[%s12441_s9 + $0xd0] sm:$0xff]  }
 0x4e8   :  { %6804 = vmatprep.subr.bf16.mxu0 %v8326_v11  ;;  %8558 = vmatprep.subr.bf16.mxu1 %v9352_v20  ;;  %v9385_v11 = vld [vmem:[%s12441_s9 + $0x130] sm:$0xff]   ;;  %v9373_v27 = vld [vmem:[%s12441_s9 + $0xa0] sm:$0xff]  }
 0x4ea   :  { %6805 = vmatpush1.bf16.msra.mxu0 %v8325_v28  ;;  %v9374_v28 = vld [vmem:[%s12441_s9 + $0xd8] sm:$0xff]  }
 0x4eb   :  { %8559 = vmatpush3.bf16.msra.mxu1 %v9353_v29  ;;  %6806 = vmatprep.subr.bf16.mxu0 %v8318_v30  ;;  %v9387_v29 = vld [vmem:[%s12441_s9 + $0x128] sm:$0xff]  }
 0x4ec   :  { %8560 = vmatprep.subr.bf16.mxu1 %v9354_v38  ;;  %v9388_v38 = vld [vmem:[%s12441_s9 + $0x160] sm:$0xff]  }
 0x4ee   :  { %6807 = vmatpush1.bf16.msra.mxu0 %v8317_v58  ;;  %v9389_v58 = vld [vmem:[%s12441_s9 + $0x120] sm:$0xff]  }
 0x4ef   :  { %8561 = vmatpush3.bf16.msra.mxu1 %v9355_v23  ;;  %6808 = vmatprep.subr.bf16.mxu0 %v8310_v32  ;;  %v9390_v23 = vld [vmem:[%s12441_s9 + $0x158] sm:$0xff]   ;;  %v9377_v32 = vld [vmem:[%s12441_s9 + $0x90] sm:$0xff]  }
 0x4f0   :  { %8562 = vmatprep.subr.bf16.mxu1 %v9356_v49  ;;  %v9378_v49 = vld [vmem:[%s12441_s9 + $0xc8] sm:$0xff]  }
 0x4f2   :  { %6809 = vmatpush1.bf16.msra.mxu0 %v8309_v33  ;;  %v9379_v33 = vld [vmem:[%s12441_s9 + $0x88] sm:$0xff]  }
 0x4f3   :  { %8563 = vmatpush3.bf16.msra.mxu1 %v9357_v35  ;;  %6810 = vmatprep.subr.bf16.mxu0 %v8302_v21  ;;  %v9380_v35 = vld [vmem:[%s12441_s9 + $0xc0] sm:$0xff]   ;;  %v9393_v21 = vld [vmem:[%s12441_s9 + $0x110] sm:$0xff]  }
 0x4f4   :  { %8564 = vmatprep.subr.bf16.mxu1 %v9358_v36  ;;  %v9394_v36 = vld [vmem:[%s12441_s9 + $0x148] sm:$0xff]  }
 0x4f6   :  { %6811 = vmatpush1.bf16.msra.mxu0 %v8301_v47  ;;  %v9395_v47 = vld [vmem:[%s12441_s9 + $0x108] sm:$0xff]  }
 0x4f7   :  { %8565 = vmatpush3.bf16.msra.mxu1 %v9359_v10  ;;  %6812 = vmatprep.subr.bf16.mxu0 %v8294_v48  ;;  %v4717_v10 = vrot.slane %v12138_v42, %v10727_v26  ;;  %v9396_v48 = vld [vmem:[%s12441_s9 + $0x140] sm:$0xff]  }
 0x4f8   :  { %8566 = vmatprep.subr.bf16.mxu1 %v9360_v53 }
 0x4fa   :  { %6813 = vmatpush1.bf16.msra.mxu0 %v8293_v7 }
 0x4fb   :  { %8567 = vmatpush3.bf16.msra.mxu1 %v9361_v41  ;;  %6814 = vmatprep.subr.bf16.mxu0 %v8286_v43 }
 0x4fc   :  { %8568 = vmatprep.subr.bf16.mxu1 %v9362_v55 }
 0x4fe   :  { %6815 = vmatpush1.bf16.msra.mxu0 %v8285_v0 }
 0x4ff   :  { %8569 = vmatpush3.bf16.msra.mxu1 %v9363_v1  ;;  %8578 = vmatprep.subr.bf16.mxu0 %v9366_v2  ;;  %v9398_v2 = vld [vmem:[%s12441_s9 + $0x1b8] sm:$0xff]  }
 0x500   :  { %8570 = vmatprep.subr.bf16.mxu1 %v9364_v3  ;;  %v9399_v3 = vld [vmem:[%s12441_s9 + $0x1b0] sm:$0xff]  }
 0x501   :  { %v12278_v12 = vpop.f32.mrf.mxu0  ;;  %8350 = vmatmul.mubr.msk.bf16.vlgmr.msra.gmra.mxu0 %vm3281_vm3, %v11482_v14  ;;  %v9384_v14 = vld [vmem:[%s12441_s9 + $0x170] sm:$0xff]  }
 0x502   :  { %8579 = vmatpush3.bf16.msra.mxu0 %v9367_v45  ;;  %v6507_v25 = vadd.f32 %v12278_v12, %v4713_v44  ;;  %v9400_v45 = vld [vmem:[%s12441_s9 + $0x1a8] sm:$0xff]   ;;  %v9405_v12 = vld [vmem:[%s12441_s9 + $0x180] sm:$0xff]  }
 0x503   :  { %v12285_v60 = vpop.f32.mrf.mxu0  ;;  %8571 = vmatpush3.bf16.msra.mxu1 %v9365_v6  ;;  %8580 = vmatprep.subr.bf16.mxu0 %v9368_v4  ;;  %v9401_v6 = vld [vmem:[%s12441_s9 + $0x1a0] sm:$0xff]   ;;  %v9402_v4 = vld [vmem:[%s12441_s9 + $0x198] sm:$0xff]  }
 0x504   :  { %8600 = vmatprep.subr.bf16.mxu1 %v9382_v56  ;;  %v6509_v53 = vadd.f32 %v12285_v60, %v4717_v10  ;;  %v9404_v56 = vld [vmem:[%s12441_s9 + $0x188] sm:$0xff]   ;;  %v16_v10 = vstv %s12443_s10 }
 0x505   :  { %v6510_v57 = vpop.f32.mrf.mxu0  ;;  %17 = vst [vmem:[#allocation2] sm:$0x1] %v16_v10 }
 0x506   :  { %v6547_v50 = vpop.f32.mrf.mxu1  ;;  %7365 = vmatmul.mubr.bf16.vlgmr.msra.gmra.mxu1 %v6849_v16  ;;  %8581 = vmatpush3.bf16.msra.mxu0 %v9369_v8  ;;  %v9408_v57 = vld [vmem:[%s12441_s9 + $0x1c0] sm:$0xff]  }
 0x507   :  { %v6511_v17 = vpop.f32.mrf.mxu0  ;;  %8582 = vmatprep.subr.bf16.mxu0 %v9370_v9  ;;  %8601 = vmatpush3.bf16.msra.mxu1 %v9383_v15  ;;  %v6548_v62 = vadd.f32 %v6547_v50, %v6507_v25  ;;  %v9406_v9 = vld [vmem:[%s12441_s9 + $0x1d0] sm:$0xff]   ;;  %v4724_v50 = vsub.s32 5, %v10298_v34 }
 0x508   :  { %v6549_v20 = vpop.f32.mrf.mxu1  ;;  %8602 = vmatprep.subr.bf16.mxu1 %v9384_v14  ;;  %v9407_v14 = vld [vmem:[%s12441_s9 + $0x1c8] sm:$0xff]  }
 0x509   :  { %v6550_v54 = vadd.f32 %v6549_v20, %v6509_v53  ;;  %v4725_v17 = vrot.slane %v12138_v42, %v4724_v50 }
 0x50a   :  { %v6551_v24 = vpop.f32.mrf.mxu1  ;;  %8583 = vmatpush3.bf16.msra.mxu0 %v9371_v59  ;;  %v4721_v59 = vrot.slane %v12138_v42, %v10810_v18 }
 0x50b   :  { %8584 = vmatprep.subr.bf16.mxu0 %v9372_v19  ;;  %8603 = vmatpush3.bf16.msra.mxu1 %v9385_v11 }
 0x50c   :  { %v6552_v30 = vpop.f32.mrf.mxu1  ;;  %8604 = vmatprep.subr.bf16.mxu1 %v9386_v22 }
 0x50e   :  { %8585 = vmatpush3.bf16.msra.mxu0 %v9373_v27 }
 0x50f   :  { %8586 = vmatprep.subr.bf16.mxu0 %v9374_v28  ;;  %8605 = vmatpush3.bf16.msra.mxu1 %v9387_v29 }
 0x510   :  { %8606 = vmatprep.subr.bf16.mxu1 %v9388_v38 }
 0x512   :  { %8587 = vmatpush3.bf16.msra.mxu0 %v9375_v39 }
 0x513   :  { %8588 = vmatprep.subr.bf16.mxu0 %v9376_v13  ;;  %8607 = vmatpush3.bf16.msra.mxu1 %v9389_v58 }
 0x514   :  { %8608 = vmatprep.subr.bf16.mxu1 %v9390_v23 }
 0x516   :  { %8589 = vmatpush3.bf16.msra.mxu0 %v9377_v32 }
 0x517   :  { %8590 = vmatprep.subr.bf16.mxu0 %v9378_v49  ;;  %8609 = vmatpush3.bf16.msra.mxu1 %v9391_v37 }
 0x518   :  { %8610 = vmatprep.subr.bf16.mxu1 %v9392_v52 }
 0x51a   :  { %8591 = vmatpush3.bf16.msra.mxu0 %v9379_v33 }
 0x51b   :  { %8592 = vmatprep.subr.bf16.mxu0 %v9380_v35  ;;  %8611 = vmatpush3.bf16.msra.mxu1 %v9393_v21 }
 0x51c   :  { %8612 = vmatprep.subr.bf16.mxu1 %v9394_v36 }
 0x51e   :  { %8593 = vmatpush3.bf16.msra.mxu0 %v9381_v46 }
 0x51f   :  { %8613 = vmatpush3.bf16.msra.mxu1 %v9395_v47  ;;  %7452 = vmatprep.subr.bf16.mxu0 %v9413_v5  ;;  %v4728_v47 = vsub.s32 6, %v10298_v34 }
 0x520   :  { %8614 = vmatprep.subr.bf16.mxu1 %v9396_v48  ;;  %v4732_v48 = vsub.s32 7, %v10298_v34 }
 0x521   :  { %v6588_v26 = vpop.f32.mrf.mxu0  ;;  %v4729_v25 = vrot.slane %v12138_v42, %v4728_v47 }
 0x522   :  { %v6589_v7 = vadd.f32 %v6588_v26, %v6548_v62 }
 0x523   :  { %v6590_v41 = vpop.f32.mrf.mxu0  ;;  %8615 = vmatpush3.bf16.msra.mxu1 %v9397_v31  ;;  %v4733_v31 = vrot.slane %v12138_v42, %v4732_v48 }
 0x524   :  { %v6591_v43 = vadd.f32 %v6590_v41, %v6550_v54  ;;  %v6843_v40 = vmax.f32 %v6589_v7, 0.0 }
 0x525   :  { %v6592_v55 = vpop.f32.mrf.mxu0 }
 0x526   :  { %v6844_v61 = vmax.f32 %v6591_v43, 0.0  ;;  %v6851_v63 = vpack.c.bf16 %v6843_v40, %v6843_v40 }
 0x527   :  { %v6593_v0 = vpop.f32.mrf.mxu0 }
 0x528   :  { %v6852_v1 = vpack.c.bf16 %v6844_v61, %v6844_v61 }
 0x52a   :  { %7404 = vmatprep.mubr.bf16.mxu0 %v6852_v1 }
 0x52b   :  { %7405 = vmatmul.mubr.bf16.vlgmr.msra.gmra.mxu0 %v6851_v63 }
 0x52c   :  { %7453 = vmatpush1.bf16.msra.mxu0 %v9398_v2 }
 0x52d   :  { %7454 = vmatprep.subr.bf16.mxu0 %v9413_v5 }
 0x530   :  { %7455 = vmatpush1.bf16.msra.mxu0 %v9399_v3 }
 0x531   :  { %7456 = vmatprep.subr.bf16.mxu0 %v9413_v5 }
 0x534   :  { %7457 = vmatpush1.bf16.msra.mxu0 %v9400_v45 }
 0x535   :  { %7458 = vmatprep.subr.bf16.mxu0 %v9413_v5 }
 0x538   :  { %7459 = vmatpush1.bf16.msra.mxu0 %v9401_v6 }
 0x539   :  { %7460 = vmatprep.subr.bf16.mxu0 %v9413_v5 }
 0x53c   :  { %7461 = vmatpush1.bf16.msra.mxu0 %v9402_v4 }
 0x53d   :  { %7462 = vmatprep.subr.bf16.mxu0 %v9413_v5 }
 0x540   :  { %7463 = vmatpush1.bf16.msra.mxu0 %v9403_v51 }
 0x541   :  { %7464 = vmatprep.subr.bf16.mxu0 %v9413_v5 }
 0x544   :  { %7465 = vmatpush1.bf16.msra.mxu0 %v9404_v56 }
 0x545   :  { %7466 = vmatprep.subr.bf16.mxu0 %v9413_v5 }
 0x546   :  { %v6629_v8 = vpop.f32.mrf.mxu1 }
 0x547   :  { %v6630_v11 = vadd.f32 %v6629_v8, %v4721_v59 }
 0x548   :  { %v6631_v60 = vpop.f32.mrf.mxu1  ;;  %7467 = vmatpush1.bf16.msra.mxu0 %v9405_v12 }
 0x549   :  { %7478 = vmatprep.subr.bf16.mxu0 %v9413_v5  ;;  %v6632_v22 = vadd.f32 %v6631_v60, %v4725_v17  ;;  %v8411_v17 = vld [vmem:[#allocation2] ss:$0 sm:$0xff] }
 0x54a   :  { %v6633_v15 = vpop.f32.mrf.mxu1 }
 0x54c   :  { %v6634_v16 = vpop.f32.mrf.mxu1  ;;  %7479 = vmatpush2.bf16.msra.mxu0 %v9406_v9 }
 0x54d   :  { %7480 = vmatprep.subr.bf16.mxu0 %v9413_v5 }
 0x550   :  { %7481 = vmatpush2.bf16.msra.mxu0 %v9407_v14 }
 0x551   :  { %7482 = vmatprep.subr.bf16.mxu0 %v9413_v5 }
 0x554   :  { %7483 = vmatpush2.bf16.msra.mxu0 %v9408_v57 }
 0x561   :  { %v6670_v19 = vpop.f32.mrf.mxu0 }
 0x562   :  { %v6671_v24 = vadd.f32 %v6670_v19, %v6630_v11 }
 0x563   :  { %v6672_v20 = vpop.f32.mrf.mxu0 }
 0x564   :  { %v6673_v29 = vadd.f32 %v6672_v20, %v6632_v22 }
 0x565   :  { %v6674_v27 = vpop.f32.mrf.mxu0 }
 0x566   :  { %v6711_v28 = vpop.f32.mrf.mxu1 }
 0x567   :  { %v6712_v30 = vadd.f32 %v6711_v28, %v6671_v24  ;;  %v6675_v38 = vpop.f32.mrf.mxu0 }
 0x568   :  { %v6713_v39 = vpop.f32.mrf.mxu1 }
 0x569   :  { %v6714_v5 = vadd.f32 %v6713_v39, %v6673_v29  ;;  %v6845_v13 = vmax.f32 %v6712_v30, 0.0 }
 0x56a   :  { %v6715_v58 = vpop.f32.mrf.mxu1 }
 0x56b   :  { %v6846_v23 = vmax.f32 %v6714_v5, 0.0  ;;  %v6853_v18 = vpack.c.bf16 %v6845_v13, %v6845_v13 }
 0x56c   :  { %v6716_v32 = vpop.f32.mrf.mxu1 }
 0x56d   :  { %v6854_v49 = vpack.c.bf16 %v6846_v23, %v6846_v23 }
 0x56f   :  { %7444 = vmatprep.mubr.bf16.mxu1 %v6854_v49 }
 0x570   :  { %7445 = vmatmul.mubr.bf16.vlgmr.msra.gmra.mxu1 %v6853_v18 }
 0x5a1   :  { %v6752_v37 = vpop.f32.mrf.mxu0 }
 0x5a2   :  { %v6753_v53 = vadd.f32 %v6752_v37, %v4729_v25 }
 0x5a3   :  { %v6754_v52 = vpop.f32.mrf.mxu0 }
 0x5a4   :  { %v6755_v62 = vadd.f32 %v6754_v52, %v4733_v31 }
 0x5a5   :  { %v6756_v33 = vpop.f32.mrf.mxu0 }
 0x5a6   :  { %v6793_v35 = vpop.f32.mrf.mxu1 }
 0x5a7   :  { %v6757_v21 = vpop.f32.mrf.mxu0  ;;  %v6794_v26 = vadd.f32 %v6793_v35, %v6753_v53 }
 0x5a8   :  { %v6795_v36 = vpop.f32.mrf.mxu1 }
 0x5a9   :  { %v6796_v7 = vadd.f32 %v6795_v36, %v6755_v62 }
 0x5aa   :  { %v6797_v44 = vpop.f32.mrf.mxu1 }
 0x5ac   :  { %v6798_v46 = vpop.f32.mrf.mxu1 }
 0x5c1   :  { %v6834_v54 = vpop.f32.mrf.mxu0 }
 0x5c2   :  { %v6835_v41 = vadd.f32 %v6834_v54, %v6794_v26 }
 0x5c3   :  { %v6836_v43 = vpop.f32.mrf.mxu0 }
 0x5c4   :  { %v6837_v40 = vadd.f32 %v6836_v43, %v6796_v7  ;;  %v6847_v55 = vmax.f32 %v6835_v41, 0.0 }
 0x5c5   :  { %v6838_v61 = vpop.f32.mrf.mxu0 }
 0x5c6   :  { %v6848_v0 = vmax.f32 %v6837_v40, 0.0  ;;  %v8572_v1 = vpop.f32.mrf.mxu1  ;;  %v6855_v3 = vpack.c.bf16 %v6847_v55, %v6847_v55 }
 0x5c7   :  { %v6839_v2 = vpop.f32.mrf.mxu0 }
 0x5c8   :  { %v6856_v63 = vpack.c.bf16 %v6848_v0, %v6848_v0  ;;  %v8573_v34 = vpop.f32.mrf.mxu1 }
 0x5c9   :  { %v8574_v45 = vadd.f32 %v8573_v34, %v8572_v1 }
 0x5ca   :  { %v8575_v6 = vpop.f32.mrf.mxu1  ;;  %8410 = vmatprep.mubr.msk.bf16.mxu0 %vm1972_vm0, %v6856_v63 }
 0x5cb   :  { %7485 = vmatmul.mubr.bf16.vlgmr.msra.gmra.mxu0 %v6855_v3 }
 0x5cc   :  { %v8576_v42 = vpop.f32.mrf.mxu1 }
 0x5eb   :  { %v8594_v4 = vpop.f32.mrf.mxu0 }
 0x5ed   :  { %v8595_v51 = vpop.f32.mrf.mxu0 }
 0x5ee   :  { %v8596_v56 = vadd.f32 %v8595_v51, %v8594_v4 }
 0x5ef   :  { %v8597_v12 = vpop.f32.mrf.mxu0 }
 0x5f0   :  { %v7407_v8 = vadd.f32 %v8596_v56, %v8574_v45 }
 0x5f1   :  { %v8598_v60 = vpop.f32.mrf.mxu0 }
 0x630   :  { %v8616_v9 = vpop.f32.mrf.mxu1 }
 0x632   :  { %v8617_v15 = vpop.f32.mrf.mxu1 }
 0x633   :  { %v8618_v16 = vadd.f32 %v8617_v15, %v8616_v9 }
 0x634   :  { %v8619_v14 = vpop.f32.mrf.mxu1 }
 0x635   :  { %v7447_v57 = vadd.f32 %v8618_v16, %v7407_v8 }
 0x636   :  { %v8620_v50 = vpop.f32.mrf.mxu1 }
 0x68b   :  { %v7486_v59 = vpop.f32.mrf.mxu0 }
 0x68c   :  { %v7487_v19 = vadd.f32 %v7486_v59, %v7447_v57 }
 0x68d   :  { %v7488_v11 = vpop.f32.mrf.mxu0 }
 0x68e   :  { %v7499_v20 = vadd.f32 %v8411_v17, %v7487_v19 }
 0x68f   :  { %v7489_v22 = vpop.f32.mrf.mxu0 }
 0x690   :  { %v8412_v24 = vmul.f32 -1.442695, %v7499_v20 }
 0x691   :  { %v7490_v27 = vpop.f32.mrf.mxu0 }
 0x692   :  { %9409 = vpow2.f32 %v8412_v24 }
 0x69f   :  { %v9410_v28 = vpop.eup %9409 }
 0x6a0   :  { %v7503_v29 = vadd.f32 1.0, %v9410_v28 }
 0x6a2   :  { %9411 = vrcp.f32 %v7503_v29 }
 0x6af   :  { %v9412_v30 = vpop.eup %9411 }
 0x6b0   :  { %7507 = vst.msk [vmem:[%s12444_s11] sm:$0xff] %vm7506_vm6, %v9412_v30 }

</bundles_post_ra>
